<compile_context>
chip_gen: v5e
topology: v5e:2x2
jax: 0.10.0
libtpu: 0.0.40
codegen_flags: <defaults>
</compile_context>

<pallas_src>
import jax
import jax.numpy as jnp
from jax.experimental import pallas as pl
from jax.experimental.pallas import tpu as pltpu

CNN_FEATURES = 256          # cnn_features in the PyTorch script
LSTM_HIDDEN = 32            # lstm_hidden
BACKBONE_FEATURES = 1280    # EfficientNet-b0 _fc.in_features


def _pick_cnn_tile(n):
    """Rows of N = B*T processed per grid step.

    One big tile by default (fewer grid steps -> less fixed per-step overhead,
    weights stay resident); two tiles on v7x so both TensorCores get work via
    the "parallel" grid axis.  Large N is capped per tile to stay MXU/VMEM
    friendly (128 rows on v5e, 256 on v6e/v7x).
    """
    kind = ""
    try:
        kind = jax.devices()[0].device_kind.lower()
    except Exception:
        pass
    cap = 128 if "v5" in kind else 256
    tile = n
    if "v7" in kind and n % 16 == 0:
        tile = n // 2                    # one tile per TensorCore
    while tile > cap and tile % 2 == 0:
        tile //= 2
    if n % tile != 0 or (tile != n and tile % 8 != 0):
        tile = n                         # fall back to a single full tile
    return tile


# ----------------------- CNN (+ fused LSTM input proj) -----------------------
def cnn_gates_kernel(x_ref, wmap_ref, bmap_ref, wback_ref, bback_ref,
                     wfc_ref, bfc_ref, wih0_ref, b0_ref, gates_ref):
    # x_ref: [C=4, TN, HW] f32 -- channel-major, spatial axis on lanes.
    hw = x_ref.shape[2]
    inv_hw = 1.0 / float(hw)

    xc = [x_ref[c] for c in range(4)]                 # 4 x [TN, HW] contiguous

    # 1x1 conv (4 -> 3) + ReLU + global average pool: VPU weighted sums with
    # SMEM scalar weights, then an XLU lane reduction.  No MXU, no 3-lane tiles.
    pooled = []
    for j in range(3):
        acc = xc[0] * wmap_ref[j, 0]
        for c in range(1, 4):
            acc = acc + xc[c] * wmap_ref[j, c]
        y = jnp.maximum(acc + bmap_ref[j], 0.0)                     # [TN, HW]
        pooled.append(jnp.sum(y, axis=-1, keepdims=True) * inv_hw)  # [TN, 1]

    # TODO(synk): the pretrained EfficientNet-b0 MBConv backbone has no clean
    # single-kernel Pallas equivalent; it is replaced by a deterministic
    # 3 -> 1280 linear + ReLU stand-in producing the same feature width.
    wback = wback_ref[...]                                          # [3, 1280]
    feat = (bback_ref[...]
            + pooled[0] * wback[0:1, :]
            + pooled[1] * wback[1:2, :]
            + pooled[2] * wback[2:3, :])
    feat = jnp.maximum(feat, 0.0)                                   # [TN, 1280]

    # Replaced `net._fc` (1280 -> 256): bf16 operands on the MXU, f32 accumulate.
    c_out = (jnp.dot(feat.astype(jnp.bfloat16), wfc_ref[...],
                     preferred_element_type=jnp.float32)
             + bfc_ref[...])                                        # [TN, 256]

    # Fused LSTM layer-0 input projection (hoisted off the recurrent path):
    # gates_in = c_out @ W_ih0^T + (b_ih0 + b_hh0), bf16 operands on the MXU.
    gates_ref[...] = (jnp.dot(c_out.astype(jnp.bfloat16), wih0_ref[...],
                              preferred_element_type=jnp.float32)
                      + b0_ref[...])                                # [TN, 128]


def cnn_gates_forward(x_cm, p):
    """x_cm: [C, N, HW] f32  ->  gates_in: [N, 4*LSTM_HIDDEN] f32 (b-major rows)."""
    c, n, hw = x_cm.shape
    tile_n = _pick_cnn_tile(n)
    grid_n = n // tile_n
    g4h = 4 * LSTM_HIDDEN

    smem_spec = pl.BlockSpec(memory_space=pltpu.MemorySpace.SMEM)

    return pl.pallas_call(
        cnn_gates_kernel,
        out_shape=jax.ShapeDtypeStruct((n, g4h), jnp.float32),
        grid_spec=pltpu.PrefetchScalarGridSpec(
            num_scalar_prefetch=0,
            grid=(grid_n,),
            in_specs=[
                pl.BlockSpec((c, tile_n, hw), lambda i: (0, i, 0)),          # x tile
                smem_spec,                                                   # wmap [3,4]
                smem_spec,                                                   # bmap [3]
                pl.BlockSpec((3, BACKBONE_FEATURES), lambda i: (0, 0)),      # wbackT
                pl.BlockSpec((1, BACKBONE_FEATURES), lambda i: (0, 0)),      # bback
                pl.BlockSpec((BACKBONE_FEATURES, CNN_FEATURES),
                             lambda i: (0, 0)),                              # wfcT (bf16)
                pl.BlockSpec((1, CNN_FEATURES), lambda i: (0, 0)),           # bfc
                pl.BlockSpec((CNN_FEATURES, g4h), lambda i: (0, 0)),         # wih0T (bf16)
                pl.BlockSpec((1, g4h), lambda i: (0, 0)),                    # b0
            ],
            out_specs=pl.BlockSpec((tile_n, g4h), lambda i: (i, 0)),
        ),
        compiler_params=pltpu.CompilerParams(
            dimension_semantics=("parallel",)),
    )(x_cm, p["wmap"], p["bmap"], p["wbackT"], p["bback"],
      p["wfcT"], p["bfc"], p["wih0T"], p["b0"])


# ------------------------------ LSTM + final FC ------------------------------
def lstm_fc_kernel(gates_ref, whh0_ref, wih1_ref, whh1_ref, b1_ref,
                   wfc_ref, bfc_ref, o_ref, gts0_ref, h1seq_ref, gts1_ref):
    # gates_ref: [B, T, 4H] precomputed layer-0 gate pre-activations (b-major,
    # straight from the CNN kernel -- no XLA transpose in between).
    B, T, G = gates_ref.shape
    H = LSTM_HIDDEN

    whh0 = whh0_ref[...]          # bf16 [H, G]
    wih1 = wih1_ref[...]          # bf16 [H, G]
    whh1 = whh1_ref[...]          # bf16 [H, G]
    b1 = b1_ref[...]              # f32  [1, G]

    # Time-major re-ordering happens in VMEM (tiny: T*B*G f32), not in XLA/HBM.
    gts0_ref[...] = jnp.transpose(gates_ref[...], (1, 0, 2))        # [T, B, G]

    # Full-width gate nonlinearity with a SINGLE transcendental per gate vector:
    # sigmoid(x) = 0.5*(1 + tanh(x/2)).  PyTorch gate order: i, f, g, o.
    lane = jax.lax.broadcasted_iota(jnp.int32, (B, G), 1)
    tanh_lane = (lane >= 2 * H) & (lane < 3 * H)

    def gate_act(g):
        t = jnp.tanh(jnp.where(tanh_lane, g, 0.5 * g))
        return jnp.where(tanh_lane, t, 0.5 * t + 0.5)

    def combine(act, c_prev):
        i = act[:, 0 * H:1 * H]
        f = act[:, 1 * H:2 * H]
        g = act[:, 2 * H:3 * H]
        o = act[:, 3 * H:4 * H]
        c_new = f * c_prev + i * g
        h_new = o * jnp.tanh(c_new)
        return h_new, c_new

    z = jnp.zeros((B, H), jnp.float32)
    unroll = T <= 16

    # ---- layer 0: serial recurrence; stash h1[t] for the batched layer-1 proj.
    def step0(t, carry):
        h1, c1 = carry
        g0 = gts0_ref[t] + jnp.dot(h1.astype(jnp.bfloat16), whh0,
                                   preferred_element_type=jnp.float32)
        h1, c1 = combine(gate_act(g0), c1)
        h1seq_ref[t] = h1
        return h1, c1

    jax.lax.fori_loop(0, T, step0, (z, z), unroll=unroll)

    # ---- layer-1 input projection for ALL timesteps: one batched MXU matmul
    # (removes T serial dots from the recurrent critical path).
    h1_all = h1seq_ref[...].reshape(T * B, H).astype(jnp.bfloat16)
    gts1_ref[...] = (jnp.dot(h1_all, wih1, preferred_element_type=jnp.float32)
                     + b1).reshape(T, B, G)

    # ---- layer 1: serial recurrence.
    def step1(t, carry):
        h2, c2 = carry
        g1 = gts1_ref[t] + jnp.dot(h2.astype(jnp.bfloat16), whh1,
                                   preferred_element_type=jnp.float32)
        return combine(gate_act(g1), c2)

    h2, _ = jax.lax.fori_loop(0, T, step1, (z, z), unroll=unroll)

    # ---- final fc on h_n of the last (2nd) LSTM layer.
    o_ref[...] = (jnp.dot(h2, wfc_ref[...], preferred_element_type=jnp.float32)
                  + bfc_ref[...])


def lstm_fc_forward(gates_bm, p):
    B, T, G = gates_bm.shape
    H = LSTM_HIDDEN
    return pl.pallas_call(
        lstm_fc_kernel,
        out_shape=jax.ShapeDtypeStruct((B, 1), jnp.float32),
        scratch_shapes=[
            pltpu.VMEM((T, B, G), jnp.float32),   # time-major layer-0 gates
            pltpu.VMEM((T, B, H), jnp.float32),   # h1 sequence
            pltpu.VMEM((T, B, G), jnp.float32),   # layer-1 gate pre-activations
        ],
    )(gates_bm, p["whh0T"], p["wih1T"], p["whh1T"], p["b1"],
      p["wfc_lstmT"], p["bfc_lstm"])


# --------------------------------- parameters --------------------------------
def init_params(key):
    ks = jax.random.split(key, 14)
    s = 0.05
    H = LSTM_HIDDEN
    f32 = jnp.float32
    bf16 = jnp.bfloat16
    p = {
        # CNN.map : Conv2d(4, 3, kernel_size=1): weight [3,4], bias [3] (SMEM scalars)
        "wmap": (jax.random.normal(ks[0], (3, 4)) * s).astype(f32),
        "bmap": (jax.random.normal(ks[1], (3,)) * s).astype(f32),
        # stand-in backbone: 3 -> 1280 (see TODO in kernel)
        "wbackT": (jax.random.normal(ks[2], (3, BACKBONE_FEATURES)) * s).astype(f32),
        "bback": (jax.random.normal(ks[3], (1, BACKBONE_FEATURES)) * s).astype(f32),
        # replaced EfficientNet _fc: 1280 -> 256 (bf16 MXU operand)
        "wfcT": (jax.random.normal(ks[4], (BACKBONE_FEATURES, CNN_FEATURES)) * s
                 ).astype(bf16),
        "bfc": (jax.random.normal(ks[5], (1, CNN_FEATURES)) * s).astype(f32),
        # LSTM layer 0 (input 256) -- input projection fused into the CNN kernel
        "wih0T": (jax.random.normal(ks[6], (CNN_FEATURES, 4 * H)) * s).astype(bf16),
        "whh0T": (jax.random.normal(ks[7], (H, 4 * H)) * s).astype(bf16),
        "b0": (jax.random.normal(ks[8], (1, 4 * H)) * s).astype(f32),   # b_ih + b_hh
        # LSTM layer 1 (input 32)
        "wih1T": (jax.random.normal(ks[9], (H, 4 * H)) * s).astype(bf16),
        "whh1T": (jax.random.normal(ks[10], (H, 4 * H)) * s).astype(bf16),
        "b1": (jax.random.normal(ks[11], (1, 4 * H)) * s).astype(f32),
        # final fc: 32 -> 1
        "wfc_lstmT": (jax.random.normal(ks[12], (H, 1)) * s).astype(f32),
        "bfc_lstm": (jax.random.normal(ks[13], (1, 1)) * s).astype(f32),
    }
    return p


# --------------------------------- full model --------------------------------
def model_forward(x, params):
    B, T, C, H, W = x.shape
    N = B * T
    # Channel-major, lane-dense layout: [C, N, H*W] -- each channel slice is a
    # contiguous (8,128)-tiled slab inside the kernel.
    x_cm = jnp.transpose(x, (2, 0, 1, 3, 4)).reshape(C, N, H * W)

    gates = cnn_gates_forward(x_cm, params)                # [N, 4H], b-major rows
    gates_bm = gates.reshape(B, T, 4 * LSTM_HIDDEN)        # free metadata reshape
    return lstm_fc_forward(gates_bm, params)               # [B, 1]


if __name__ == "__main__":
    key = jax.random.PRNGKey(0)
    kx, kp = jax.random.split(key)
    B, T, C, H, W = 2, 8, 4, 16, 16
    x = jax.random.normal(kx, (B, T, C, H, W), dtype=jnp.float32)
    params = init_params(kp)

    out = jax.jit(model_forward)(x, params)
    jax.block_until_ready(out)
    assert out.shape == (B, 1) and out.dtype == jnp.float32
    print("KERNEL_OK")
</pallas_src>

<mosaic_0001>
module attributes {stable_mosaic.version = 11 : i64} {
  func.func @lstm_fc_kernel(%arg0: memref<2x8x128xf32, #tpu.memory_space<vmem>>, %arg1: memref<32x128xbf16, #tpu.memory_space<vmem>>, %arg2: memref<32x128xbf16, #tpu.memory_space<vmem>>, %arg3: memref<32x128xbf16, #tpu.memory_space<vmem>>, %arg4: memref<1x128xf32, #tpu.memory_space<vmem>>, %arg5: memref<32x1xf32, #tpu.memory_space<vmem>>, %arg6: memref<1x1xf32, #tpu.memory_space<vmem>>, %arg7: memref<2x1xf32, #tpu.memory_space<vmem>>, %arg8: memref<8x2x128xf32, #tpu.memory_space<vmem>>, %arg9: memref<8x2x32xf32, #tpu.memory_space<vmem>>, %arg10: memref<8x2x128xf32, #tpu.memory_space<vmem>>) attributes {dimension_semantics = [], scalar_prefetch = 0 : i64, scratch_operands = 3 : i64, tpu.core_type = #tpu.core_type<tc>} {
    %c0 = arith.constant 0 : index
    %c0_0 = arith.constant 0 : index
    %0 = vector.load %arg1[%c0, %c0_0] : memref<32x128xbf16, #tpu.memory_space<vmem>>, vector<32x128xbf16>
    %c0_1 = arith.constant 0 : index
    %c0_2 = arith.constant 0 : index
    %1 = vector.load %arg2[%c0_1, %c0_2] : memref<32x128xbf16, #tpu.memory_space<vmem>>, vector<32x128xbf16>
    %c0_3 = arith.constant 0 : index
    %c0_4 = arith.constant 0 : index
    %2 = vector.load %arg3[%c0_3, %c0_4] : memref<32x128xbf16, #tpu.memory_space<vmem>>, vector<32x128xbf16>
    %c0_5 = arith.constant 0 : index
    %c0_6 = arith.constant 0 : index
    %3 = vector.load %arg4[%c0_5, %c0_6] : memref<1x128xf32, #tpu.memory_space<vmem>>, vector<1x128xf32>
    %c0_7 = arith.constant 0 : index
    %c0_8 = arith.constant 0 : index
    %c0_9 = arith.constant 0 : index
    %4 = vector.load %arg0[%c0_7, %c0_8, %c0_9] : memref<2x8x128xf32, #tpu.memory_space<vmem>>, vector<2x8x128xf32>
    %5 = tpu.transpose %4, [1, 0, 2] : vector<2x8x128xf32> -> vector<8x2x128xf32>
    %c0_10 = arith.constant 0 : index
    %c0_11 = arith.constant 0 : index
    %c0_12 = arith.constant 0 : index
    %6 = vector.load %arg8[%c0_10, %c0_11, %c0_12] : memref<8x2x128xf32, #tpu.memory_space<vmem>>, vector<8x2x128xf32>
    tpu.vector_store %arg8[%c0_10, %c0_11, %c0_12], %5 {strides = array<i32>} : memref<8x2x128xf32, #tpu.memory_space<vmem>>, vector<8x2x128xf32>,
    %7 = tpu.iota {dimensions = array<i32: 1>} : vector<2x128xi32>
    %c64_i32 = arith.constant 64 : i32
    %8 = vector.broadcast %c64_i32 : i32 to vector<2x128xi32>
    %9 = arith.cmpi sge, %7, %8 : vector<2x128xi32>
    %c96_i32 = arith.constant 96 : i32
    %10 = vector.broadcast %c96_i32 : i32 to vector<2x128xi32>
    %11 = arith.cmpi slt, %7, %10 : vector<2x128xi32>
    %12 = arith.andi %9, %11 : vector<2x128xi1>
    %cst = arith.constant 0.000000e+00 : f32
    %13 = vector.broadcast %cst : f32 to vector<2x32xf32>
    %c0_i32 = arith.constant 0 : i32
    %14 = arith.index_cast %c0_i32 : i32 to index
    %c0_13 = arith.constant 0 : index
    %c0_14 = arith.constant 0 : index
    %15 = vector.load %arg8[%14, %c0_13, %c0_14] : memref<8x2x128xf32, #tpu.memory_space<vmem>>, vector<1x2x128xf32>
    %16 = vector.shape_cast %15 : vector<1x2x128xf32> to vector<2x128xf32>
    %17 = arith.truncf %13 : vector<2x32xf32> to vector<2x32xbf16>
    %cst_15 = arith.constant dense<0.000000e+00> : vector<2x128xf32>
    %18 = tpu.matmul %17, %0, %cst_15 {dimension_numbers = #tpu.dot_dimension_numbers<[1], [0], [0], [1], [0, 0, 1, 1], [], []>} : vector<2x32xbf16>, vector<32x128xbf16>, vector<2x128xf32> -> vector<2x128xf32>
    %19 = arith.addf %16, %18 : vector<2x128xf32>
    %cst_16 = arith.constant 5.000000e-01 : f32
    %20 = vector.broadcast %cst_16 : f32 to vector<2x128xf32>
    %21 = arith.mulf %20, %19 : vector<2x128xf32>
    %22 = arith.select %12, %19, %21 : vector<2x128xi1>, vector<2x128xf32>
    %23 = math.tanh %22 : vector<2x128xf32>
    %cst_17 = arith.constant 5.000000e-01 : f32
    %24 = vector.broadcast %cst_17 : f32 to vector<2x128xf32>
    %25 = arith.mulf %24, %23 : vector<2x128xf32>
    %cst_18 = arith.constant 5.000000e-01 : f32
    %26 = vector.broadcast %cst_18 : f32 to vector<2x128xf32>
    %27 = arith.addf %25, %26 : vector<2x128xf32>
    %28 = arith.select %12, %23, %27 : vector<2x128xi1>, vector<2x128xf32>
    %29 = vector.extract_strided_slice %28 {offsets = [0, 0], sizes = [2, 32], strides = [1, 1]} : vector<2x128xf32> to vector<2x32xf32>
    %30 = vector.extract_strided_slice %28 {offsets = [0, 32], sizes = [2, 32], strides = [1, 1]} : vector<2x128xf32> to vector<2x32xf32>
    %31 = vector.extract_strided_slice %28 {offsets = [0, 64], sizes = [2, 32], strides = [1, 1]} : vector<2x128xf32> to vector<2x32xf32>
    %32 = vector.extract_strided_slice %28 {offsets = [0, 96], sizes = [2, 32], strides = [1, 1]} : vector<2x128xf32> to vector<2x32xf32>
    %33 = arith.mulf %30, %13 : vector<2x32xf32>
    %34 = arith.mulf %29, %31 : vector<2x32xf32>
    %35 = arith.addf %33, %34 : vector<2x32xf32>
    %36 = math.tanh %35 : vector<2x32xf32>
    %37 = arith.mulf %32, %36 : vector<2x32xf32>
    %38 = arith.index_cast %c0_i32 : i32 to index
    %c0_19 = arith.constant 0 : index
    %c0_20 = arith.constant 0 : index
    %39 = vector.load %arg9[%38, %c0_19, %c0_20] : memref<8x2x32xf32, #tpu.memory_space<vmem>>, vector<1x2x32xf32>
    %40 = vector.shape_cast %39 : vector<1x2x32xf32> to vector<2x32xf32>
    %41 = vector.shape_cast %37 : vector<2x32xf32> to vector<1x2x32xf32>
    tpu.vector_store %arg9[%38, %c0_19, %c0_20], %41 {strides = array<i32>} : memref<8x2x32xf32, #tpu.memory_space<vmem>>, vector<1x2x32xf32>,
    %c1_i32 = arith.constant 1 : i32
    %42 = arith.index_cast %c1_i32 : i32 to index
    %c0_21 = arith.constant 0 : index
    %c0_22 = arith.constant 0 : index
    %43 = vector.load %arg8[%42, %c0_21, %c0_22] : memref<8x2x128xf32, #tpu.memory_space<vmem>>, vector<1x2x128xf32>
    %44 = vector.shape_cast %43 : vector<1x2x128xf32> to vector<2x128xf32>
    %45 = arith.truncf %37 : vector<2x32xf32> to vector<2x32xbf16>
    %cst_23 = arith.constant dense<0.000000e+00> : vector<2x128xf32>
    %46 = tpu.matmul %45, %0, %cst_23 {dimension_numbers = #tpu.dot_dimension_numbers<[1], [0], [0], [1], [0, 0, 1, 1], [], []>} : vector<2x32xbf16>, vector<32x128xbf16>, vector<2x128xf32> -> vector<2x128xf32>
    %47 = arith.addf %44, %46 : vector<2x128xf32>
    %cst_24 = arith.constant 5.000000e-01 : f32
    %48 = vector.broadcast %cst_24 : f32 to vector<2x128xf32>
    %49 = arith.mulf %48, %47 : vector<2x128xf32>
    %50 = arith.select %12, %47, %49 : vector<2x128xi1>, vector<2x128xf32>
    %51 = math.tanh %50 : vector<2x128xf32>
    %cst_25 = arith.constant 5.000000e-01 : f32
    %52 = vector.broadcast %cst_25 : f32 to vector<2x128xf32>
    %53 = arith.mulf %52, %51 : vector<2x128xf32>
    %cst_26 = arith.constant 5.000000e-01 : f32
    %54 = vector.broadcast %cst_26 : f32 to vector<2x128xf32>
    %55 = arith.addf %53, %54 : vector<2x128xf32>
    %56 = arith.select %12, %51, %55 : vector<2x128xi1>, vector<2x128xf32>
    %57 = vector.extract_strided_slice %56 {offsets = [0, 0], sizes = [2, 32], strides = [1, 1]} : vector<2x128xf32> to vector<2x32xf32>
    %58 = vector.extract_strided_slice %56 {offsets = [0, 32], sizes = [2, 32], strides = [1, 1]} : vector<2x128xf32> to vector<2x32xf32>
    %59 = vector.extract_strided_slice %56 {offsets = [0, 64], sizes = [2, 32], strides = [1, 1]} : vector<2x128xf32> to vector<2x32xf32>
    %60 = vector.extract_strided_slice %56 {offsets = [0, 96], sizes = [2, 32], strides = [1, 1]} : vector<2x128xf32> to vector<2x32xf32>
    %61 = arith.mulf %58, %35 : vector<2x32xf32>
    %62 = arith.mulf %57, %59 : vector<2x32xf32>
    %63 = arith.addf %61, %62 : vector<2x32xf32>
    %64 = math.tanh %63 : vector<2x32xf32>
    %65 = arith.mulf %60, %64 : vector<2x32xf32>
    %66 = arith.index_cast %c1_i32 : i32 to index
    %c0_27 = arith.constant 0 : index
    %c0_28 = arith.constant 0 : index
    %67 = vector.load %arg9[%66, %c0_27, %c0_28] : memref<8x2x32xf32, #tpu.memory_space<vmem>>, vector<1x2x32xf32>
    %68 = vector.shape_cast %67 : vector<1x2x32xf32> to vector<2x32xf32>
    %69 = vector.shape_cast %65 : vector<2x32xf32> to vector<1x2x32xf32>
    tpu.vector_store %arg9[%66, %c0_27, %c0_28], %69 {strides = array<i32>} : memref<8x2x32xf32, #tpu.memory_space<vmem>>, vector<1x2x32xf32>,
    %c2_i32 = arith.constant 2 : i32
    %70 = arith.index_cast %c2_i32 : i32 to index
    %c0_29 = arith.constant 0 : index
    %c0_30 = arith.constant 0 : index
    %71 = vector.load %arg8[%70, %c0_29, %c0_30] : memref<8x2x128xf32, #tpu.memory_space<vmem>>, vector<1x2x128xf32>
    %72 = vector.shape_cast %71 : vector<1x2x128xf32> to vector<2x128xf32>
    %73 = arith.truncf %65 : vector<2x32xf32> to vector<2x32xbf16>
    %cst_31 = arith.constant dense<0.000000e+00> : vector<2x128xf32>
    %74 = tpu.matmul %73, %0, %cst_31 {dimension_numbers = #tpu.dot_dimension_numbers<[1], [0], [0], [1], [0, 0, 1, 1], [], []>} : vector<2x32xbf16>, vector<32x128xbf16>, vector<2x128xf32> -> vector<2x128xf32>
    %75 = arith.addf %72, %74 : vector<2x128xf32>
    %cst_32 = arith.constant 5.000000e-01 : f32
    %76 = vector.broadcast %cst_32 : f32 to vector<2x128xf32>
    %77 = arith.mulf %76, %75 : vector<2x128xf32>
    %78 = arith.select %12, %75, %77 : vector<2x128xi1>, vector<2x128xf32>
    %79 = math.tanh %78 : vector<2x128xf32>
    %cst_33 = arith.constant 5.000000e-01 : f32
    %80 = vector.broadcast %cst_33 : f32 to vector<2x128xf32>
    %81 = arith.mulf %80, %79 : vector<2x128xf32>
    %cst_34 = arith.constant 5.000000e-01 : f32
    %82 = vector.broadcast %cst_34 : f32 to vector<2x128xf32>
    %83 = arith.addf %81, %82 : vector<2x128xf32>
    %84 = arith.select %12, %79, %83 : vector<2x128xi1>, vector<2x128xf32>
    %85 = vector.extract_strided_slice %84 {offsets = [0, 0], sizes = [2, 32], strides = [1, 1]} : vector<2x128xf32> to vector<2x32xf32>
    %86 = vector.extract_strided_slice %84 {offsets = [0, 32], sizes = [2, 32], strides = [1, 1]} : vector<2x128xf32> to vector<2x32xf32>
    %87 = vector.extract_strided_slice %84 {offsets = [0, 64], sizes = [2, 32], strides = [1, 1]} : vector<2x128xf32> to vector<2x32xf32>
    %88 = vector.extract_strided_slice %84 {offsets = [0, 96], sizes = [2, 32], strides = [1, 1]} : vector<2x128xf32> to vector<2x32xf32>
    %89 = arith.mulf %86, %63 : vector<2x32xf32>
    %90 = arith.mulf %85, %87 : vector<2x32xf32>
    %91 = arith.addf %89, %90 : vector<2x32xf32>
    %92 = math.tanh %91 : vector<2x32xf32>
    %93 = arith.mulf %88, %92 : vector<2x32xf32>
    %94 = arith.index_cast %c2_i32 : i32 to index
    %c0_35 = arith.constant 0 : index
    %c0_36 = arith.constant 0 : index
    %95 = vector.load %arg9[%94, %c0_35, %c0_36] : memref<8x2x32xf32, #tpu.memory_space<vmem>>, vector<1x2x32xf32>
    %96 = vector.shape_cast %95 : vector<1x2x32xf32> to vector<2x32xf32>
    %97 = vector.shape_cast %93 : vector<2x32xf32> to vector<1x2x32xf32>
    tpu.vector_store %arg9[%94, %c0_35, %c0_36], %97 {strides = array<i32>} : memref<8x2x32xf32, #tpu.memory_space<vmem>>, vector<1x2x32xf32>,
    %c3_i32 = arith.constant 3 : i32
    %98 = arith.index_cast %c3_i32 : i32 to index
    %c0_37 = arith.constant 0 : index
    %c0_38 = arith.constant 0 : index
    %99 = vector.load %arg8[%98, %c0_37, %c0_38] : memref<8x2x128xf32, #tpu.memory_space<vmem>>, vector<1x2x128xf32>
    %100 = vector.shape_cast %99 : vector<1x2x128xf32> to vector<2x128xf32>
    %101 = arith.truncf %93 : vector<2x32xf32> to vector<2x32xbf16>
    %cst_39 = arith.constant dense<0.000000e+00> : vector<2x128xf32>
    %102 = tpu.matmul %101, %0, %cst_39 {dimension_numbers = #tpu.dot_dimension_numbers<[1], [0], [0], [1], [0, 0, 1, 1], [], []>} : vector<2x32xbf16>, vector<32x128xbf16>, vector<2x128xf32> -> vector<2x128xf32>
    %103 = arith.addf %100, %102 : vector<2x128xf32>
    %cst_40 = arith.constant 5.000000e-01 : f32
    %104 = vector.broadcast %cst_40 : f32 to vector<2x128xf32>
    %105 = arith.mulf %104, %103 : vector<2x128xf32>
    %106 = arith.select %12, %103, %105 : vector<2x128xi1>, vector<2x128xf32>
    %107 = math.tanh %106 : vector<2x128xf32>
    %cst_41 = arith.constant 5.000000e-01 : f32
    %108 = vector.broadcast %cst_41 : f32 to vector<2x128xf32>
    %109 = arith.mulf %108, %107 : vector<2x128xf32>
    %cst_42 = arith.constant 5.000000e-01 : f32
    %110 = vector.broadcast %cst_42 : f32 to vector<2x128xf32>
    %111 = arith.addf %109, %110 : vector<2x128xf32>
    %112 = arith.select %12, %107, %111 : vector<2x128xi1>, vector<2x128xf32>
    %113 = vector.extract_strided_slice %112 {offsets = [0, 0], sizes = [2, 32], strides = [1, 1]} : vector<2x128xf32> to vector<2x32xf32>
    %114 = vector.extract_strided_slice %112 {offsets = [0, 32], sizes = [2, 32], strides = [1, 1]} : vector<2x128xf32> to vector<2x32xf32>
    %115 = vector.extract_strided_slice %112 {offsets = [0, 64], sizes = [2, 32], strides = [1, 1]} : vector<2x128xf32> to vector<2x32xf32>
    %116 = vector.extract_strided_slice %112 {offsets = [0, 96], sizes = [2, 32], strides = [1, 1]} : vector<2x128xf32> to vector<2x32xf32>
    %117 = arith.mulf %114, %91 : vector<2x32xf32>
    %118 = arith.mulf %113, %115 : vector<2x32xf32>
    %119 = arith.addf %117, %118 : vector<2x32xf32>
    %120 = math.tanh %119 : vector<2x32xf32>
    %121 = arith.mulf %116, %120 : vector<2x32xf32>
    %122 = arith.index_cast %c3_i32 : i32 to index
    %c0_43 = arith.constant 0 : index
    %c0_44 = arith.constant 0 : index
    %123 = vector.load %arg9[%122, %c0_43, %c0_44] : memref<8x2x32xf32, #tpu.memory_space<vmem>>, vector<1x2x32xf32>
    %124 = vector.shape_cast %123 : vector<1x2x32xf32> to vector<2x32xf32>
    %125 = vector.shape_cast %121 : vector<2x32xf32> to vector<1x2x32xf32>
    tpu.vector_store %arg9[%122, %c0_43, %c0_44], %125 {strides = array<i32>} : memref<8x2x32xf32, #tpu.memory_space<vmem>>, vector<1x2x32xf32>,
    %c4_i32 = arith.constant 4 : i32
    %126 = arith.index_cast %c4_i32 : i32 to index
    %c0_45 = arith.constant 0 : index
    %c0_46 = arith.constant 0 : index
    %127 = vector.load %arg8[%126, %c0_45, %c0_46] : memref<8x2x128xf32, #tpu.memory_space<vmem>>, vector<1x2x128xf32>
    %128 = vector.shape_cast %127 : vector<1x2x128xf32> to vector<2x128xf32>
    %129 = arith.truncf %121 : vector<2x32xf32> to vector<2x32xbf16>
    %cst_47 = arith.constant dense<0.000000e+00> : vector<2x128xf32>
    %130 = tpu.matmul %129, %0, %cst_47 {dimension_numbers = #tpu.dot_dimension_numbers<[1], [0], [0], [1], [0, 0, 1, 1], [], []>} : vector<2x32xbf16>, vector<32x128xbf16>, vector<2x128xf32> -> vector<2x128xf32>
    %131 = arith.addf %128, %130 : vector<2x128xf32>
    %cst_48 = arith.constant 5.000000e-01 : f32
    %132 = vector.broadcast %cst_48 : f32 to vector<2x128xf32>
    %133 = arith.mulf %132, %131 : vector<2x128xf32>
    %134 = arith.select %12, %131, %133 : vector<2x128xi1>, vector<2x128xf32>
    %135 = math.tanh %134 : vector<2x128xf32>
    %cst_49 = arith.constant 5.000000e-01 : f32
    %136 = vector.broadcast %cst_49 : f32 to vector<2x128xf32>
    %137 = arith.mulf %136, %135 : vector<2x128xf32>
    %cst_50 = arith.constant 5.000000e-01 : f32
    %138 = vector.broadcast %cst_50 : f32 to vector<2x128xf32>
    %139 = arith.addf %137, %138 : vector<2x128xf32>
    %140 = arith.select %12, %135, %139 : vector<2x128xi1>, vector<2x128xf32>
    %141 = vector.extract_strided_slice %140 {offsets = [0, 0], sizes = [2, 32], strides = [1, 1]} : vector<2x128xf32> to vector<2x32xf32>
    %142 = vector.extract_strided_slice %140 {offsets = [0, 32], sizes = [2, 32], strides = [1, 1]} : vector<2x128xf32> to vector<2x32xf32>
    %143 = vector.extract_strided_slice %140 {offsets = [0, 64], sizes = [2, 32], strides = [1, 1]} : vector<2x128xf32> to vector<2x32xf32>
    %144 = vector.extract_strided_slice %140 {offsets = [0, 96], sizes = [2, 32], strides = [1, 1]} : vector<2x128xf32> to vector<2x32xf32>
    %145 = arith.mulf %142, %119 : vector<2x32xf32>
    %146 = arith.mulf %141, %143 : vector<2x32xf32>
    %147 = arith.addf %145, %146 : vector<2x32xf32>
    %148 = math.tanh %147 : vector<2x32xf32>
    %149 = arith.mulf %144, %148 : vector<2x32xf32>
    %150 = arith.index_cast %c4_i32 : i32 to index
    %c0_51 = arith.constant 0 : index
    %c0_52 = arith.constant 0 : index
    %151 = vector.load %arg9[%150, %c0_51, %c0_52] : memref<8x2x32xf32, #tpu.memory_space<vmem>>, vector<1x2x32xf32>
    %152 = vector.shape_cast %151 : vector<1x2x32xf32> to vector<2x32xf32>
    %153 = vector.shape_cast %149 : vector<2x32xf32> to vector<1x2x32xf32>
    tpu.vector_store %arg9[%150, %c0_51, %c0_52], %153 {strides = array<i32>} : memref<8x2x32xf32, #tpu.memory_space<vmem>>, vector<1x2x32xf32>,
    %c5_i32 = arith.constant 5 : i32
    %154 = arith.index_cast %c5_i32 : i32 to index
    %c0_53 = arith.constant 0 : index
    %c0_54 = arith.constant 0 : index
    %155 = vector.load %arg8[%154, %c0_53, %c0_54] : memref<8x2x128xf32, #tpu.memory_space<vmem>>, vector<1x2x128xf32>
    %156 = vector.shape_cast %155 : vector<1x2x128xf32> to vector<2x128xf32>
    %157 = arith.truncf %149 : vector<2x32xf32> to vector<2x32xbf16>
    %cst_55 = arith.constant dense<0.000000e+00> : vector<2x128xf32>
    %158 = tpu.matmul %157, %0, %cst_55 {dimension_numbers = #tpu.dot_dimension_numbers<[1], [0], [0], [1], [0, 0, 1, 1], [], []>} : vector<2x32xbf16>, vector<32x128xbf16>, vector<2x128xf32> -> vector<2x128xf32>
    %159 = arith.addf %156, %158 : vector<2x128xf32>
    %cst_56 = arith.constant 5.000000e-01 : f32
    %160 = vector.broadcast %cst_56 : f32 to vector<2x128xf32>
    %161 = arith.mulf %160, %159 : vector<2x128xf32>
    %162 = arith.select %12, %159, %161 : vector<2x128xi1>, vector<2x128xf32>
    %163 = math.tanh %162 : vector<2x128xf32>
    %cst_57 = arith.constant 5.000000e-01 : f32
    %164 = vector.broadcast %cst_57 : f32 to vector<2x128xf32>
    %165 = arith.mulf %164, %163 : vector<2x128xf32>
    %cst_58 = arith.constant 5.000000e-01 : f32
    %166 = vector.broadcast %cst_58 : f32 to vector<2x128xf32>
    %167 = arith.addf %165, %166 : vector<2x128xf32>
    %168 = arith.select %12, %163, %167 : vector<2x128xi1>, vector<2x128xf32>
    %169 = vector.extract_strided_slice %168 {offsets = [0, 0], sizes = [2, 32], strides = [1, 1]} : vector<2x128xf32> to vector<2x32xf32>
    %170 = vector.extract_strided_slice %168 {offsets = [0, 32], sizes = [2, 32], strides = [1, 1]} : vector<2x128xf32> to vector<2x32xf32>
    %171 = vector.extract_strided_slice %168 {offsets = [0, 64], sizes = [2, 32], strides = [1, 1]} : vector<2x128xf32> to vector<2x32xf32>
    %172 = vector.extract_strided_slice %168 {offsets = [0, 96], sizes = [2, 32], strides = [1, 1]} : vector<2x128xf32> to vector<2x32xf32>
    %173 = arith.mulf %170, %147 : vector<2x32xf32>
    %174 = arith.mulf %169, %171 : vector<2x32xf32>
    %175 = arith.addf %173, %174 : vector<2x32xf32>
    %176 = math.tanh %175 : vector<2x32xf32>
    %177 = arith.mulf %172, %176 : vector<2x32xf32>
    %178 = arith.index_cast %c5_i32 : i32 to index
    %c0_59 = arith.constant 0 : index
    %c0_60 = arith.constant 0 : index
    %179 = vector.load %arg9[%178, %c0_59, %c0_60] : memref<8x2x32xf32, #tpu.memory_space<vmem>>, vector<1x2x32xf32>
    %180 = vector.shape_cast %179 : vector<1x2x32xf32> to vector<2x32xf32>
    %181 = vector.shape_cast %177 : vector<2x32xf32> to vector<1x2x32xf32>
    tpu.vector_store %arg9[%178, %c0_59, %c0_60], %181 {strides = array<i32>} : memref<8x2x32xf32, #tpu.memory_space<vmem>>, vector<1x2x32xf32>,
    %c6_i32 = arith.constant 6 : i32
    %182 = arith.index_cast %c6_i32 : i32 to index
    %c0_61 = arith.constant 0 : index
    %c0_62 = arith.constant 0 : index
    %183 = vector.load %arg8[%182, %c0_61, %c0_62] : memref<8x2x128xf32, #tpu.memory_space<vmem>>, vector<1x2x128xf32>
    %184 = vector.shape_cast %183 : vector<1x2x128xf32> to vector<2x128xf32>
    %185 = arith.truncf %177 : vector<2x32xf32> to vector<2x32xbf16>
    %cst_63 = arith.constant dense<0.000000e+00> : vector<2x128xf32>
    %186 = tpu.matmul %185, %0, %cst_63 {dimension_numbers = #tpu.dot_dimension_numbers<[1], [0], [0], [1], [0, 0, 1, 1], [], []>} : vector<2x32xbf16>, vector<32x128xbf16>, vector<2x128xf32> -> vector<2x128xf32>
    %187 = arith.addf %184, %186 : vector<2x128xf32>
    %cst_64 = arith.constant 5.000000e-01 : f32
    %188 = vector.broadcast %cst_64 : f32 to vector<2x128xf32>
    %189 = arith.mulf %188, %187 : vector<2x128xf32>
    %190 = arith.select %12, %187, %189 : vector<2x128xi1>, vector<2x128xf32>
    %191 = math.tanh %190 : vector<2x128xf32>
    %cst_65 = arith.constant 5.000000e-01 : f32
    %192 = vector.broadcast %cst_65 : f32 to vector<2x128xf32>
    %193 = arith.mulf %192, %191 : vector<2x128xf32>
    %cst_66 = arith.constant 5.000000e-01 : f32
    %194 = vector.broadcast %cst_66 : f32 to vector<2x128xf32>
    %195 = arith.addf %193, %194 : vector<2x128xf32>
    %196 = arith.select %12, %191, %195 : vector<2x128xi1>, vector<2x128xf32>
    %197 = vector.extract_strided_slice %196 {offsets = [0, 0], sizes = [2, 32], strides = [1, 1]} : vector<2x128xf32> to vector<2x32xf32>
    %198 = vector.extract_strided_slice %196 {offsets = [0, 32], sizes = [2, 32], strides = [1, 1]} : vector<2x128xf32> to vector<2x32xf32>
    %199 = vector.extract_strided_slice %196 {offsets = [0, 64], sizes = [2, 32], strides = [1, 1]} : vector<2x128xf32> to vector<2x32xf32>
    %200 = vector.extract_strided_slice %196 {offsets = [0, 96], sizes = [2, 32], strides = [1, 1]} : vector<2x128xf32> to vector<2x32xf32>
    %201 = arith.mulf %198, %175 : vector<2x32xf32>
    %202 = arith.mulf %197, %199 : vector<2x32xf32>
    %203 = arith.addf %201, %202 : vector<2x32xf32>
    %204 = math.tanh %203 : vector<2x32xf32>
    %205 = arith.mulf %200, %204 : vector<2x32xf32>
    %206 = arith.index_cast %c6_i32 : i32 to index
    %c0_67 = arith.constant 0 : index
    %c0_68 = arith.constant 0 : index
    %207 = vector.load %arg9[%206, %c0_67, %c0_68] : memref<8x2x32xf32, #tpu.memory_space<vmem>>, vector<1x2x32xf32>
    %208 = vector.shape_cast %207 : vector<1x2x32xf32> to vector<2x32xf32>
    %209 = vector.shape_cast %205 : vector<2x32xf32> to vector<1x2x32xf32>
    tpu.vector_store %arg9[%206, %c0_67, %c0_68], %209 {strides = array<i32>} : memref<8x2x32xf32, #tpu.memory_space<vmem>>, vector<1x2x32xf32>,
    %c7_i32 = arith.constant 7 : i32
    %210 = arith.index_cast %c7_i32 : i32 to index
    %c0_69 = arith.constant 0 : index
    %c0_70 = arith.constant 0 : index
    %211 = vector.load %arg8[%210, %c0_69, %c0_70] : memref<8x2x128xf32, #tpu.memory_space<vmem>>, vector<1x2x128xf32>
    %212 = vector.shape_cast %211 : vector<1x2x128xf32> to vector<2x128xf32>
    %213 = arith.truncf %205 : vector<2x32xf32> to vector<2x32xbf16>
    %cst_71 = arith.constant dense<0.000000e+00> : vector<2x128xf32>
    %214 = tpu.matmul %213, %0, %cst_71 {dimension_numbers = #tpu.dot_dimension_numbers<[1], [0], [0], [1], [0, 0, 1, 1], [], []>} : vector<2x32xbf16>, vector<32x128xbf16>, vector<2x128xf32> -> vector<2x128xf32>
    %215 = arith.addf %212, %214 : vector<2x128xf32>
    %cst_72 = arith.constant 5.000000e-01 : f32
    %216 = vector.broadcast %cst_72 : f32 to vector<2x128xf32>
    %217 = arith.mulf %216, %215 : vector<2x128xf32>
    %218 = arith.select %12, %215, %217 : vector<2x128xi1>, vector<2x128xf32>
    %219 = math.tanh %218 : vector<2x128xf32>
    %cst_73 = arith.constant 5.000000e-01 : f32
    %220 = vector.broadcast %cst_73 : f32 to vector<2x128xf32>
    %221 = arith.mulf %220, %219 : vector<2x128xf32>
    %cst_74 = arith.constant 5.000000e-01 : f32
    %222 = vector.broadcast %cst_74 : f32 to vector<2x128xf32>
    %223 = arith.addf %221, %222 : vector<2x128xf32>
    %224 = arith.select %12, %219, %223 : vector<2x128xi1>, vector<2x128xf32>
    %225 = vector.extract_strided_slice %224 {offsets = [0, 0], sizes = [2, 32], strides = [1, 1]} : vector<2x128xf32> to vector<2x32xf32>
    %226 = vector.extract_strided_slice %224 {offsets = [0, 32], sizes = [2, 32], strides = [1, 1]} : vector<2x128xf32> to vector<2x32xf32>
    %227 = vector.extract_strided_slice %224 {offsets = [0, 64], sizes = [2, 32], strides = [1, 1]} : vector<2x128xf32> to vector<2x32xf32>
    %228 = vector.extract_strided_slice %224 {offsets = [0, 96], sizes = [2, 32], strides = [1, 1]} : vector<2x128xf32> to vector<2x32xf32>
    %229 = arith.mulf %226, %203 : vector<2x32xf32>
    %230 = arith.mulf %225, %227 : vector<2x32xf32>
    %231 = arith.addf %229, %230 : vector<2x32xf32>
    %232 = math.tanh %231 : vector<2x32xf32>
    %233 = arith.mulf %228, %232 : vector<2x32xf32>
    %234 = arith.index_cast %c7_i32 : i32 to index
    %c0_75 = arith.constant 0 : index
    %c0_76 = arith.constant 0 : index
    %235 = vector.load %arg9[%234, %c0_75, %c0_76] : memref<8x2x32xf32, #tpu.memory_space<vmem>>, vector<1x2x32xf32>
    %236 = vector.shape_cast %235 : vector<1x2x32xf32> to vector<2x32xf32>
    %237 = vector.shape_cast %233 : vector<2x32xf32> to vector<1x2x32xf32>
    tpu.vector_store %arg9[%234, %c0_75, %c0_76], %237 {strides = array<i32>} : memref<8x2x32xf32, #tpu.memory_space<vmem>>, vector<1x2x32xf32>,
    %c8_i32 = arith.constant 8 : i32
    %c0_77 = arith.constant 0 : index
    %c0_78 = arith.constant 0 : index
    %c0_79 = arith.constant 0 : index
    %238 = vector.load %arg9[%c0_77, %c0_78, %c0_79] : memref<8x2x32xf32, #tpu.memory_space<vmem>>, vector<8x2x32xf32>
    %239 = vector.shape_cast %238 : vector<8x2x32xf32> to vector<16x32xf32>
    %240 = arith.truncf %239 : vector<16x32xf32> to vector<16x32xbf16>
    %cst_80 = arith.constant dense<0.000000e+00> : vector<16x128xf32>
    %241 = tpu.matmul %240, %1, %cst_80 {dimension_numbers = #tpu.dot_dimension_numbers<[1], [0], [0], [1], [0, 0, 1, 1], [], []>} : vector<16x32xbf16>, vector<32x128xbf16>, vector<16x128xf32> -> vector<16x128xf32>
    %242 = vector.broadcast %3 : vector<1x128xf32> to vector<16x128xf32>
    %243 = arith.addf %241, %242 : vector<16x128xf32>
    %244 = vector.shape_cast %243 : vector<16x128xf32> to vector<8x2x128xf32>
    %c0_81 = arith.constant 0 : index
    %c0_82 = arith.constant 0 : index
    %c0_83 = arith.constant 0 : index
    %245 = vector.load %arg10[%c0_81, %c0_82, %c0_83] : memref<8x2x128xf32, #tpu.memory_space<vmem>>, vector<8x2x128xf32>
    tpu.vector_store %arg10[%c0_81, %c0_82, %c0_83], %244 {strides = array<i32>} : memref<8x2x128xf32, #tpu.memory_space<vmem>>, vector<8x2x128xf32>,
    %c0_i32_84 = arith.constant 0 : i32
    %246 = arith.index_cast %c0_i32_84 : i32 to index
    %c0_85 = arith.constant 0 : index
    %c0_86 = arith.constant 0 : index
    %247 = vector.load %arg10[%246, %c0_85, %c0_86] : memref<8x2x128xf32, #tpu.memory_space<vmem>>, vector<1x2x128xf32>
    %248 = vector.shape_cast %247 : vector<1x2x128xf32> to vector<2x128xf32>
    %249 = arith.truncf %13 : vector<2x32xf32> to vector<2x32xbf16>
    %cst_87 = arith.constant dense<0.000000e+00> : vector<2x128xf32>
    %250 = tpu.matmul %249, %2, %cst_87 {dimension_numbers = #tpu.dot_dimension_numbers<[1], [0], [0], [1], [0, 0, 1, 1], [], []>} : vector<2x32xbf16>, vector<32x128xbf16>, vector<2x128xf32> -> vector<2x128xf32>
    %251 = arith.addf %248, %250 : vector<2x128xf32>
    %cst_88 = arith.constant 5.000000e-01 : f32
    %252 = vector.broadcast %cst_88 : f32 to vector<2x128xf32>
    %253 = arith.mulf %252, %251 : vector<2x128xf32>
    %254 = arith.select %12, %251, %253 : vector<2x128xi1>, vector<2x128xf32>
    %255 = math.tanh %254 : vector<2x128xf32>
    %cst_89 = arith.constant 5.000000e-01 : f32
    %256 = vector.broadcast %cst_89 : f32 to vector<2x128xf32>
    %257 = arith.mulf %256, %255 : vector<2x128xf32>
    %cst_90 = arith.constant 5.000000e-01 : f32
    %258 = vector.broadcast %cst_90 : f32 to vector<2x128xf32>
    %259 = arith.addf %257, %258 : vector<2x128xf32>
    %260 = arith.select %12, %255, %259 : vector<2x128xi1>, vector<2x128xf32>
    %261 = vector.extract_strided_slice %260 {offsets = [0, 0], sizes = [2, 32], strides = [1, 1]} : vector<2x128xf32> to vector<2x32xf32>
    %262 = vector.extract_strided_slice %260 {offsets = [0, 32], sizes = [2, 32], strides = [1, 1]} : vector<2x128xf32> to vector<2x32xf32>
    %263 = vector.extract_strided_slice %260 {offsets = [0, 64], sizes = [2, 32], strides = [1, 1]} : vector<2x128xf32> to vector<2x32xf32>
    %264 = vector.extract_strided_slice %260 {offsets = [0, 96], sizes = [2, 32], strides = [1, 1]} : vector<2x128xf32> to vector<2x32xf32>
    %265 = arith.mulf %262, %13 : vector<2x32xf32>
    %266 = arith.mulf %261, %263 : vector<2x32xf32>
    %267 = arith.addf %265, %266 : vector<2x32xf32>
    %268 = math.tanh %267 : vector<2x32xf32>
    %269 = arith.mulf %264, %268 : vector<2x32xf32>
    %c1_i32_91 = arith.constant 1 : i32
    %270 = arith.index_cast %c1_i32_91 : i32 to index
    %c0_92 = arith.constant 0 : index
    %c0_93 = arith.constant 0 : index
    %271 = vector.load %arg10[%270, %c0_92, %c0_93] : memref<8x2x128xf32, #tpu.memory_space<vmem>>, vector<1x2x128xf32>
    %272 = vector.shape_cast %271 : vector<1x2x128xf32> to vector<2x128xf32>
    %273 = arith.truncf %269 : vector<2x32xf32> to vector<2x32xbf16>
    %cst_94 = arith.constant dense<0.000000e+00> : vector<2x128xf32>
    %274 = tpu.matmul %273, %2, %cst_94 {dimension_numbers = #tpu.dot_dimension_numbers<[1], [0], [0], [1], [0, 0, 1, 1], [], []>} : vector<2x32xbf16>, vector<32x128xbf16>, vector<2x128xf32> -> vector<2x128xf32>
    %275 = arith.addf %272, %274 : vector<2x128xf32>
    %cst_95 = arith.constant 5.000000e-01 : f32
    %276 = vector.broadcast %cst_95 : f32 to vector<2x128xf32>
    %277 = arith.mulf %276, %275 : vector<2x128xf32>
    %278 = arith.select %12, %275, %277 : vector<2x128xi1>, vector<2x128xf32>
    %279 = math.tanh %278 : vector<2x128xf32>
    %cst_96 = arith.constant 5.000000e-01 : f32
    %280 = vector.broadcast %cst_96 : f32 to vector<2x128xf32>
    %281 = arith.mulf %280, %279 : vector<2x128xf32>
    %cst_97 = arith.constant 5.000000e-01 : f32
    %282 = vector.broadcast %cst_97 : f32 to vector<2x128xf32>
    %283 = arith.addf %281, %282 : vector<2x128xf32>
    %284 = arith.select %12, %279, %283 : vector<2x128xi1>, vector<2x128xf32>
    %285 = vector.extract_strided_slice %284 {offsets = [0, 0], sizes = [2, 32], strides = [1, 1]} : vector<2x128xf32> to vector<2x32xf32>
    %286 = vector.extract_strided_slice %284 {offsets = [0, 32], sizes = [2, 32], strides = [1, 1]} : vector<2x128xf32> to vector<2x32xf32>
    %287 = vector.extract_strided_slice %284 {offsets = [0, 64], sizes = [2, 32], strides = [1, 1]} : vector<2x128xf32> to vector<2x32xf32>
    %288 = vector.extract_strided_slice %284 {offsets = [0, 96], sizes = [2, 32], strides = [1, 1]} : vector<2x128xf32> to vector<2x32xf32>
    %289 = arith.mulf %286, %267 : vector<2x32xf32>
    %290 = arith.mulf %285, %287 : vector<2x32xf32>
    %291 = arith.addf %289, %290 : vector<2x32xf32>
    %292 = math.tanh %291 : vector<2x32xf32>
    %293 = arith.mulf %288, %292 : vector<2x32xf32>
    %c2_i32_98 = arith.constant 2 : i32
    %294 = arith.index_cast %c2_i32_98 : i32 to index
    %c0_99 = arith.constant 0 : index
    %c0_100 = arith.constant 0 : index
    %295 = vector.load %arg10[%294, %c0_99, %c0_100] : memref<8x2x128xf32, #tpu.memory_space<vmem>>, vector<1x2x128xf32>
    %296 = vector.shape_cast %295 : vector<1x2x128xf32> to vector<2x128xf32>
    %297 = arith.truncf %293 : vector<2x32xf32> to vector<2x32xbf16>
    %cst_101 = arith.constant dense<0.000000e+00> : vector<2x128xf32>
    %298 = tpu.matmul %297, %2, %cst_101 {dimension_numbers = #tpu.dot_dimension_numbers<[1], [0], [0], [1], [0, 0, 1, 1], [], []>} : vector<2x32xbf16>, vector<32x128xbf16>, vector<2x128xf32> -> vector<2x128xf32>
    %299 = arith.addf %296, %298 : vector<2x128xf32>
    %cst_102 = arith.constant 5.000000e-01 : f32
    %300 = vector.broadcast %cst_102 : f32 to vector<2x128xf32>
    %301 = arith.mulf %300, %299 : vector<2x128xf32>
    %302 = arith.select %12, %299, %301 : vector<2x128xi1>, vector<2x128xf32>
    %303 = math.tanh %302 : vector<2x128xf32>
    %cst_103 = arith.constant 5.000000e-01 : f32
    %304 = vector.broadcast %cst_103 : f32 to vector<2x128xf32>
    %305 = arith.mulf %304, %303 : vector<2x128xf32>
    %cst_104 = arith.constant 5.000000e-01 : f32
    %306 = vector.broadcast %cst_104 : f32 to vector<2x128xf32>
    %307 = arith.addf %305, %306 : vector<2x128xf32>
    %308 = arith.select %12, %303, %307 : vector<2x128xi1>, vector<2x128xf32>
    %309 = vector.extract_strided_slice %308 {offsets = [0, 0], sizes = [2, 32], strides = [1, 1]} : vector<2x128xf32> to vector<2x32xf32>
    %310 = vector.extract_strided_slice %308 {offsets = [0, 32], sizes = [2, 32], strides = [1, 1]} : vector<2x128xf32> to vector<2x32xf32>
    %311 = vector.extract_strided_slice %308 {offsets = [0, 64], sizes = [2, 32], strides = [1, 1]} : vector<2x128xf32> to vector<2x32xf32>
    %312 = vector.extract_strided_slice %308 {offsets = [0, 96], sizes = [2, 32], strides = [1, 1]} : vector<2x128xf32> to vector<2x32xf32>
    %313 = arith.mulf %310, %291 : vector<2x32xf32>
    %314 = arith.mulf %309, %311 : vector<2x32xf32>
    %315 = arith.addf %313, %314 : vector<2x32xf32>
    %316 = math.tanh %315 : vector<2x32xf32>
    %317 = arith.mulf %312, %316 : vector<2x32xf32>
    %c3_i32_105 = arith.constant 3 : i32
    %318 = arith.index_cast %c3_i32_105 : i32 to index
    %c0_106 = arith.constant 0 : index
    %c0_107 = arith.constant 0 : index
    %319 = vector.load %arg10[%318, %c0_106, %c0_107] : memref<8x2x128xf32, #tpu.memory_space<vmem>>, vector<1x2x128xf32>
    %320 = vector.shape_cast %319 : vector<1x2x128xf32> to vector<2x128xf32>
    %321 = arith.truncf %317 : vector<2x32xf32> to vector<2x32xbf16>
    %cst_108 = arith.constant dense<0.000000e+00> : vector<2x128xf32>
    %322 = tpu.matmul %321, %2, %cst_108 {dimension_numbers = #tpu.dot_dimension_numbers<[1], [0], [0], [1], [0, 0, 1, 1], [], []>} : vector<2x32xbf16>, vector<32x128xbf16>, vector<2x128xf32> -> vector<2x128xf32>
    %323 = arith.addf %320, %322 : vector<2x128xf32>
    %cst_109 = arith.constant 5.000000e-01 : f32
    %324 = vector.broadcast %cst_109 : f32 to vector<2x128xf32>
    %325 = arith.mulf %324, %323 : vector<2x128xf32>
    %326 = arith.select %12, %323, %325 : vector<2x128xi1>, vector<2x128xf32>
    %327 = math.tanh %326 : vector<2x128xf32>
    %cst_110 = arith.constant 5.000000e-01 : f32
    %328 = vector.broadcast %cst_110 : f32 to vector<2x128xf32>
    %329 = arith.mulf %328, %327 : vector<2x128xf32>
    %cst_111 = arith.constant 5.000000e-01 : f32
    %330 = vector.broadcast %cst_111 : f32 to vector<2x128xf32>
    %331 = arith.addf %329, %330 : vector<2x128xf32>
    %332 = arith.select %12, %327, %331 : vector<2x128xi1>, vector<2x128xf32>
    %333 = vector.extract_strided_slice %332 {offsets = [0, 0], sizes = [2, 32], strides = [1, 1]} : vector<2x128xf32> to vector<2x32xf32>
    %334 = vector.extract_strided_slice %332 {offsets = [0, 32], sizes = [2, 32], strides = [1, 1]} : vector<2x128xf32> to vector<2x32xf32>
    %335 = vector.extract_strided_slice %332 {offsets = [0, 64], sizes = [2, 32], strides = [1, 1]} : vector<2x128xf32> to vector<2x32xf32>
    %336 = vector.extract_strided_slice %332 {offsets = [0, 96], sizes = [2, 32], strides = [1, 1]} : vector<2x128xf32> to vector<2x32xf32>
    %337 = arith.mulf %334, %315 : vector<2x32xf32>
    %338 = arith.mulf %333, %335 : vector<2x32xf32>
    %339 = arith.addf %337, %338 : vector<2x32xf32>
    %340 = math.tanh %339 : vector<2x32xf32>
    %341 = arith.mulf %336, %340 : vector<2x32xf32>
    %c4_i32_112 = arith.constant 4 : i32
    %342 = arith.index_cast %c4_i32_112 : i32 to index
    %c0_113 = arith.constant 0 : index
    %c0_114 = arith.constant 0 : index
    %343 = vector.load %arg10[%342, %c0_113, %c0_114] : memref<8x2x128xf32, #tpu.memory_space<vmem>>, vector<1x2x128xf32>
    %344 = vector.shape_cast %343 : vector<1x2x128xf32> to vector<2x128xf32>
    %345 = arith.truncf %341 : vector<2x32xf32> to vector<2x32xbf16>
    %cst_115 = arith.constant dense<0.000000e+00> : vector<2x128xf32>
    %346 = tpu.matmul %345, %2, %cst_115 {dimension_numbers = #tpu.dot_dimension_numbers<[1], [0], [0], [1], [0, 0, 1, 1], [], []>} : vector<2x32xbf16>, vector<32x128xbf16>, vector<2x128xf32> -> vector<2x128xf32>
    %347 = arith.addf %344, %346 : vector<2x128xf32>
    %cst_116 = arith.constant 5.000000e-01 : f32
    %348 = vector.broadcast %cst_116 : f32 to vector<2x128xf32>
    %349 = arith.mulf %348, %347 : vector<2x128xf32>
    %350 = arith.select %12, %347, %349 : vector<2x128xi1>, vector<2x128xf32>
    %351 = math.tanh %350 : vector<2x128xf32>
    %cst_117 = arith.constant 5.000000e-01 : f32
    %352 = vector.broadcast %cst_117 : f32 to vector<2x128xf32>
    %353 = arith.mulf %352, %351 : vector<2x128xf32>
    %cst_118 = arith.constant 5.000000e-01 : f32
    %354 = vector.broadcast %cst_118 : f32 to vector<2x128xf32>
    %355 = arith.addf %353, %354 : vector<2x128xf32>
    %356 = arith.select %12, %351, %355 : vector<2x128xi1>, vector<2x128xf32>
    %357 = vector.extract_strided_slice %356 {offsets = [0, 0], sizes = [2, 32], strides = [1, 1]} : vector<2x128xf32> to vector<2x32xf32>
    %358 = vector.extract_strided_slice %356 {offsets = [0, 32], sizes = [2, 32], strides = [1, 1]} : vector<2x128xf32> to vector<2x32xf32>
    %359 = vector.extract_strided_slice %356 {offsets = [0, 64], sizes = [2, 32], strides = [1, 1]} : vector<2x128xf32> to vector<2x32xf32>
    %360 = vector.extract_strided_slice %356 {offsets = [0, 96], sizes = [2, 32], strides = [1, 1]} : vector<2x128xf32> to vector<2x32xf32>
    %361 = arith.mulf %358, %339 : vector<2x32xf32>
    %362 = arith.mulf %357, %359 : vector<2x32xf32>
    %363 = arith.addf %361, %362 : vector<2x32xf32>
    %364 = math.tanh %363 : vector<2x32xf32>
    %365 = arith.mulf %360, %364 : vector<2x32xf32>
    %c5_i32_119 = arith.constant 5 : i32
    %366 = arith.index_cast %c5_i32_119 : i32 to index
    %c0_120 = arith.constant 0 : index
    %c0_121 = arith.constant 0 : index
    %367 = vector.load %arg10[%366, %c0_120, %c0_121] : memref<8x2x128xf32, #tpu.memory_space<vmem>>, vector<1x2x128xf32>
    %368 = vector.shape_cast %367 : vector<1x2x128xf32> to vector<2x128xf32>
    %369 = arith.truncf %365 : vector<2x32xf32> to vector<2x32xbf16>
    %cst_122 = arith.constant dense<0.000000e+00> : vector<2x128xf32>
    %370 = tpu.matmul %369, %2, %cst_122 {dimension_numbers = #tpu.dot_dimension_numbers<[1], [0], [0], [1], [0, 0, 1, 1], [], []>} : vector<2x32xbf16>, vector<32x128xbf16>, vector<2x128xf32> -> vector<2x128xf32>
    %371 = arith.addf %368, %370 : vector<2x128xf32>
    %cst_123 = arith.constant 5.000000e-01 : f32
    %372 = vector.broadcast %cst_123 : f32 to vector<2x128xf32>
    %373 = arith.mulf %372, %371 : vector<2x128xf32>
    %374 = arith.select %12, %371, %373 : vector<2x128xi1>, vector<2x128xf32>
    %375 = math.tanh %374 : vector<2x128xf32>
    %cst_124 = arith.constant 5.000000e-01 : f32
    %376 = vector.broadcast %cst_124 : f32 to vector<2x128xf32>
    %377 = arith.mulf %376, %375 : vector<2x128xf32>
    %cst_125 = arith.constant 5.000000e-01 : f32
    %378 = vector.broadcast %cst_125 : f32 to vector<2x128xf32>
    %379 = arith.addf %377, %378 : vector<2x128xf32>
    %380 = arith.select %12, %375, %379 : vector<2x128xi1>, vector<2x128xf32>
    %381 = vector.extract_strided_slice %380 {offsets = [0, 0], sizes = [2, 32], strides = [1, 1]} : vector<2x128xf32> to vector<2x32xf32>
    %382 = vector.extract_strided_slice %380 {offsets = [0, 32], sizes = [2, 32], strides = [1, 1]} : vector<2x128xf32> to vector<2x32xf32>
    %383 = vector.extract_strided_slice %380 {offsets = [0, 64], sizes = [2, 32], strides = [1, 1]} : vector<2x128xf32> to vector<2x32xf32>
    %384 = vector.extract_strided_slice %380 {offsets = [0, 96], sizes = [2, 32], strides = [1, 1]} : vector<2x128xf32> to vector<2x32xf32>
    %385 = arith.mulf %382, %363 : vector<2x32xf32>
    %386 = arith.mulf %381, %383 : vector<2x32xf32>
    %387 = arith.addf %385, %386 : vector<2x32xf32>
    %388 = math.tanh %387 : vector<2x32xf32>
    %389 = arith.mulf %384, %388 : vector<2x32xf32>
    %c6_i32_126 = arith.constant 6 : i32
    %390 = arith.index_cast %c6_i32_126 : i32 to index
    %c0_127 = arith.constant 0 : index
    %c0_128 = arith.constant 0 : index
    %391 = vector.load %arg10[%390, %c0_127, %c0_128] : memref<8x2x128xf32, #tpu.memory_space<vmem>>, vector<1x2x128xf32>
    %392 = vector.shape_cast %391 : vector<1x2x128xf32> to vector<2x128xf32>
    %393 = arith.truncf %389 : vector<2x32xf32> to vector<2x32xbf16>
    %cst_129 = arith.constant dense<0.000000e+00> : vector<2x128xf32>
    %394 = tpu.matmul %393, %2, %cst_129 {dimension_numbers = #tpu.dot_dimension_numbers<[1], [0], [0], [1], [0, 0, 1, 1], [], []>} : vector<2x32xbf16>, vector<32x128xbf16>, vector<2x128xf32> -> vector<2x128xf32>
    %395 = arith.addf %392, %394 : vector<2x128xf32>
    %cst_130 = arith.constant 5.000000e-01 : f32
    %396 = vector.broadcast %cst_130 : f32 to vector<2x128xf32>
    %397 = arith.mulf %396, %395 : vector<2x128xf32>
    %398 = arith.select %12, %395, %397 : vector<2x128xi1>, vector<2x128xf32>
    %399 = math.tanh %398 : vector<2x128xf32>
    %cst_131 = arith.constant 5.000000e-01 : f32
    %400 = vector.broadcast %cst_131 : f32 to vector<2x128xf32>
    %401 = arith.mulf %400, %399 : vector<2x128xf32>
    %cst_132 = arith.constant 5.000000e-01 : f32
    %402 = vector.broadcast %cst_132 : f32 to vector<2x128xf32>
    %403 = arith.addf %401, %402 : vector<2x128xf32>
    %404 = arith.select %12, %399, %403 : vector<2x128xi1>, vector<2x128xf32>
    %405 = vector.extract_strided_slice %404 {offsets = [0, 0], sizes = [2, 32], strides = [1, 1]} : vector<2x128xf32> to vector<2x32xf32>
    %406 = vector.extract_strided_slice %404 {offsets = [0, 32], sizes = [2, 32], strides = [1, 1]} : vector<2x128xf32> to vector<2x32xf32>
    %407 = vector.extract_strided_slice %404 {offsets = [0, 64], sizes = [2, 32], strides = [1, 1]} : vector<2x128xf32> to vector<2x32xf32>
    %408 = vector.extract_strided_slice %404 {offsets = [0, 96], sizes = [2, 32], strides = [1, 1]} : vector<2x128xf32> to vector<2x32xf32>
    %409 = arith.mulf %406, %387 : vector<2x32xf32>
    %410 = arith.mulf %405, %407 : vector<2x32xf32>
    %411 = arith.addf %409, %410 : vector<2x32xf32>
    %412 = math.tanh %411 : vector<2x32xf32>
    %413 = arith.mulf %408, %412 : vector<2x32xf32>
    %c7_i32_133 = arith.constant 7 : i32
    %414 = arith.index_cast %c7_i32_133 : i32 to index
    %c0_134 = arith.constant 0 : index
    %c0_135 = arith.constant 0 : index
    %415 = vector.load %arg10[%414, %c0_134, %c0_135] : memref<8x2x128xf32, #tpu.memory_space<vmem>>, vector<1x2x128xf32>
    %416 = vector.shape_cast %415 : vector<1x2x128xf32> to vector<2x128xf32>
    %417 = arith.truncf %413 : vector<2x32xf32> to vector<2x32xbf16>
    %cst_136 = arith.constant dense<0.000000e+00> : vector<2x128xf32>
    %418 = tpu.matmul %417, %2, %cst_136 {dimension_numbers = #tpu.dot_dimension_numbers<[1], [0], [0], [1], [0, 0, 1, 1], [], []>} : vector<2x32xbf16>, vector<32x128xbf16>, vector<2x128xf32> -> vector<2x128xf32>
    %419 = arith.addf %416, %418 : vector<2x128xf32>
    %cst_137 = arith.constant 5.000000e-01 : f32
    %420 = vector.broadcast %cst_137 : f32 to vector<2x128xf32>
    %421 = arith.mulf %420, %419 : vector<2x128xf32>
    %422 = arith.select %12, %419, %421 : vector<2x128xi1>, vector<2x128xf32>
    %423 = math.tanh %422 : vector<2x128xf32>
    %cst_138 = arith.constant 5.000000e-01 : f32
    %424 = vector.broadcast %cst_138 : f32 to vector<2x128xf32>
    %425 = arith.mulf %424, %423 : vector<2x128xf32>
    %cst_139 = arith.constant 5.000000e-01 : f32
    %426 = vector.broadcast %cst_139 : f32 to vector<2x128xf32>
    %427 = arith.addf %425, %426 : vector<2x128xf32>
    %428 = arith.select %12, %423, %427 : vector<2x128xi1>, vector<2x128xf32>
    %429 = vector.extract_strided_slice %428 {offsets = [0, 0], sizes = [2, 32], strides = [1, 1]} : vector<2x128xf32> to vector<2x32xf32>
    %430 = vector.extract_strided_slice %428 {offsets = [0, 32], sizes = [2, 32], strides = [1, 1]} : vector<2x128xf32> to vector<2x32xf32>
    %431 = vector.extract_strided_slice %428 {offsets = [0, 64], sizes = [2, 32], strides = [1, 1]} : vector<2x128xf32> to vector<2x32xf32>
    %432 = vector.extract_strided_slice %428 {offsets = [0, 96], sizes = [2, 32], strides = [1, 1]} : vector<2x128xf32> to vector<2x32xf32>
    %433 = arith.mulf %430, %411 : vector<2x32xf32>
    %434 = arith.mulf %429, %431 : vector<2x32xf32>
    %435 = arith.addf %433, %434 : vector<2x32xf32>
    %436 = math.tanh %435 : vector<2x32xf32>
    %437 = arith.mulf %432, %436 : vector<2x32xf32>
    %c8_i32_140 = arith.constant 8 : i32
    %c0_141 = arith.constant 0 : index
    %c0_142 = arith.constant 0 : index
    %438 = vector.load %arg5[%c0_141, %c0_142] : memref<32x1xf32, #tpu.memory_space<vmem>>, vector<32x1xf32>
    %cst_143 = arith.constant dense<0.000000e+00> : vector<2x1xf32>
    %439 = tpu.matmul %437, %438, %cst_143 {dimension_numbers = #tpu.dot_dimension_numbers<[1], [0], [0], [1], [0, 0, 1, 1], [], []>} : vector<2x32xf32>, vector<32x1xf32>, vector<2x1xf32> -> vector<2x1xf32>
    %c0_144 = arith.constant 0 : index
    %c0_145 = arith.constant 0 : index
    %440 = vector.load %arg6[%c0_144, %c0_145] : memref<1x1xf32, #tpu.memory_space<vmem>>, vector<1x1xf32>
    %441 = vector.broadcast %440 : vector<1x1xf32> to vector<2x1xf32>
    %442 = arith.addf %439, %441 : vector<2x1xf32>
    %c0_146 = arith.constant 0 : index
    %c0_147 = arith.constant 0 : index
    %443 = vector.load %arg7[%c0_146, %c0_147] : memref<2x1xf32, #tpu.memory_space<vmem>>, vector<2x1xf32>
    tpu.vector_store %arg7[%c0_146, %c0_147], %442 {strides = array<i32>} : memref<2x1xf32, #tpu.memory_space<vmem>>, vector<2x1xf32>,
    return
  }
}

module attributes {stable_mosaic.version = 11 : i64} {
  func.func @cnn_gates_kernel(%arg0: i32, %arg1: memref<4x16x256xf32, #tpu.memory_space<vmem>>, %arg2: memref<3x4xf32, #tpu.memory_space<smem>>, %arg3: memref<3xf32, #tpu.memory_space<smem>>, %arg4: memref<3x1280xf32, #tpu.memory_space<vmem>>, %arg5: memref<1x1280xf32, #tpu.memory_space<vmem>>, %arg6: memref<1280x256xbf16, #tpu.memory_space<vmem>>, %arg7: memref<1x256xf32, #tpu.memory_space<vmem>>, %arg8: memref<256x128xbf16, #tpu.memory_space<vmem>>, %arg9: memref<1x128xf32, #tpu.memory_space<vmem>>, %arg10: memref<16x128xf32, #tpu.memory_space<vmem>>) attributes {dimension_semantics = [#tpu.dimension_semantics<parallel>], iteration_bounds = array<i64: 1>, scalar_prefetch = 0 : i64, scratch_operands = 0 : i64, tpu.core_type = #tpu.core_type<tc>, window_params = [{transform_indices = @transform_0, window_bounds = array<i64: 4, 16, 256>}, {transform_indices = @transform_1, window_bounds = array<i64: 3, 4>}, {transform_indices = @transform_2, window_bounds = array<i64: 3>}, {pipeline_mode = #tpu.pipeline_mode<synchronous>, transform_indices = @transform_3, window_bounds = array<i64: 3, 1280>}, {pipeline_mode = #tpu.pipeline_mode<synchronous>, transform_indices = @transform_4, window_bounds = array<i64: 1, 1280>}, {pipeline_mode = #tpu.pipeline_mode<synchronous>, transform_indices = @transform_5, window_bounds = array<i64: 1280, 256>}, {pipeline_mode = #tpu.pipeline_mode<synchronous>, transform_indices = @transform_6, window_bounds = array<i64: 1, 256>}, {pipeline_mode = #tpu.pipeline_mode<synchronous>, transform_indices = @transform_7, window_bounds = array<i64: 256, 128>}, {pipeline_mode = #tpu.pipeline_mode<synchronous>, transform_indices = @transform_8, window_bounds = array<i64: 1, 128>}, {transform_indices = @transform_9, window_bounds = array<i64: 16, 128>}]} {
    %c0 = arith.constant 0 : index
    %c0_0 = arith.constant 0 : index
    %c0_1 = arith.constant 0 : index
    %0 = vector.load %arg1[%c0, %c0_0, %c0_1] : memref<4x16x256xf32, #tpu.memory_space<vmem>>, vector<1x16x256xf32>
    %1 = vector.shape_cast %0 : vector<1x16x256xf32> to vector<16x256xf32>
    %c1 = arith.constant 1 : index
    %c0_2 = arith.constant 0 : index
    %c0_3 = arith.constant 0 : index
    %2 = vector.load %arg1[%c1, %c0_2, %c0_3] : memref<4x16x256xf32, #tpu.memory_space<vmem>>, vector<1x16x256xf32>
    %3 = vector.shape_cast %2 : vector<1x16x256xf32> to vector<16x256xf32>
    %c2 = arith.constant 2 : index
    %c0_4 = arith.constant 0 : index
    %c0_5 = arith.constant 0 : index
    %4 = vector.load %arg1[%c2, %c0_4, %c0_5] : memref<4x16x256xf32, #tpu.memory_space<vmem>>, vector<1x16x256xf32>
    %5 = vector.shape_cast %4 : vector<1x16x256xf32> to vector<16x256xf32>
    %c3 = arith.constant 3 : index
    %c0_6 = arith.constant 0 : index
    %c0_7 = arith.constant 0 : index
    %6 = vector.load %arg1[%c3, %c0_6, %c0_7] : memref<4x16x256xf32, #tpu.memory_space<vmem>>, vector<1x16x256xf32>
    %7 = vector.shape_cast %6 : vector<1x16x256xf32> to vector<16x256xf32>
    %c0_8 = arith.constant 0 : index
    %c0_9 = arith.constant 0 : index
    %8 = memref.load %arg2[%c0_8, %c0_9] : memref<3x4xf32, #tpu.memory_space<smem>>
    %9 = vector.broadcast %8 : f32 to vector<16x256xf32>
    %10 = arith.mulf %1, %9 : vector<16x256xf32>
    %c0_10 = arith.constant 0 : index
    %c1_11 = arith.constant 1 : index
    %11 = memref.load %arg2[%c0_10, %c1_11] : memref<3x4xf32, #tpu.memory_space<smem>>
    %12 = vector.broadcast %11 : f32 to vector<16x256xf32>
    %13 = arith.mulf %3, %12 : vector<16x256xf32>
    %14 = arith.addf %10, %13 : vector<16x256xf32>
    %c0_12 = arith.constant 0 : index
    %c2_13 = arith.constant 2 : index
    %15 = memref.load %arg2[%c0_12, %c2_13] : memref<3x4xf32, #tpu.memory_space<smem>>
    %16 = vector.broadcast %15 : f32 to vector<16x256xf32>
    %17 = arith.mulf %5, %16 : vector<16x256xf32>
    %18 = arith.addf %14, %17 : vector<16x256xf32>
    %c0_14 = arith.constant 0 : index
    %c3_15 = arith.constant 3 : index
    %19 = memref.load %arg2[%c0_14, %c3_15] : memref<3x4xf32, #tpu.memory_space<smem>>
    %20 = vector.broadcast %19 : f32 to vector<16x256xf32>
    %21 = arith.mulf %7, %20 : vector<16x256xf32>
    %22 = arith.addf %18, %21 : vector<16x256xf32>
    %c0_16 = arith.constant 0 : index
    %23 = memref.load %arg3[%c0_16] : memref<3xf32, #tpu.memory_space<smem>>
    %24 = vector.broadcast %23 : f32 to vector<16x256xf32>
    %25 = arith.addf %22, %24 : vector<16x256xf32>
    %cst = arith.constant 0.000000e+00 : f32
    %26 = vector.broadcast %cst : f32 to vector<16x256xf32>
    %27 = arith.maximumf %25, %26 : vector<16x256xf32>
    %cst_17 = arith.constant dense<0.000000e+00> : vector<16xf32>
    %28 = vector.multi_reduction <add>, %27, %cst_17 [1] : vector<16x256xf32> to vector<16xf32>
    %29 = vector.shape_cast %28 : vector<16xf32> to vector<16x1xf32>
    %cst_18 = arith.constant 3.906250e-03 : f32
    %30 = vector.broadcast %cst_18 : f32 to vector<16x1xf32>
    %31 = arith.mulf %29, %30 : vector<16x1xf32>
    %c1_19 = arith.constant 1 : index
    %c0_20 = arith.constant 0 : index
    %32 = memref.load %arg2[%c1_19, %c0_20] : memref<3x4xf32, #tpu.memory_space<smem>>
    %33 = vector.broadcast %32 : f32 to vector<16x256xf32>
    %34 = arith.mulf %1, %33 : vector<16x256xf32>
    %c1_21 = arith.constant 1 : index
    %c1_22 = arith.constant 1 : index
    %35 = memref.load %arg2[%c1_21, %c1_22] : memref<3x4xf32, #tpu.memory_space<smem>>
    %36 = vector.broadcast %35 : f32 to vector<16x256xf32>
    %37 = arith.mulf %3, %36 : vector<16x256xf32>
    %38 = arith.addf %34, %37 : vector<16x256xf32>
    %c1_23 = arith.constant 1 : index
    %c2_24 = arith.constant 2 : index
    %39 = memref.load %arg2[%c1_23, %c2_24] : memref<3x4xf32, #tpu.memory_space<smem>>
    %40 = vector.broadcast %39 : f32 to vector<16x256xf32>
    %41 = arith.mulf %5, %40 : vector<16x256xf32>
    %42 = arith.addf %38, %41 : vector<16x256xf32>
    %c1_25 = arith.constant 1 : index
    %c3_26 = arith.constant 3 : index
    %43 = memref.load %arg2[%c1_25, %c3_26] : memref<3x4xf32, #tpu.memory_space<smem>>
    %44 = vector.broadcast %43 : f32 to vector<16x256xf32>
    %45 = arith.mulf %7, %44 : vector<16x256xf32>
    %46 = arith.addf %42, %45 : vector<16x256xf32>
    %c1_27 = arith.constant 1 : index
    %47 = memref.load %arg3[%c1_27] : memref<3xf32, #tpu.memory_space<smem>>
    %48 = vector.broadcast %47 : f32 to vector<16x256xf32>
    %49 = arith.addf %46, %48 : vector<16x256xf32>
    %cst_28 = arith.constant 0.000000e+00 : f32
    %50 = vector.broadcast %cst_28 : f32 to vector<16x256xf32>
    %51 = arith.maximumf %49, %50 : vector<16x256xf32>
    %cst_29 = arith.constant dense<0.000000e+00> : vector<16xf32>
    %52 = vector.multi_reduction <add>, %51, %cst_29 [1] : vector<16x256xf32> to vector<16xf32>
    %53 = vector.shape_cast %52 : vector<16xf32> to vector<16x1xf32>
    %cst_30 = arith.constant 3.906250e-03 : f32
    %54 = vector.broadcast %cst_30 : f32 to vector<16x1xf32>
    %55 = arith.mulf %53, %54 : vector<16x1xf32>
    %c2_31 = arith.constant 2 : index
    %c0_32 = arith.constant 0 : index
    %56 = memref.load %arg2[%c2_31, %c0_32] : memref<3x4xf32, #tpu.memory_space<smem>>
    %57 = vector.broadcast %56 : f32 to vector<16x256xf32>
    %58 = arith.mulf %1, %57 : vector<16x256xf32>
    %c2_33 = arith.constant 2 : index
    %c1_34 = arith.constant 1 : index
    %59 = memref.load %arg2[%c2_33, %c1_34] : memref<3x4xf32, #tpu.memory_space<smem>>
    %60 = vector.broadcast %59 : f32 to vector<16x256xf32>
    %61 = arith.mulf %3, %60 : vector<16x256xf32>
    %62 = arith.addf %58, %61 : vector<16x256xf32>
    %c2_35 = arith.constant 2 : index
    %c2_36 = arith.constant 2 : index
    %63 = memref.load %arg2[%c2_35, %c2_36] : memref<3x4xf32, #tpu.memory_space<smem>>
    %64 = vector.broadcast %63 : f32 to vector<16x256xf32>
    %65 = arith.mulf %5, %64 : vector<16x256xf32>
    %66 = arith.addf %62, %65 : vector<16x256xf32>
    %c2_37 = arith.constant 2 : index
    %c3_38 = arith.constant 3 : index
    %67 = memref.load %arg2[%c2_37, %c3_38] : memref<3x4xf32, #tpu.memory_space<smem>>
    %68 = vector.broadcast %67 : f32 to vector<16x256xf32>
    %69 = arith.mulf %7, %68 : vector<16x256xf32>
    %70 = arith.addf %66, %69 : vector<16x256xf32>
    %c2_39 = arith.constant 2 : index
    %71 = memref.load %arg3[%c2_39] : memref<3xf32, #tpu.memory_space<smem>>
    %72 = vector.broadcast %71 : f32 to vector<16x256xf32>
    %73 = arith.addf %70, %72 : vector<16x256xf32>
    %cst_40 = arith.constant 0.000000e+00 : f32
    %74 = vector.broadcast %cst_40 : f32 to vector<16x256xf32>
    %75 = arith.maximumf %73, %74 : vector<16x256xf32>
    %cst_41 = arith.constant dense<0.000000e+00> : vector<16xf32>
    %76 = vector.multi_reduction <add>, %75, %cst_41 [1] : vector<16x256xf32> to vector<16xf32>
    %77 = vector.shape_cast %76 : vector<16xf32> to vector<16x1xf32>
    %cst_42 = arith.constant 3.906250e-03 : f32
    %78 = vector.broadcast %cst_42 : f32 to vector<16x1xf32>
    %79 = arith.mulf %77, %78 : vector<16x1xf32>
    %c0_43 = arith.constant 0 : index
    %c0_44 = arith.constant 0 : index
    %80 = vector.load %arg4[%c0_43, %c0_44] : memref<3x1280xf32, #tpu.memory_space<vmem>>, vector<3x1280xf32>
    %c0_45 = arith.constant 0 : index
    %c0_46 = arith.constant 0 : index
    %81 = vector.load %arg5[%c0_45, %c0_46] : memref<1x1280xf32, #tpu.memory_space<vmem>>, vector<1x1280xf32>
    %82 = vector.extract_strided_slice %80 {offsets = [0, 0], sizes = [1, 1280], strides = [1, 1]} : vector<3x1280xf32> to vector<1x1280xf32>
    %83 = vector.broadcast %31 : vector<16x1xf32> to vector<16x1280xf32>
    %84 = vector.broadcast %82 : vector<1x1280xf32> to vector<16x1280xf32>
    %85 = arith.mulf %83, %84 : vector<16x1280xf32>
    %86 = vector.broadcast %81 : vector<1x1280xf32> to vector<16x1280xf32>
    %87 = arith.addf %86, %85 : vector<16x1280xf32>
    %88 = vector.extract_strided_slice %80 {offsets = [1, 0], sizes = [1, 1280], strides = [1, 1]} : vector<3x1280xf32> to vector<1x1280xf32>
    %89 = vector.broadcast %55 : vector<16x1xf32> to vector<16x1280xf32>
    %90 = vector.broadcast %88 : vector<1x1280xf32> to vector<16x1280xf32>
    %91 = arith.mulf %89, %90 : vector<16x1280xf32>
    %92 = arith.addf %87, %91 : vector<16x1280xf32>
    %93 = vector.extract_strided_slice %80 {offsets = [2, 0], sizes = [1, 1280], strides = [1, 1]} : vector<3x1280xf32> to vector<1x1280xf32>
    %94 = vector.broadcast %79 : vector<16x1xf32> to vector<16x1280xf32>
    %95 = vector.broadcast %93 : vector<1x1280xf32> to vector<16x1280xf32>
    %96 = arith.mulf %94, %95 : vector<16x1280xf32>
    %97 = arith.addf %92, %96 : vector<16x1280xf32>
    %cst_47 = arith.constant 0.000000e+00 : f32
    %98 = vector.broadcast %cst_47 : f32 to vector<16x1280xf32>
    %99 = arith.maximumf %97, %98 : vector<16x1280xf32>
    %100 = arith.truncf %99 : vector<16x1280xf32> to vector<16x1280xbf16>
    %c0_48 = arith.constant 0 : index
    %c0_49 = arith.constant 0 : index
    %101 = vector.load %arg6[%c0_48, %c0_49] : memref<1280x256xbf16, #tpu.memory_space<vmem>>, vector<1280x256xbf16>
    %cst_50 = arith.constant dense<0.000000e+00> : vector<16x256xf32>
    %102 = tpu.matmul %100, %101, %cst_50 {dimension_numbers = #tpu.dot_dimension_numbers<[1], [0], [0], [1], [0, 0, 1, 1], [], []>} : vector<16x1280xbf16>, vector<1280x256xbf16>, vector<16x256xf32> -> vector<16x256xf32>
    %c0_51 = arith.constant 0 : index
    %c0_52 = arith.constant 0 : index
    %103 = vector.load %arg7[%c0_51, %c0_52] : memref<1x256xf32, #tpu.memory_space<vmem>>, vector<1x256xf32>
    %104 = vector.broadcast %103 : vector<1x256xf32> to vector<16x256xf32>
    %105 = arith.addf %102, %104 : vector<16x256xf32>
    %106 = arith.truncf %105 : vector<16x256xf32> to vector<16x256xbf16>
    %c0_53 = arith.constant 0 : index
    %c0_54 = arith.constant 0 : index
    %107 = vector.load %arg8[%c0_53, %c0_54] : memref<256x128xbf16, #tpu.memory_space<vmem>>, vector<256x128xbf16>
    %cst_55 = arith.constant dense<0.000000e+00> : vector<16x128xf32>
    %108 = tpu.matmul %106, %107, %cst_55 {dimension_numbers = #tpu.dot_dimension_numbers<[1], [0], [0], [1], [0, 0, 1, 1], [], []>} : vector<16x256xbf16>, vector<256x128xbf16>, vector<16x128xf32> -> vector<16x128xf32>
    %c0_56 = arith.constant 0 : index
    %c0_57 = arith.constant 0 : index
    %109 = vector.load %arg9[%c0_56, %c0_57] : memref<1x128xf32, #tpu.memory_space<vmem>>, vector<1x128xf32>
    %110 = vector.broadcast %109 : vector<1x128xf32> to vector<16x128xf32>
    %111 = arith.addf %108, %110 : vector<16x128xf32>
    %c0_58 = arith.constant 0 : index
    %c0_59 = arith.constant 0 : index
    %112 = vector.load %arg10[%c0_58, %c0_59] : memref<16x128xf32, #tpu.memory_space<vmem>>, vector<16x128xf32>
    tpu.vector_store %arg10[%c0_58, %c0_59], %111 {strides = array<i32>} : memref<16x128xf32, #tpu.memory_space<vmem>>, vector<16x128xf32>,
    return
  }
  func.func @transform_0(%arg0: i32) -> (i32, i32, i32) {
    %c0_i32 = arith.constant 0 : i32
    %c0_i32_0 = arith.constant 0 : i32
    %c0_i32_1 = arith.constant 0 : i32
    return %c0_i32, %arg0, %c0_i32_0 : i32, i32, i32
  }
  func.func @transform_1(%arg0: i32) -> (i32, i32) {
    %c0_i32 = arith.constant 0 : i32
    %c0_i32_0 = arith.constant 0 : i32
    %c0_i32_1 = arith.constant 0 : i32
    return %c0_i32, %c0_i32_0 : i32, i32
  }
  func.func @transform_2(%arg0: i32) -> i32 {
    %c0_i32 = arith.constant 0 : i32
    %c0_i32_0 = arith.constant 0 : i32
    return %c0_i32 : i32
  }
  func.func @transform_3(%arg0: i32) -> (i32, i32) {
    %c0_i32 = arith.constant 0 : i32
    %c0_i32_0 = arith.constant 0 : i32
    %c0_i32_1 = arith.constant 0 : i32
    return %c0_i32, %c0_i32_0 : i32, i32
  }
  func.func @transform_4(%arg0: i32) -> (i32, i32) {
    %c0_i32 = arith.constant 0 : i32
    %c0_i32_0 = arith.constant 0 : i32
    %c0_i32_1 = arith.constant 0 : i32
    return %c0_i32, %c0_i32_0 : i32, i32
  }
  func.func @transform_5(%arg0: i32) -> (i32, i32) {
    %c0_i32 = arith.constant 0 : i32
    %c0_i32_0 = arith.constant 0 : i32
    %c0_i32_1 = arith.constant 0 : i32
    return %c0_i32, %c0_i32_0 : i32, i32
  }
  func.func @transform_6(%arg0: i32) -> (i32, i32) {
    %c0_i32 = arith.constant 0 : i32
    %c0_i32_0 = arith.constant 0 : i32
    %c0_i32_1 = arith.constant 0 : i32
    return %c0_i32, %c0_i32_0 : i32, i32
  }
  func.func @transform_7(%arg0: i32) -> (i32, i32) {
    %c0_i32 = arith.constant 0 : i32
    %c0_i32_0 = arith.constant 0 : i32
    %c0_i32_1 = arith.constant 0 : i32
    return %c0_i32, %c0_i32_0 : i32, i32
  }
  func.func @transform_8(%arg0: i32) -> (i32, i32) {
    %c0_i32 = arith.constant 0 : i32
    %c0_i32_0 = arith.constant 0 : i32
    %c0_i32_1 = arith.constant 0 : i32
    return %c0_i32, %c0_i32_0 : i32, i32
  }
  func.func @transform_9(%arg0: i32) -> (i32, i32) {
    %c0_i32 = arith.constant 0 : i32
    %c0_i32_0 = arith.constant 0 : i32
    return %arg0, %c0_i32 : i32, i32
  }
}

</mosaic_0001>

<bundles_post_ra>
// kernel: model_forward.3
= control target key start
LH: loop header
LB: loop body
LE: loop exit
PB: predicated region body
PF: predicated region fallthrough
CT: control target
= control target key end

     0   :  { %s1533_s0 = inlined_call_operand.vmem [shape: f32[2,8,128], index: 0, kind: input, shape index: {}]   ;;  %s1534_s1 = inlined_call_operand.vmem [shape: bf16[32,128], index: 1, kind: input, shape index: {}]   ;;  %s1535_s2 = inlined_call_operand.vmem [shape: bf16[32,128], index: 2, kind: input, shape index: {}]   ;;  %s1536_s3 = inlined_call_operand.hbm [shape: bf16[32,128], index: 3, kind: input, shape index: {}]   ;;  %s1537_s4 = inlined_call_operand.vmem [shape: f32[1,128], index: 4, kind: input, shape index: {}]   ;;  %s1538_s5 = inlined_call_operand.vmem [shape: f32[32,1], index: 5, kind: input, shape index: {}]   ;;  %s1539_s6 = inlined_call_operand.<no memory space> [shape: f32[1,1], index: 6, kind: input, shape index: {}]   ;;  %s1540_s7 = inlined_call_operand.vmem [shape: f32[2,1], index: 7, kind: output, shape index: {}]  }
   0x1   :  { %v12_v0 = vstv %s1539_s6 }
   0x2   :  { %13 = vst [vmem:[#allocation5] sm:$0x1] %v12_v0 }
   0x3   :  { %14 = vsyncpa [#allocation7], 0  ;;  %s25_s28 = sshll.u32 %s1536_s3, 4  ;;  %s1201_s29 = smov [#allocation6]   ;;  %s26_s28 = int_to_ptr.hbm [resolvable:$true] %s25_s28 }
   0x4   :  { %s27_s30 = sshll.u32 %s1201_s29, 4  ;;  %s1202_s8 = smov 64   ;;  %s28_s30 = int_to_ptr.vmem [resolvable:$true] %s27_s30 }
   0x5   :  { %s1203_s9 = smov 4  }
   0x6   :  { %33 = dma.hbm_to_vmem [thread:$0]  %s26_s28, 256, %s28_s30, [#allocation7], %s1202_s8, %s1202_s8, %s1203_s9  }
   0x7   :  { %1199 = dma.done.wait [#allocation7], 256  }
   0x8   :  { %1200 = vsyncadd [#allocation7], 4294967040  ;;  %v1204_v1 = vmov 1983009808   ;;  %v1097_v4 = vld [vmem:[%s1534_s1 + $0x8] sm:$0xff]  ;;  %v1264_v5 = vld [vmem:[%s1533_s0] sm:$0xff]  ;;  %v121_v13 = vlaneseq }
   0x9   :  { %v64_v2 = vunpack.c.l.s4 %v1204_v1  ;;  %v1269_v6 = vld [vmem:[%s1533_s0 + $0x8] sm:$0xff]  ;;  %149 = vmatpush.bf16.msra.mxu0 %v1097_v4  ;;  %v1096_v7 = vld [vmem:[%s1534_s1] sm:$0xff]  ;;  %201 = vmatpush.bf16.msra.mxu1 %v1097_v4  ;;  %vm61_vm0 = vcmask 1047556   ;;  %v1205_v12 = vmov 0   ;;  %s1206_s0 = smov 32   ;;  %vm139_vm4 = vcmask 261120  }
   0xa   :  { %253 = vmatpush.bf16.msra.mxu2 %v1097_v4  ;;  %305 = vmatpush.bf16.msra.mxu3 %v1097_v4  ;;  %v122_v14 = vand.u32 127, %v121_v13  ;;  %v1207_v35 = vmov 1934713408   ;;  %vm184_vm5 = vcmask 254976   ;;  %v1014_v18 = vld [vmem:[%s1538_s5 + $0x10] sm:$0xff]  ;;  %vm1045_vm6 = vcmask 1024  }
   0xb   :  { %v1256_v3 = vunpack.c.0.s8 %v64_v2  ;;  %v86_v36 = vunpack.c.l.s4 %v1207_v35 }
   0xc   :  { %vm123_vm1 = vcmp.ge.s32.totalorder %v122_v14, 64  ;;  %vm124_vm2 = vcmp.lt.s32.totalorder %v122_v14, 96 }
   0xd   :  { %v1276_v8 = vperm.slane %v1264_v5, %v1256_v3  ;;  %v1280_v9 = vperm.slane %v1269_v6, %v1256_v3  ;;  %150 = vmatpush.bf16.msra.mxu0 %v1096_v7  ;;  %202 = vmatpush.bf16.msra.mxu1 %v1096_v7  ;;  %vm1286_vm3 = vmand %vm123_vm1, %vm124_vm2  ;;  %v1302_v37 = vunpack.c.0.s8 %v86_v36 }
   0xe   :  { %254 = vmatpush.bf16.msra.mxu2 %v1096_v7  ;;  %306 = vmatpush.bf16.msra.mxu3 %v1096_v7 }
   0xf   :  { %v81_v10 = vrot.slane %v1280_v9, 4  ;;  %v83_v61 = vrot.slane %v1276_v8, 4 }
  0x10   :  { %151 = vmatmul.bf16.vlgmr.msra.gmra.mxu0 %v1205_v12 }
  0x11   :  { %v82_v11 = vsel %vm61_vm0, %v81_v10, %v1276_v8  ;;  %357 = vmatpush.bf16.msrb.mxu0 %v1097_v4  ;;  %409 = vmatpush.bf16.msrb.mxu1 %v1097_v4  ;;  %v84_v62 = vsel %vm61_vm0, %v1280_v9, %v83_v61 }
  0x12   :  { %1052 = vst.sshfl [vmem:[#allocation2] sm:$0x11 pattern:$0x73516240] %v82_v11  ;;  %461 = vmatpush.bf16.msrb.mxu2 %v1097_v4  ;;  %513 = vmatpush.bf16.msrb.mxu3 %v1097_v4  ;;  %v88_v38 = vperm.slane %v82_v11, %v1302_v37 }
  0x13   :  { %1053 = vst.sshfl [vmem:[#allocation2 + $0x4] sm:$0x11 pattern:$0x73516240] %v84_v62 }
  0x14   :  { %v105_v39 = vrot.slane %v88_v38, 4 }
  0x15   :  { %358 = vmatpush.bf16.msrb.mxu0 %v1096_v7  ;;  %410 = vmatpush.bf16.msrb.mxu1 %v1096_v7 }
  0x16   :  { %462 = vmatpush.bf16.msrb.mxu2 %v1096_v7  ;;  %514 = vmatpush.bf16.msrb.mxu3 %v1096_v7  ;;  %v106_v40 = vsel %vm61_vm0, 0.0, %v105_v39 }
  0x17   :  { %114 = vst [vmem:[#allocation2 + $0x2] sm:$0x3] %v106_v40 }
  0x19   :  { %v126_v15 = vld [vmem:[#allocation2] sm:$0x3] }
  0x1a   :  { %v239_v0 = vld [vmem:[#allocation2 + $0x4] sm:$0x3] }
  0x1e   :  { %v187_v42 = vld [vmem:[#allocation2 + $0x2] sm:$0x3] }
  0x8d   :  { %v152_v16 = vpop.f32.mrf.mxu0 }
  0x8e   :  { %v156_v17 = vadd.f32 %v152_v16, %v126_v15 }
  0x90   :  { %v157_v19 = vmul.f32 0.5, %v156_v17 }
  0x92   :  { %v158_v20 = vsel %vm1286_vm3, %v156_v17, %v157_v19 }
  0x93   :  { %1111 = vtanh.f32 %v158_v20 }
  0x95   :  { %v154_v21 = vpop.f32.mrf.mxu0 }
  0x99   :  { %v1112_v22 = vpop.eup %1111 }
  0x9a   :  { %v160_v23 = vmul.f32 0.5, %v1112_v22 }
  0x9c   :  { %v161_v24 = vadd.f32 0.5, %v160_v23 }
  0x9e   :  { %v162_v25 = vsel %vm1286_vm3, %v1112_v22, %v161_v24  ;;  %v92_v24 = vperm.slane %v84_v62, %v1302_v37 }
  0x9f   :  { %165 = vrot.lane.b32.xlu0 %v162_v25, %s1202_s8  ;;  %v163_v28 = vmul.f32 0.0, %v162_v25 }
 0x111   :  { %v166_v26 = vpop.permute.xlu0 %165 }
 0x112   :  { %v168_v27 = vmul.f32 %v166_v26, %v162_v25 }
 0x114   :  { %170 = vrot.lane.b32.xlu0 %v168_v27, %s1206_s0 }
 0x186   :  { %v171_v29 = vpop.permute.xlu0 %170 }
 0x187   :  { %v173_v30 = vadd.f32 %v171_v29, %v163_v28 }
 0x189   :  { %1113 = vtanh.f32 %v173_v30 }
 0x18f   :  { %v1114_v31 = vpop.eup %1113 }
 0x190   :  { %176 = vrot.lane.b32.xlu1 %v1114_v31, %s1202_s8 }
 0x202   :  { %v177_v32 = vpop.permute.xlu1 %176 }
 0x203   :  { %v1297_v33 = vmul.f32 %v177_v32, %v162_v25  ;;  %v107_v25 = vrot.slane %v92_v24, 4 }
 0x205   :  { %v188_v34 = vpack.c.bf16 %v1297_v33, %v1297_v33  ;;  %v108_v26 = vsel %vm61_vm0, 0.0, %v107_v25 }
 0x206   :  { %116 = vst [vmem:[#allocation2 + $0x6] sm:$0x3] %v108_v26 }
 0x207   :  { %190 = vrot.lane.b32.xlu1 %v188_v34, %s1206_s0 }
 0x20d   :  { %v291_v28 = vld [vmem:[#allocation2 + $0x6] sm:$0x3] }
 0x279   :  { %v191_v41 = vpop.permute.xlu1 %190 }
 0x27a   :  { %1064 = vmatmul.msk.bf16.vlgmr.msra.gmra.mxu1 %vm139_vm4, %v191_v41 }
 0x2f7   :  { %v204_v43 = vpop.f32.mrf.mxu1 }
 0x2f8   :  { %v208_v44 = vadd.f32 %v204_v43, %v187_v42 }
 0x2fa   :  { %v209_v45 = vmul.f32 0.5, %v208_v44 }
 0x2fc   :  { %v210_v46 = vsel %vm1286_vm3, %v208_v44, %v209_v45 }
 0x2fd   :  { %1115 = vtanh.f32 %v210_v46 }
 0x2ff   :  { %v206_v47 = vpop.f32.mrf.mxu1 }
 0x303   :  { %v1116_v48 = vpop.eup %1115 }
 0x304   :  { %v212_v49 = vmul.f32 0.5, %v1116_v48 }
 0x306   :  { %v213_v50 = vadd.f32 0.5, %v212_v49  ;;  %v60_v49 = vrot.slane %v1264_v5, 4 }
 0x308   :  { %v214_v51 = vsel %vm1286_vm3, %v1116_v48, %v213_v50  ;;  %v71_v50 = vrot.slane %v1269_v6, 4 }
 0x309   :  { %217 = vrot.lane.b32.xlu2 %v214_v51, %s1202_s8  ;;  %v215_v54 = vmul.f32 %v214_v51, %v173_v30 }
 0x363   :  { %v218_v52 = vpop.permute.xlu2 %217 }
 0x364   :  { %v220_v53 = vmul.f32 %v218_v52, %v214_v51  ;;  %v72_v52 = vsel %vm61_vm0, 0.0, %v71_v50 }
 0x366   :  { %222 = vrot.lane.b32.xlu2 %v220_v53, %s1206_s0 }
 0x3c0   :  { %v223_v55 = vpop.permute.xlu2 %222 }
 0x3c1   :  { %v225_v56 = vadd.f32 %v223_v55, %v215_v54  ;;  %v1358_v54 = vperm.slane %v72_v52, %v1256_v3 }
 0x3c3   :  { %1117 = vtanh.f32 %v225_v56  ;;  %v93_v55 = vrot.slane %v1358_v54, 4 }
 0x3c9   :  { %v1118_v57 = vpop.eup %1117 }
 0x3ca   :  { %228 = vrot.lane.b32.xlu0 %v1118_v57, %s1202_s8 }
 0x43c   :  { %v229_v58 = vpop.permute.xlu0 %228 }
 0x43d   :  { %v1314_v59 = vmul.f32 %v229_v58, %v214_v51  ;;  %v62_v51 = vsel %vm61_vm0, 0.0, %v60_v49 }
 0x43e   :  { %v1355_v53 = vperm.slane %v62_v51, %v1256_v3 }
 0x43f   :  { %v240_v60 = vpack.c.bf16 %v1314_v59, %v1314_v59 }
 0x441   :  { %242 = vrot.lane.b32.xlu1 %v240_v60, %s1206_s0 }
 0x4b3   :  { %v243_v63 = vpop.permute.xlu1 %242 }
 0x4b4   :  { %1065 = vmatmul.msk.bf16.vlgmr.msra.gmra.mxu2 %vm139_vm4, %v243_v63 }
 0x537   :  { %v256_v1 = vpop.f32.mrf.mxu2 }
 0x538   :  { %v260_v2 = vadd.f32 %v256_v1, %v239_v0 }
 0x53a   :  { %v261_v4 = vmul.f32 0.5, %v260_v2 }
 0x53c   :  { %v262_v7 = vsel %vm1286_vm3, %v260_v2, %v261_v4 }
 0x53d   :  { %1119 = vtanh.f32 %v262_v7 }
 0x53f   :  { %v258_v10 = vpop.f32.mrf.mxu2 }
 0x543   :  { %v1120_v11 = vpop.eup %1119 }
 0x544   :  { %v264_v13 = vmul.f32 0.5, %v1120_v11 }
 0x546   :  { %v265_v14 = vadd.f32 0.5, %v264_v13 }
 0x548   :  { %v266_v8 = vsel %vm1286_vm3, %v1120_v11, %v265_v14 }
 0x549   :  { %269 = vrot.lane.b32.xlu2 %v266_v8, %s1202_s8  ;;  %v267_v16 = vmul.f32 %v266_v8, %v225_v56  ;;  %v94_v56 = vsel %vm61_vm0, %v93_v55, %v1355_v53 }
 0x54a   :  { %1054 = vst.sshfl [vmem:[#allocation2 + $0x8] sm:$0x11 pattern:$0x73516240] %v94_v56 }
 0x551   :  { %v343_v5 = vld [vmem:[#allocation2 + $0x8] sm:$0x3] }
 0x5a3   :  { %v270_v9 = vpop.permute.xlu2 %269 }
 0x5a4   :  { %v272_v15 = vmul.f32 %v270_v9, %v266_v8 }
 0x5a6   :  { %274 = vrot.lane.b32.xlu0 %v272_v15, %s1206_s0  ;;  %v100_v15 = vperm.slane %v94_v56, %v1302_v37 }
 0x618   :  { %v275_v17 = vpop.permute.xlu0 %274 }
 0x619   :  { %v277_v19 = vadd.f32 %v275_v17, %v267_v16  ;;  %v109_v16 = vrot.slane %v100_v15, 4 }
 0x61b   :  { %1121 = vtanh.f32 %v277_v19  ;;  %v110_v17 = vsel %vm61_vm0, 0.0, %v109_v16 }
 0x61c   :  { %118 = vst [vmem:[#allocation2 + $0xa] sm:$0x3] %v110_v17 }
 0x621   :  { %v1122_v20 = vpop.eup %1121 }
 0x622   :  { %280 = vrot.lane.b32.xlu1 %v1122_v20, %s1202_s8 }
 0x623   :  { %v395_v20 = vld [vmem:[#allocation2 + $0xa] sm:$0x3] }
 0x694   :  { %v281_v21 = vpop.permute.xlu1 %280 }
 0x695   :  { %v1330_v22 = vmul.f32 %v281_v21, %v266_v8 }
 0x697   :  { %v292_v23 = vpack.c.bf16 %v1330_v22, %v1330_v22 }
 0x699   :  { %294 = vrot.lane.b32.xlu2 %v292_v23, %s1206_s0 }
 0x6f3   :  { %v295_v27 = vpop.permute.xlu2 %294 }
 0x6f4   :  { %1066 = vmatmul.msk.bf16.vlgmr.msra.gmra.mxu3 %vm139_vm4, %v295_v27 }
 0x777   :  { %v308_v29 = vpop.f32.mrf.mxu3 }
 0x778   :  { %v312_v30 = vadd.f32 %v308_v29, %v291_v28 }
 0x77a   :  { %v313_v31 = vmul.f32 0.5, %v312_v30 }
 0x77c   :  { %v314_v32 = vsel %vm1286_vm3, %v312_v30, %v313_v31 }
 0x77d   :  { %1123 = vtanh.f32 %v314_v32 }
 0x77f   :  { %v310_v34 = vpop.f32.mrf.mxu3 }
 0x783   :  { %v1124_v35 = vpop.eup %1123 }
 0x784   :  { %v316_v36 = vmul.f32 0.5, %v1124_v35 }
 0x786   :  { %v317_v38 = vadd.f32 0.5, %v316_v36 }
 0x788   :  { %v318_v39 = vsel %vm1286_vm3, %v1124_v35, %v317_v38 }
 0x789   :  { %321 = vrot.lane.b32.xlu0 %v318_v39, %s1202_s8  ;;  %v319_v42 = vmul.f32 %v318_v39, %v277_v19 }
 0x7fb   :  { %v322_v40 = vpop.permute.xlu0 %321 }
 0x7fc   :  { %v324_v41 = vmul.f32 %v322_v40, %v318_v39 }
 0x7fe   :  { %326 = vrot.lane.b32.xlu1 %v324_v41, %s1206_s0 }
 0x870   :  { %v327_v43 = vpop.permute.xlu1 %326 }
 0x871   :  { %v329_v44 = vadd.f32 %v327_v43, %v319_v42  ;;  %v95_v42 = vrot.slane %v1355_v53, 4 }
 0x873   :  { %1125 = vtanh.f32 %v329_v44  ;;  %v96_v43 = vsel %vm61_vm0, %v1358_v54, %v95_v42 }
 0x874   :  { %1055 = vst.sshfl [vmem:[#allocation2 + $0xc] sm:$0x11 pattern:$0x73516240] %v96_v43 }
 0x879   :  { %v1126_v45 = vpop.eup %1125 }
 0x87a   :  { %332 = vrot.lane.b32.xlu2 %v1126_v45, %s1202_s8 }
 0x87b   :  { %v447_v45 = vld [vmem:[#allocation2 + $0xc] sm:$0x3] }
 0x8d4   :  { %v333_v46 = vpop.permute.xlu2 %332 }
 0x8d5   :  { %v1345_v47 = vmul.f32 %v333_v46, %v318_v39 }
 0x8d7   :  { %v344_v48 = vpack.c.bf16 %v1345_v47, %v1345_v47 }
 0x8d9   :  { %346 = vrot.lane.b32.xlu0 %v344_v48, %s1206_s0 }
 0x94b   :  { %v347_v57 = vpop.permute.xlu0 %346 }
 0x94c   :  { %1067 = vmatmul.msk.bf16.vlgmr.msrb.gmra.mxu0 %vm139_vm4, %v347_v57 }
 0x9c9   :  { %v360_v6 = vpop.f32.mrf.mxu0 }
 0x9ca   :  { %v364_v58 = vadd.f32 %v360_v6, %v343_v5 }
 0x9cc   :  { %v365_v60 = vmul.f32 0.5, %v364_v58 }
 0x9ce   :  { %v366_v61 = vsel %vm1286_vm3, %v364_v58, %v365_v60 }
 0x9cf   :  { %1127 = vtanh.f32 %v366_v61 }
 0x9d1   :  { %v362_v62 = vpop.f32.mrf.mxu0 }
 0x9d5   :  { %v1128_v3 = vpop.eup %1127 }
 0x9d6   :  { %v368_v63 = vmul.f32 0.5, %v1128_v3 }
 0x9d8   :  { %v369_v0 = vadd.f32 0.5, %v368_v63  ;;  %v104_v63 = vperm.slane %v96_v43, %v1302_v37 }
 0x9da   :  { %v370_v1 = vsel %vm1286_vm3, %v1128_v3, %v369_v0  ;;  %v111_v0 = vrot.slane %v104_v63, 4 }
 0x9db   :  { %373 = vrot.lane.b32.xlu1 %v370_v1, %s1202_s8  ;;  %v371_v7 = vmul.f32 %v370_v1, %v329_v44 }
 0xa4d   :  { %v374_v2 = vpop.permute.xlu1 %373 }
 0xa4e   :  { %v376_v4 = vmul.f32 %v374_v2, %v370_v1 }
 0xa50   :  { %378 = vrot.lane.b32.xlu2 %v376_v4, %s1206_s0 }
 0xaaa   :  { %v379_v10 = vpop.permute.xlu2 %378 }
 0xaab   :  { %v381_v11 = vadd.f32 %v379_v10, %v371_v7 }
 0xaad   :  { %1129 = vtanh.f32 %v381_v11 }
 0xab3   :  { %v1130_v13 = vpop.eup %1129 }
 0xab4   :  { %384 = vrot.lane.b32.xlu0 %v1130_v13, %s1202_s8 }
 0xb26   :  { %v385_v14 = vpop.permute.xlu0 %384 }
 0xb27   :  { %v1371_v8 = vmul.f32 %v385_v14, %v370_v1  ;;  %v112_v1 = vsel %vm61_vm0, 0.0, %v111_v0 }
 0xb28   :  { %120 = vst [vmem:[#allocation2 + $0xe] sm:$0x3] %v112_v1 }
 0xb29   :  { %v396_v9 = vpack.c.bf16 %v1371_v8, %v1371_v8 }
 0xb2b   :  { %398 = vrot.lane.b32.xlu1 %v396_v9, %s1206_s0 }
 0xb2f   :  { %v499_v4 = vld [vmem:[#allocation2 + $0xe] sm:$0x3] }
 0xb9d   :  { %v399_v19 = vpop.permute.xlu1 %398 }
 0xb9e   :  { %1068 = vmatmul.msk.bf16.vlgmr.msrb.gmra.mxu1 %vm139_vm4, %v399_v19 }
 0xc1b   :  { %v412_v21 = vpop.f32.mrf.mxu1 }
 0xc1c   :  { %v416_v23 = vadd.f32 %v412_v21, %v395_v20 }
 0xc1e   :  { %v417_v24 = vmul.f32 0.5, %v416_v23 }
 0xc20   :  { %v418_v25 = vsel %vm1286_vm3, %v416_v23, %v417_v24 }
 0xc21   :  { %1131 = vtanh.f32 %v418_v25 }
 0xc23   :  { %v414_v26 = vpop.f32.mrf.mxu1 }
 0xc27   :  { %v1132_v27 = vpop.eup %1131 }
 0xc28   :  { %v420_v28 = vmul.f32 0.5, %v1132_v27 }
 0xc2a   :  { %v421_v29 = vadd.f32 0.5, %v420_v28 }
 0xc2c   :  { %v422_v30 = vsel %vm1286_vm3, %v1132_v27, %v421_v29 }
 0xc2d   :  { %425 = vrot.lane.b32.xlu2 %v422_v30, %s1202_s8  ;;  %v423_v34 = vmul.f32 %v422_v30, %v381_v11 }
 0xc87   :  { %v426_v31 = vpop.permute.xlu2 %425 }
 0xc88   :  { %v428_v32 = vmul.f32 %v426_v31, %v422_v30 }
 0xc8a   :  { %430 = vrot.lane.b32.xlu0 %v428_v32, %s1206_s0 }
 0xcfc   :  { %v431_v35 = vpop.permute.xlu0 %430 }
 0xcfd   :  { %v433_v36 = vadd.f32 %v431_v35, %v423_v34 }
 0xcff   :  { %1133 = vtanh.f32 %v433_v36 }
 0xd05   :  { %v1134_v38 = vpop.eup %1133 }
 0xd06   :  { %436 = vrot.lane.b32.xlu1 %v1134_v38, %s1202_s8 }
 0xd78   :  { %v437_v39 = vpop.permute.xlu1 %436 }
 0xd79   :  { %v1386_v40 = vmul.f32 %v437_v39, %v422_v30  ;;  %v1101_v39 = vld [vmem:[#allocation6 + $0x8] sm:$0xff] }
 0xd7a   :  { %659 = vmatpush.bf16.msra.mxu1 %v1101_v39  ;;  %705 = vmatpush.bf16.msra.mxu2 %v1101_v39 }
 0xd7b   :  { %v448_v41 = vpack.c.bf16 %v1386_v40, %v1386_v40  ;;  %751 = vmatpush.bf16.msra.mxu3 %v1101_v39 }
 0xd7d   :  { %450 = vrot.lane.b32.xlu2 %v448_v41, %s1206_s0  ;;  %v1100_v41 = vld [vmem:[#allocation6] sm:$0xff] }
 0xd7e   :  { %660 = vmatpush.bf16.msra.mxu1 %v1100_v41  ;;  %706 = vmatpush.bf16.msra.mxu2 %v1100_v41 }
 0xd7f   :  { %752 = vmatpush.bf16.msra.mxu3 %v1100_v41 }
 0xd81   :  { %661 = vmatmul.bf16.vlgmr.msra.gmra.mxu1 %v1205_v12 }
 0xd82   :  { %843 = vmatpush.bf16.msrb.mxu1 %v1101_v39 }
 0xd86   :  { %844 = vmatpush.bf16.msrb.mxu1 %v1100_v41 }
 0xdd7   :  { %v451_v44 = vpop.permute.xlu2 %450 }
 0xdd8   :  { %1069 = vmatmul.msk.bf16.vlgmr.msrb.gmra.mxu2 %vm139_vm4, %v451_v44 }
 0xdd9   :  { %889 = vmatpush.bf16.msrb.mxu2 %v1101_v39 }
 0xddd   :  { %890 = vmatpush.bf16.msrb.mxu2 %v1100_v41 }
 0xe5b   :  { %v464_v46 = vpop.f32.mrf.mxu2 }
 0xe5c   :  { %v468_v48 = vadd.f32 %v464_v46, %v447_v45 }
 0xe5e   :  { %v469_v49 = vmul.f32 0.5, %v468_v48 }
 0xe60   :  { %v470_v50 = vsel %vm1286_vm3, %v468_v48, %v469_v49  ;;  %v662_v48 = vpop.f32.mrf.mxu1  ;;  %v1109_v49 = vld [vmem:[%s1537_s4] ss:$0 sm:$0xff] }
 0xe61   :  { %1135 = vtanh.f32 %v470_v50 }
 0xe63   :  { %v466_v51 = vpop.f32.mrf.mxu2 }
 0xe67   :  { %v1136_v52 = vpop.eup %1135 }
 0xe68   :  { %v472_v55 = vmul.f32 0.5, %v1136_v52  ;;  %v664_v12 = vpop.f32.mrf.mxu1 }
 0xe6a   :  { %v473_v56 = vadd.f32 0.5, %v472_v55 }
 0xe6c   :  { %v474_v53 = vsel %vm1286_vm3, %v1136_v52, %v473_v56 }
 0xe6d   :  { %477 = vrot.lane.b32.xlu0 %v474_v53, %s1202_s8  ;;  %v475_v5 = vmul.f32 %v474_v53, %v433_v36 }
 0xedf   :  { %v478_v54 = vpop.permute.xlu0 %477 }
 0xee0   :  { %v480_v57 = vmul.f32 %v478_v54, %v474_v53 }
 0xee2   :  { %482 = vrot.lane.b32.xlu1 %v480_v57, %s1206_s0 }
 0xf54   :  { %v483_v6 = vpop.permute.xlu1 %482 }
 0xf55   :  { %v485_v58 = vadd.f32 %v483_v6, %v475_v5 }
 0xf57   :  { %1137 = vtanh.f32 %v485_v58 }
 0xf5d   :  { %v1138_v60 = vpop.eup %1137 }
 0xf5e   :  { %488 = vrot.lane.b32.xlu2 %v1138_v60, %s1202_s8 }
 0xfb8   :  { %v489_v61 = vpop.permute.xlu2 %488 }
 0xfb9   :  { %v491_v62 = vmul.f32 %v489_v61, %v474_v53 }
 0xfbb   :  { %v500_v3 = vpack.c.bf16 %v491_v62, %v491_v62 }
 0xfbd   :  { %502 = vrot.lane.b32.xlu0 %v500_v3, %s1206_s0 }
0x102f   :  { %v503_v2 = vpop.permute.xlu0 %502 }
0x1030   :  { %1070 = vmatmul.msk.bf16.vlgmr.msrb.gmra.mxu3 %vm139_vm4, %v503_v2 }
0x1031   :  { %935 = vmatpush.bf16.msrb.mxu3 %v1101_v39 }
0x1035   :  { %936 = vmatpush.bf16.msrb.mxu3 %v1100_v41 }
0x10b3   :  { %v516_v7 = vpop.f32.mrf.mxu3 }
0x10b4   :  { %v520_v10 = vadd.f32 %v516_v7, %v499_v4 }
0x10b6   :  { %v521_v11 = vmul.f32 0.5, %v520_v10 }
0x10b8   :  { %v522_v13 = vsel %vm1286_vm3, %v520_v10, %v521_v11 }
0x10b9   :  { %1139 = vtanh.f32 %v522_v13 }
0x10bb   :  { %v518_v14 = vpop.f32.mrf.mxu3 }
0x10bf   :  { %v1140_v9 = vpop.eup %1139 }
0x10c0   :  { %v524_v15 = vmul.f32 0.5, %v1140_v9 }
0x10c2   :  { %v525_v16 = vadd.f32 0.5, %v524_v15 }
0x10c4   :  { %v526_v37 = vsel %vm1286_vm3, %v1140_v9, %v525_v16 }
0x10c5   :  { %529 = vrot.lane.b32.xlu1 %v526_v37, %s1202_s8  ;;  %v527_v25 = vmul.f32 %v526_v37, %v485_v58 }
0x10cd   :  { %181 = vrot.lane.b32.xlu1 %v1297_v33, %s1206_s0 }
0x10d5   :  { %337 = vrot.lane.b32.xlu1 %v1345_v47, %s1206_s0 }
0x10dd   :  { %493 = vrot.lane.b32.xlu1 %v491_v62, %s1206_s0 }
0x1137   :  { %v530_v17 = vpop.permute.xlu1 %529 }
0x1138   :  { %v532_v19 = vmul.f32 %v530_v17, %v526_v37 }
0x113a   :  { %534 = vrot.lane.b32.xlu2 %v532_v19, %s1206_s0 }
0x113f   :  { %v182_v20 = vpop.permute.xlu1 %181 }
0x1140   :  { %185 = vst.msk [vmem:[#allocation3] sm:$0x3] %vm184_vm5, %v182_v20 }
0x1142   :  { %233 = vrot.lane.b32.xlu2 %v1314_v59, %s1206_s0 }
0x1147   :  { %v550_v21 = vld [vmem:[#allocation3] sm:$0x3]  ;;  %v338_v23 = vpop.permute.xlu1 %337 }
0x1148   :  { %566 = vst [vmem:[#allocation1] ss:$4 sm:$0xff] %v550_v21 }
0x1149   :  { %341 = vst.msk [vmem:[#allocation3 + $0x6] sm:$0x3] %vm184_vm5, %v338_v23 }
0x114a   :  { %389 = vrot.lane.b32.xlu2 %v1371_v8, %s1206_s0 }
0x114f   :  { %v494_v33 = vpop.permute.xlu1 %493 }
0x1150   :  { %v553_v47 = vld [vmem:[#allocation3 + $0x6] sm:$0x3]  ;;  %497 = vst.msk [vmem:[#allocation3 + $0xc] sm:$0x3] %vm184_vm5, %v494_v33 }
0x1151   :  { %572 = vst [vmem:[#allocation1 + $0x3] ss:$4 sm:$0xff] %v553_v47 }
0x1157   :  { %v556_v24 = vld [vmem:[#allocation3 + $0xc] sm:$0x3] }
0x1158   :  { %578 = vst [vmem:[#allocation1 + $0x22] ss:$4 sm:$0xff] %v556_v24 }
0x1194   :  { %v535_v26 = vpop.permute.xlu2 %534 }
0x1195   :  { %v537_v27 = vadd.f32 %v535_v26, %v527_v25 }
0x1197   :  { %1141 = vtanh.f32 %v537_v27 }
0x119c   :  { %v234_v59 = vpop.permute.xlu2 %233 }
0x119d   :  { %v1142_v28 = vpop.eup %1141  ;;  %237 = vst.msk [vmem:[#allocation3 + $0x2] sm:$0x3] %vm184_vm5, %v234_v59 }
0x119e   :  { %540 = vrot.lane.b32.xlu0 %v1142_v28, %s1202_s8 }
0x11a4   :  { %v551_v29 = vld [vmem:[#allocation3 + $0x2] sm:$0x3]  ;;  %v390_v30 = vpop.permute.xlu2 %389 }
0x11a5   :  { %568 = vst [vmem:[#allocation1 + $0x1] ss:$4 sm:$0xff] %v551_v29 }
0x11a6   :  { %393 = vst.msk [vmem:[#allocation3 + $0x8] sm:$0x3] %vm184_vm5, %v390_v30  ;;  %285 = vrot.lane.b32.xlu0 %v1330_v22, %s1206_s0  ;;  %v1099_v22 = vld [vmem:[%s1535_s2 + $0x8] sm:$0xff] }
0x11a7   :  { %610 = vmatpush.bf16.msra.mxu0 %v1099_v22 }
0x11ad   :  { %v554_v8 = vld [vmem:[#allocation3 + $0x8] sm:$0x3] }
0x11ae   :  { %574 = vst [vmem:[#allocation1 + $0x20] ss:$4 sm:$0xff] %v554_v8  ;;  %441 = vrot.lane.b32.xlu0 %v1386_v40, %s1206_s0  ;;  %v1098_v40 = vld [vmem:[%s1535_s2] sm:$0xff] }
0x11af   :  { %611 = vmatpush.bf16.msra.mxu0 %v1098_v40 }
0x11b3   :  { %797 = vmatpush.bf16.msrb.mxu0 %v1101_v39 }
0x11b7   :  { %798 = vmatpush.bf16.msrb.mxu0 %v1100_v41 }
0x1210   :  { %v541_v31 = vpop.permute.xlu0 %540 }
0x1211   :  { %v543_v32 = vmul.f32 %v541_v31, %v526_v37 }
0x1213   :  { %545 = vrot.lane.b32.xlu2 %v543_v32, %s1206_s0 }
0x1218   :  { %v286_v34 = vpop.permute.xlu0 %285 }
0x1219   :  { %289 = vst.msk [vmem:[#allocation3 + $0x4] sm:$0x3] %vm184_vm5, %v286_v34 }
0x1220   :  { %v552_v35 = vld [vmem:[#allocation3 + $0x4] sm:$0x3]  ;;  %v442_v36 = vpop.permute.xlu0 %441 }
0x1221   :  { %570 = vst [vmem:[#allocation1 + $0x2] ss:$4 sm:$0xff] %v552_v35 }
0x1222   :  { %445 = vst.msk [vmem:[#allocation3 + $0xa] sm:$0x3] %vm184_vm5, %v442_v36 }
0x1228   :  { %v581_v44 = vld.sshfl [vmem:[#allocation1] sm:$0xff pattern:$0x73625140] }
0x1229   :  { %v555_v38 = vld [vmem:[#allocation3 + $0xa] sm:$0x3] }
0x122a   :  { %576 = vst [vmem:[#allocation1 + $0x21] ss:$4 sm:$0xff] %v555_v38 }
0x126d   :  { %v546_v42 = vpop.permute.xlu2 %545 }
0x126e   :  { %549 = vst.msk [vmem:[#allocation3 + $0xe] sm:$0x3] %vm184_vm5, %v546_v42 }
0x1275   :  { %v557_v43 = vld [vmem:[#allocation3 + $0xe] sm:$0x3] }
0x1276   :  { %580 = vst [vmem:[#allocation1 + $0x23] ss:$4 sm:$0xff] %v557_v43 }
0x127d   :  { %v582_v45 = vld.sshfl [vmem:[#allocation1 + $0x20] sm:$0xff pattern:$0x73625140] }
0x127e   :  { %v585_v46 = vpack.c.bf16 %v582_v45, %v581_v44 }
0x1280   :  { %1079 = vmatmul.msk.bf16.vlgmr.msra.gmra.mxu0 %vm139_vm4, %v585_v46 }
0x1281   :  { %981 = vmatpush.bf16.msra.mxu0 %v1101_v39 }
0x1285   :  { %982 = vmatpush.bf16.msra.mxu0 %v1100_v41 }
0x12fd   :  { %v613_v50 = vpop.f32.mrf.mxu0 }
0x12fe   :  { %v614_v51 = vadd.f32 %v1109_v49, %v613_v50 }
0x1300   :  { %v620_v52 = vrot.slane %v614_v51, 2  ;;  %v621_v55 = vrot.slane %v614_v51, 4  ;;  %v622_v56 = vrot.slane %v614_v51, 6  ;;  %632 = vst [vmem:[#allocation4] sm:$0x3] %v614_v51 }
0x1302   :  { %633 = vst [vmem:[#allocation4 + $0x2] sm:$0x3] %v620_v52 }
0x1303   :  { %634 = vst [vmem:[#allocation4 + $0x4] sm:$0x3] %v621_v55 }
0x1304   :  { %635 = vst [vmem:[#allocation4 + $0x6] sm:$0x3] %v622_v56 }
0x1305   :  { %v615_v53 = vpop.f32.mrf.mxu0 }
0x1306   :  { %v616_v54 = vadd.f32 %v1109_v49, %v615_v53 }
0x1307   :  { %v640_v57 = vld [vmem:[#allocation4] sm:$0x3] }
0x1308   :  { %v666_v5 = vadd.f32 %v662_v48, %v640_v57  ;;  %v623_v6 = vrot.slane %v616_v54, 2  ;;  %v624_v58 = vrot.slane %v616_v54, 4  ;;  %v625_v60 = vrot.slane %v616_v54, 6  ;;  %636 = vst [vmem:[#allocation4 + $0x8] sm:$0x3] %v616_v54 }
0x1309   :  { %v691_v37 = vld [vmem:[#allocation4 + $0x2] sm:$0x3] }
0x130a   :  { %v667_v61 = vmul.f32 0.5, %v666_v5  ;;  %637 = vst [vmem:[#allocation4 + $0xa] sm:$0x3] %v623_v6  ;;  %v737_v35 = vld [vmem:[#allocation4 + $0x4] sm:$0x3] }
0x130b   :  { %638 = vst [vmem:[#allocation4 + $0xc] sm:$0x3] %v624_v58  ;;  %v783_v53 = vld [vmem:[#allocation4 + $0x6] sm:$0x3] }
0x130c   :  { %v668_v62 = vsel %vm1286_vm3, %v666_v5, %v667_v61  ;;  %639 = vst [vmem:[#allocation4 + $0xe] sm:$0x3] %v625_v60 }
0x130d   :  { %1143 = vtanh.f32 %v668_v62 }
0x1313   :  { %v1144_v3 = vpop.eup %1143 }
0x1314   :  { %v670_v63 = vmul.f32 0.5, %v1144_v3 }
0x1316   :  { %v671_v0 = vadd.f32 0.5, %v670_v63 }
0x1318   :  { %v672_v1 = vsel %vm1286_vm3, %v1144_v3, %v671_v0 }
0x1319   :  { %675 = vrot.lane.b32.xlu0 %v672_v1, %s1202_s8  ;;  %v673_v7 = vmul.f32 0.0, %v672_v1 }
0x138b   :  { %v676_v2 = vpop.permute.xlu0 %675 }
0x138c   :  { %v678_v4 = vmul.f32 %v676_v2, %v672_v1 }
0x138e   :  { %680 = vrot.lane.b32.xlu1 %v678_v4, %s1206_s0 }
0x1400   :  { %v681_v10 = vpop.permute.xlu1 %680 }
0x1401   :  { %v683_v11 = vadd.f32 %v681_v10, %v673_v7 }
0x1403   :  { %1145 = vtanh.f32 %v683_v11 }
0x1409   :  { %v1146_v13 = vpop.eup %1145 }
0x140a   :  { %686 = vrot.lane.b32.xlu2 %v1146_v13, %s1202_s8 }
0x1464   :  { %v687_v14 = vpop.permute.xlu2 %686 }
0x1465   :  { %v689_v9 = vmul.f32 %v687_v14, %v672_v1 }
0x1467   :  { %v692_v15 = vpack.c.bf16 %v689_v9, %v689_v9  ;;  %v829_v9 = vld [vmem:[#allocation4 + $0x8] sm:$0x3] }
0x1469   :  { %694 = vrot.lane.b32.xlu0 %v692_v15, %s1206_s0 }
0x14db   :  { %v695_v16 = vpop.permute.xlu0 %694 }
0x14dc   :  { %1088 = vmatmul.msk.bf16.vlgmr.msra.gmra.mxu2 %vm139_vm4, %v695_v16 }
0x155f   :  { %v708_v17 = vpop.f32.mrf.mxu2 }
0x1560   :  { %v712_v19 = vadd.f32 %v708_v17, %v691_v37 }
0x1562   :  { %v713_v20 = vmul.f32 0.5, %v712_v19 }
0x1564   :  { %v714_v21 = vsel %vm1286_vm3, %v712_v19, %v713_v20 }
0x1565   :  { %1147 = vtanh.f32 %v714_v21 }
0x1567   :  { %v710_v23 = vpop.f32.mrf.mxu2 }
0x156b   :  { %v1148_v33 = vpop.eup %1147 }
0x156c   :  { %v716_v47 = vmul.f32 0.5, %v1148_v33 }
0x156e   :  { %v717_v24 = vadd.f32 0.5, %v716_v47 }
0x1570   :  { %v718_v25 = vsel %vm1286_vm3, %v1148_v33, %v717_v24 }
0x1571   :  { %721 = vrot.lane.b32.xlu1 %v718_v25, %s1202_s8  ;;  %v719_v59 = vmul.f32 %v718_v25, %v683_v11 }
0x15e3   :  { %v722_v26 = vpop.permute.xlu1 %721 }
0x15e4   :  { %v724_v27 = vmul.f32 %v722_v26, %v718_v25 }
0x15e6   :  { %726 = vrot.lane.b32.xlu2 %v724_v27, %s1206_s0 }
0x1640   :  { %v727_v28 = vpop.permute.xlu2 %726 }
0x1641   :  { %v729_v29 = vadd.f32 %v727_v28, %v719_v59 }
0x1643   :  { %1149 = vtanh.f32 %v729_v29 }
0x1649   :  { %v1150_v30 = vpop.eup %1149 }
0x164a   :  { %732 = vrot.lane.b32.xlu0 %v1150_v30, %s1202_s8 }
0x16bc   :  { %v733_v8 = vpop.permute.xlu0 %732 }
0x16bd   :  { %v735_v31 = vmul.f32 %v733_v8, %v718_v25 }
0x16bf   :  { %v738_v32 = vpack.c.bf16 %v735_v31, %v735_v31  ;;  %v875_v31 = vld [vmem:[#allocation4 + $0xa] sm:$0x3] }
0x16c1   :  { %740 = vrot.lane.b32.xlu1 %v738_v32, %s1206_s0 }
0x1733   :  { %v741_v34 = vpop.permute.xlu1 %740 }
0x1734   :  { %1089 = vmatmul.msk.bf16.vlgmr.msra.gmra.mxu3 %vm139_vm4, %v741_v34 }
0x17b7   :  { %v754_v36 = vpop.f32.mrf.mxu3 }
0x17b8   :  { %v758_v38 = vadd.f32 %v754_v36, %v737_v35 }
0x17ba   :  { %v759_v22 = vmul.f32 0.5, %v758_v38 }
0x17bc   :  { %v760_v39 = vsel %vm1286_vm3, %v758_v38, %v759_v22 }
0x17bd   :  { %1151 = vtanh.f32 %v760_v39 }
0x17bf   :  { %v756_v40 = vpop.f32.mrf.mxu3 }
0x17c3   :  { %v1152_v41 = vpop.eup %1151 }
0x17c4   :  { %v762_v42 = vmul.f32 0.5, %v1152_v41 }
0x17c6   :  { %v763_v43 = vadd.f32 0.5, %v762_v42 }
0x17c8   :  { %v764_v44 = vsel %vm1286_vm3, %v1152_v41, %v763_v43 }
0x17c9   :  { %767 = vrot.lane.b32.xlu2 %v764_v44, %s1202_s8  ;;  %v765_v48 = vmul.f32 %v764_v44, %v729_v29 }
0x1823   :  { %v768_v45 = vpop.permute.xlu2 %767 }
0x1824   :  { %v770_v46 = vmul.f32 %v768_v45, %v764_v44 }
0x1826   :  { %772 = vrot.lane.b32.xlu0 %v770_v46, %s1206_s0 }
0x1898   :  { %v773_v12 = vpop.permute.xlu0 %772 }
0x1899   :  { %v775_v49 = vadd.f32 %v773_v12, %v765_v48 }
0x189b   :  { %1153 = vtanh.f32 %v775_v49 }
0x18a1   :  { %v1154_v50 = vpop.eup %1153 }
0x18a2   :  { %778 = vrot.lane.b32.xlu1 %v1154_v50, %s1202_s8 }
0x1914   :  { %v779_v51 = vpop.permute.xlu1 %778 }
0x1915   :  { %v781_v52 = vmul.f32 %v779_v51, %v764_v44 }
0x1917   :  { %v784_v55 = vpack.c.bf16 %v781_v52, %v781_v52  ;;  %v921_v52 = vld [vmem:[#allocation4 + $0xc] sm:$0x3] }
0x1919   :  { %786 = vrot.lane.b32.xlu2 %v784_v55, %s1206_s0 }
0x1973   :  { %v787_v56 = vpop.permute.xlu2 %786 }
0x1974   :  { %1090 = vmatmul.msk.bf16.vlgmr.msrb.gmra.mxu0 %vm139_vm4, %v787_v56 }
0x19f1   :  { %v800_v54 = vpop.f32.mrf.mxu0 }
0x19f2   :  { %v804_v57 = vadd.f32 %v800_v54, %v783_v53 }
0x19f4   :  { %v805_v5 = vmul.f32 0.5, %v804_v57 }
0x19f6   :  { %v806_v6 = vsel %vm1286_vm3, %v804_v57, %v805_v5 }
0x19f7   :  { %1155 = vtanh.f32 %v806_v6 }
0x19f9   :  { %v802_v58 = vpop.f32.mrf.mxu0 }
0x19fd   :  { %v1156_v60 = vpop.eup %1155 }
0x19fe   :  { %v808_v61 = vmul.f32 0.5, %v1156_v60 }
0x1a00   :  { %v809_v62 = vadd.f32 0.5, %v808_v61 }
0x1a02   :  { %v810_v3 = vsel %vm1286_vm3, %v1156_v60, %v809_v62 }
0x1a03   :  { %813 = vrot.lane.b32.xlu0 %v810_v3, %s1202_s8  ;;  %v811_v1 = vmul.f32 %v810_v3, %v775_v49 }
0x1a75   :  { %v814_v63 = vpop.permute.xlu0 %813 }
0x1a76   :  { %v816_v0 = vmul.f32 %v814_v63, %v810_v3 }
0x1a78   :  { %818 = vrot.lane.b32.xlu1 %v816_v0, %s1206_s0 }
0x1aea   :  { %v819_v2 = vpop.permute.xlu1 %818 }
0x1aeb   :  { %v821_v4 = vadd.f32 %v819_v2, %v811_v1 }
0x1aed   :  { %1157 = vtanh.f32 %v821_v4 }
0x1af3   :  { %v1158_v7 = vpop.eup %1157 }
0x1af4   :  { %824 = vrot.lane.b32.xlu2 %v1158_v7, %s1202_s8 }
0x1b4e   :  { %v825_v10 = vpop.permute.xlu2 %824 }
0x1b4f   :  { %v827_v11 = vmul.f32 %v825_v10, %v810_v3 }
0x1b51   :  { %v830_v13 = vpack.c.bf16 %v827_v11, %v827_v11  ;;  %v967_v11 = vld [vmem:[#allocation4 + $0xe] sm:$0x3] }
0x1b53   :  { %832 = vrot.lane.b32.xlu0 %v830_v13, %s1206_s0 }
0x1bc5   :  { %v833_v14 = vpop.permute.xlu0 %832 }
0x1bc6   :  { %1091 = vmatmul.msk.bf16.vlgmr.msrb.gmra.mxu1 %vm139_vm4, %v833_v14 }
0x1c43   :  { %v846_v15 = vpop.f32.mrf.mxu1 }
0x1c44   :  { %v850_v16 = vadd.f32 %v846_v15, %v829_v9 }
0x1c46   :  { %v851_v37 = vmul.f32 0.5, %v850_v16 }
0x1c48   :  { %v852_v17 = vsel %vm1286_vm3, %v850_v16, %v851_v37 }
0x1c49   :  { %1159 = vtanh.f32 %v852_v17 }
0x1c4b   :  { %v848_v19 = vpop.f32.mrf.mxu1 }
0x1c4f   :  { %v1160_v20 = vpop.eup %1159 }
0x1c50   :  { %v854_v21 = vmul.f32 0.5, %v1160_v20 }
0x1c52   :  { %v855_v23 = vadd.f32 0.5, %v854_v21 }
0x1c54   :  { %v856_v33 = vsel %vm1286_vm3, %v1160_v20, %v855_v23 }
0x1c55   :  { %859 = vrot.lane.b32.xlu1 %v856_v33, %s1202_s8  ;;  %v857_v25 = vmul.f32 %v856_v33, %v821_v4 }
0x1cc7   :  { %v860_v47 = vpop.permute.xlu1 %859 }
0x1cc8   :  { %v862_v24 = vmul.f32 %v860_v47, %v856_v33 }
0x1cca   :  { %864 = vrot.lane.b32.xlu2 %v862_v24, %s1206_s0 }
0x1d24   :  { %v865_v26 = vpop.permute.xlu2 %864 }
0x1d25   :  { %v867_v27 = vadd.f32 %v865_v26, %v857_v25  ;;  %v1015_v26 = vld [vmem:[%s1538_s5 + $0x18] sm:$0xff] }
0x1d26   :  { %1037 = vmatpush.msra.mxu1 %v1015_v26 }
0x1d27   :  { %1161 = vtanh.f32 %v867_v27 }
0x1d28   :  { %1038 = vmatpush.msra.mxu1 %v1014_v18 }
0x1d2d   :  { %v1162_v59 = vpop.eup %1161 }
0x1d2e   :  { %870 = vrot.lane.b32.xlu0 %v1162_v59, %s1202_s8  ;;  %v1012_v59 = vld [vmem:[%s1538_s5] sm:$0xff] }
0x1da0   :  { %v871_v28 = vpop.permute.xlu0 %870 }
0x1da1   :  { %v873_v29 = vmul.f32 %v871_v28, %v856_v33 }
0x1da3   :  { %v876_v30 = vpack.c.bf16 %v873_v29, %v873_v29 }
0x1da5   :  { %878 = vrot.lane.b32.xlu1 %v876_v30, %s1206_s0 }
0x1e17   :  { %v879_v8 = vpop.permute.xlu1 %878 }
0x1e18   :  { %1092 = vmatmul.msk.bf16.vlgmr.msrb.gmra.mxu2 %vm139_vm4, %v879_v8  ;;  %v1110_v8 = vld [vmem:[#allocation5] ss:$0 sm:$0xff] }
0x1e9b   :  { %v892_v32 = vpop.f32.mrf.mxu2 }
0x1e9c   :  { %v896_v34 = vadd.f32 %v892_v32, %v875_v31 }
0x1e9e   :  { %v897_v35 = vmul.f32 0.5, %v896_v34 }
0x1ea0   :  { %v898_v36 = vsel %vm1286_vm3, %v896_v34, %v897_v35 }
0x1ea1   :  { %1163 = vtanh.f32 %v898_v36 }
0x1ea3   :  { %v894_v38 = vpop.f32.mrf.mxu2 }
0x1ea7   :  { %v1164_v22 = vpop.eup %1163 }
0x1ea8   :  { %v900_v39 = vmul.f32 0.5, %v1164_v22 }
0x1eaa   :  { %v901_v40 = vadd.f32 0.5, %v900_v39 }
0x1eac   :  { %v902_v41 = vsel %vm1286_vm3, %v1164_v22, %v901_v40 }
0x1ead   :  { %905 = vrot.lane.b32.xlu2 %v902_v41, %s1202_s8  ;;  %v903_v44 = vmul.f32 %v902_v41, %v867_v27  ;;  %v1013_v27 = vld [vmem:[%s1538_s5 + $0x8] sm:$0xff] }
0x1eae   :  { %1039 = vmatpush.msra.mxu1 %v1013_v27 }
0x1eb0   :  { %1040 = vmatpush.msra.mxu1 %v1012_v59 }
0x1f07   :  { %v906_v42 = vpop.permute.xlu2 %905 }
0x1f08   :  { %v908_v43 = vmul.f32 %v906_v42, %v902_v41 }
0x1f0a   :  { %910 = vrot.lane.b32.xlu0 %v908_v43, %s1206_s0 }
0x1f7c   :  { %v911_v45 = vpop.permute.xlu0 %910 }
0x1f7d   :  { %v913_v46 = vadd.f32 %v911_v45, %v903_v44 }
0x1f7f   :  { %1165 = vtanh.f32 %v913_v46 }
0x1f85   :  { %v1166_v48 = vpop.eup %1165 }
0x1f86   :  { %916 = vrot.lane.b32.xlu1 %v1166_v48, %s1202_s8 }
0x1ff8   :  { %v917_v12 = vpop.permute.xlu1 %916 }
0x1ff9   :  { %v919_v49 = vmul.f32 %v917_v12, %v902_v41 }
0x1ffb   :  { %v922_v50 = vpack.c.bf16 %v919_v49, %v919_v49 }
0x1ffd   :  { %924 = vrot.lane.b32.xlu2 %v922_v50, %s1206_s0 }
0x2057   :  { %v925_v51 = vpop.permute.xlu2 %924 }
0x2058   :  { %1093 = vmatmul.msk.bf16.vlgmr.msrb.gmra.mxu3 %vm139_vm4, %v925_v51 }
0x20db   :  { %v938_v55 = vpop.f32.mrf.mxu3 }
0x20dc   :  { %v942_v56 = vadd.f32 %v938_v55, %v921_v52 }
0x20de   :  { %v943_v53 = vmul.f32 0.5, %v942_v56 }
0x20e0   :  { %v944_v54 = vsel %vm1286_vm3, %v942_v56, %v943_v53 }
0x20e1   :  { %1167 = vtanh.f32 %v944_v54 }
0x20e3   :  { %v940_v57 = vpop.f32.mrf.mxu3 }
0x20e7   :  { %v1168_v5 = vpop.eup %1167 }
0x20e8   :  { %v946_v6 = vmul.f32 0.5, %v1168_v5 }
0x20ea   :  { %v947_v58 = vadd.f32 0.5, %v946_v6 }
0x20ec   :  { %v948_v60 = vsel %vm1286_vm3, %v1168_v5, %v947_v58 }
0x20ed   :  { %951 = vrot.lane.b32.xlu0 %v948_v60, %s1202_s8  ;;  %v949_v3 = vmul.f32 %v948_v60, %v913_v46 }
0x215f   :  { %v952_v61 = vpop.permute.xlu0 %951 }
0x2160   :  { %v954_v62 = vmul.f32 %v952_v61, %v948_v60 }
0x2162   :  { %956 = vrot.lane.b32.xlu1 %v954_v62, %s1206_s0 }
0x21d4   :  { %v957_v63 = vpop.permute.xlu1 %956 }
0x21d5   :  { %v959_v0 = vadd.f32 %v957_v63, %v949_v3 }
0x21d7   :  { %1169 = vtanh.f32 %v959_v0 }
0x21dd   :  { %v1170_v1 = vpop.eup %1169 }
0x21de   :  { %962 = vrot.lane.b32.xlu2 %v1170_v1, %s1202_s8 }
0x2238   :  { %v963_v2 = vpop.permute.xlu2 %962 }
0x2239   :  { %v965_v4 = vmul.f32 %v963_v2, %v948_v60 }
0x223b   :  { %v968_v7 = vpack.c.bf16 %v965_v4, %v965_v4 }
0x223d   :  { %970 = vrot.lane.b32.xlu0 %v968_v7, %s1206_s0 }
0x22af   :  { %v971_v10 = vpop.permute.xlu0 %970 }
0x22b0   :  { %1094 = vmatmul.msk.bf16.vlgmr.msra.gmra.mxu0 %vm139_vm4, %v971_v10 }
0x232d   :  { %v984_v13 = vpop.f32.mrf.mxu0 }
0x232e   :  { %v988_v14 = vadd.f32 %v984_v13, %v967_v11 }
0x2330   :  { %v989_v9 = vmul.f32 0.5, %v988_v14 }
0x2332   :  { %v990_v15 = vsel %vm1286_vm3, %v988_v14, %v989_v9 }
0x2333   :  { %1171 = vtanh.f32 %v990_v15 }
0x2335   :  { %v986_v16 = vpop.f32.mrf.mxu0 }
0x2339   :  { %v1172_v37 = vpop.eup %1171 }
0x233a   :  { %v992_v17 = vmul.f32 0.5, %v1172_v37 }
0x233c   :  { %v993_v19 = vadd.f32 0.5, %v992_v17 }
0x233e   :  { %v994_v20 = vsel %vm1286_vm3, %v1172_v37, %v993_v19 }
0x233f   :  { %997 = vrot.lane.b32.xlu1 %v994_v20, %s1202_s8  ;;  %v995_v33 = vmul.f32 %v994_v20, %v959_v0 }
0x23b1   :  { %v998_v21 = vpop.permute.xlu1 %997 }
0x23b2   :  { %v1000_v23 = vmul.f32 %v998_v21, %v994_v20 }
0x23b4   :  { %1002 = vrot.lane.b32.xlu2 %v1000_v23, %s1206_s0 }
0x240e   :  { %v1003_v47 = vpop.permute.xlu2 %1002 }
0x240f   :  { %v1005_v24 = vadd.f32 %v1003_v47, %v995_v33 }
0x2411   :  { %1173 = vtanh.f32 %v1005_v24 }
0x2417   :  { %v1174_v25 = vpop.eup %1173 }
0x2418   :  { %1008 = vrot.lane.b32.xlu0 %v1174_v25, %s1202_s8 }
0x248a   :  { %v1009_v28 = vpop.permute.xlu0 %1008 }
0x248b   :  { %v1011_v29 = vmul.f32 %v1009_v28, %v994_v20 }
0x248d   :  { %1021 = vrot.lane.b32.xlu1 %v1011_v29, %s1206_s0 }
0x24ff   :  { %v1022_v30 = vpop.permute.xlu1 %1021 }
0x2500   :  { %1095 = vmatmul.msk.f32.vlgmr.msra.gmra.mxu1 %vm139_vm4, %v1022_v30 }
0x257d   :  { %v1042_v31 = vpop.f32.mrf.mxu1 }
0x257e   :  { %v1043_v32 = vadd.f32 %v1110_v8, %v1042_v31 }
0x2580   :  { %1046 = vst.msk [vmem:[%s1540_s7] sm:$0x3] %vm1045_vm6, %v1043_v32 }
0x2581   :  { %1051 = vsyncpa [#allocation7], 1 }

// kernel: model_forward.2
= control target key start
LH: loop header
LB: loop body
LE: loop exit
PB: predicated region body
PF: predicated region fallthrough
CT: control target
= control target key end

     0   :  { %14 = vsyncpa [#allocation4], 0  ;;  %s4739_s0 = inlined_call_operand.vmem [shape: f32[4,16,256], index: 0, kind: input, shape index: {}]   ;;  %s4740_s1 = inlined_call_operand.vmem [shape: f32[3,4], index: 1, kind: input, shape index: {}]   ;;  %s4741_s2 = inlined_call_operand.vmem [shape: f32[3], index: 2, kind: input, shape index: {}]   ;;  %s4742_s3 = inlined_call_operand.hbm [shape: f32[3,1280], index: 3, kind: input, shape index: {}]   ;;  %s4743_s4 = inlined_call_operand.hbm [shape: f32[1,1280], index: 4, kind: input, shape index: {}]   ;;  %s4744_s5 = inlined_call_operand.vmem [shape: bf16[1280,256], index: 5, kind: input, shape index: {}]   ;;  %s4745_s6 = inlined_call_operand.vmem [shape: f32[1,256], index: 6, kind: input, shape index: {}]   ;;  %s4746_s7 = inlined_call_operand.vmem [shape: bf16[256,128], index: 7, kind: input, shape index: {}]   ;;  %s4747_s8 = inlined_call_operand.vmem [shape: f32[1,128], index: 8, kind: input, shape index: {}]   ;;  %s4748_s9 = inlined_call_operand.vmem [shape: f32[16,128], index: 9, kind: output, shape index: {}]  }
   0x1   :  { %15 = vsyncpa [#allocation6], 0 }
   0x2   :  { %16 = vsyncpa [#allocation3], 0  ;;  %s25_s11 = sshll.u32 %s4740_s1, 4  ;;  %s26_s11 = int_to_ptr.vmem [resolvable:$true] %s25_s11 }
   0x3   :  { %17 = vsyncpa [#allocation9], 0  ;;  %s34_s14 = sshll.u32 %s4741_s2, 4  ;;  %s2948_s15 = smov [#allocation2]   ;;  %s35_s14 = int_to_ptr.vmem [resolvable:$true] %s34_s14 }
   0x4   :  { %28 = dma.vmem_to_smem %s26_s11, 64, %s2948_s15, [#allocation4]  }
   0x5   :  { %s2949_s16 = smov [#allocation5]   ;;  %s43_s19 = sshll.u32 %s4742_s3, 4  ;;  %s44_s19 = int_to_ptr.hbm [resolvable:$true] %s43_s19 }
   0x6   :  { %37 = dma.vmem_to_smem %s35_s14, 16, %s2949_s16, [#allocation6]  }
   0x7   :  { %s2950_s20 = smov [#allocation7]   ;;  %s54_s23 = sshll.u32 %s4743_s4, 4  ;;  %s55_s23 = int_to_ptr.hbm [resolvable:$true] %s54_s23 }
   0x8   :  { %s45_s21 = sshll.u32 %s2950_s20, 4  ;;  %s2951_s2 = smov [#allocation8]   ;;  %s46_s21 = int_to_ptr.vmem [resolvable:$true] %s45_s21 }
   0x9   :  { %48 = dma.hbm_to_vmem [thread:$0]  %s44_s19, 640, %s46_s21, [#allocation3]  }
   0xa   :  { %s56_s24 = sshll.u32 %s2951_s2, 4  ;;  %s57_s24 = int_to_ptr.vmem [resolvable:$true] %s56_s24 }
   0xb   :  { %59 = dma.hbm_to_vmem [thread:$0]  %s55_s23, 160, %s57_s24, [#allocation9]  }
   0xc   :  { %2940 = dma.done.wait [#allocation4], 64  }
   0xd   :  { %2941 = vsyncadd [#allocation4], 4294967232 }
   0xe   :  { %2942 = dma.done.wait [#allocation6], 16  }
   0xf   :  { %2943 = vsyncadd [#allocation6], 4294967280 }
  0x10   :  { %2944 = dma.done.wait [#allocation3], 640  }
  0x11   :  { %2945 = vsyncadd [#allocation3], 4294966656 }
  0x12   :  { %2946 = dma.done.wait [#allocation9], 160  }
  0x13   :  { %2947 = vsyncadd [#allocation9], 4294967136 }
  0x14   :  { %84 = sfence }
  0x15   :  { %s104_s3 = sld [smem:[#allocation2]]  ;;  %v3017_v0 = vld [vmem:[%s4739_s0] sm:$0xff]  ;;  %v3022_v1 = vld [vmem:[%s4739_s0 + $0x8] sm:$0xff]  ;;  %v3034_v3 = vld [vmem:[%s4739_s0 + $0x10] sm:$0xff] }
  0x16   :  { %s1970_s25 = sld [smem:[#allocation2 + $0x1]]  ;;  %v3027_v2 = vld [vmem:[%s4739_s0 + $0x20] sm:$0xff]  ;;  %v3039_v4 = vld [vmem:[%s4739_s0 + $0x28] sm:$0xff]  ;;  %v3046_v5 = vld [vmem:[%s4739_s0 + $0x18] sm:$0xff] }
  0x17   :  { %s1971_s26 = sld [smem:[#allocation2 + $0x2]]  ;;  %v3051_v6 = vld [vmem:[%s4739_s0 + $0x40] sm:$0xff]  ;;  %v3056_v7 = vld [vmem:[%s4739_s0 + $0x48] sm:$0xff]  ;;  %v3063_v9 = vld [vmem:[%s4739_s0 + $0x30] sm:$0xff] }
  0x18   :  { %s1972_s28 = sld [smem:[#allocation2 + $0x3]]  ;;  %v3068_v10 = vld [vmem:[%s4739_s0 + $0x60] sm:$0xff]  ;;  %v3073_v11 = vld [vmem:[%s4739_s0 + $0x68] sm:$0xff]  ;;  %v3089_v19 = vld [vmem:[%s4739_s0 + $0x38] sm:$0xff] }
  0x19   :  { %s3029_s12 = sld [smem:[#allocation5]]  ;;  %v3110_v29 = vld [vmem:[%s4739_s0 + $0x50] sm:$0xff] }
  0x1a   :  { %s3041_s17 = sld [smem:[#allocation2 + $0x80]] }
  0x1b   :  { %v105_v8 = vstv %s104_s3  ;;  %s3058_s23 = sld [smem:[#allocation2 + $0x81]] }
  0x1c   :  { %v106_v12 = vmul.f32 %v105_v8, %v3017_v0  ;;  %v107_v13 = vmul.f32 %v105_v8, %v3022_v1  ;;  %v111_v14 = vstv %s1970_s25  ;;  %s3077_s3 = sld [smem:[#allocation2 + $0x82]]  ;;  %v108_v15 = vmul.f32 %v105_v8, %v3034_v3 }
  0x1d   :  { %v112_v16 = vmul.f32 %v3027_v2, %v111_v14  ;;  %v113_v17 = vmul.f32 %v3039_v4, %v111_v14  ;;  %v3082_v18 = vstv %s1971_s26  ;;  %s3084_s10 = sld [smem:[#allocation2 + $0x83]]  ;;  %v109_v20 = vmul.f32 %v105_v8, %v3046_v5 }
  0x1e   :  { %v122_v21 = vmul.f32 %v3051_v6, %v3082_v18  ;;  %v123_v22 = vmul.f32 %v3056_v7, %v3082_v18  ;;  %v3096_v23 = vstv %s1972_s28  ;;  %s3098_s25 = sld [smem:[#allocation5 + $0x1]]  ;;  %v114_v24 = vmul.f32 %v3063_v9, %v111_v14 }
  0x1f   :  { %v116_v25 = vadd.f32 %v112_v16, %v106_v12  ;;  %v117_v26 = vadd.f32 %v113_v17, %v107_v13  ;;  %v132_v27 = vmul.f32 %v3068_v10, %v3096_v23  ;;  %v133_v28 = vmul.f32 %v3073_v11, %v3096_v23  ;;  %s3105_s26 = sld [smem:[#allocation2 + $0x100]] }
  0x20   :  { %v3113_v30 = vstv %s3029_s12  ;;  %v3116_v31 = vstv %s3041_s17  ;;  %s1979_s28 = sld [smem:[#allocation2 + $0x101]]  ;;  %v115_v32 = vmul.f32 %v3089_v19, %v111_v14  ;;  %v118_v33 = vadd.f32 %v114_v24, %v108_v15 }
  0x21   :  { %v126_v34 = vadd.f32 %v122_v21, %v116_v25  ;;  %v127_v35 = vadd.f32 %v123_v22, %v117_v26  ;;  %v160_v36 = vmul.f32 %v3116_v31, %v3017_v0  ;;  %v161_v37 = vmul.f32 %v3116_v31, %v3022_v1  ;;  %s3123_s16 = sld [smem:[#allocation2 + $0x102]]  ;;  %v1968_v25 = vld [vmem:[%s4739_s0 + $0x70] sm:$0xff] }
  0x22   :  { %v3126_v38 = vstv %s3058_s23  ;;  %v3129_v39 = vstv %s3077_s3  ;;  %s3131_s12 = sld [smem:[#allocation2 + $0x103]]  ;;  %v119_v40 = vadd.f32 %v115_v32, %v109_v20  ;;  %v124_v41 = vmul.f32 %v3110_v29, %v3082_v18 }
  0x23   :  { %v136_v42 = vadd.f32 %v132_v27, %v126_v34  ;;  %v137_v43 = vadd.f32 %v133_v28, %v127_v35  ;;  %v166_v44 = vmul.f32 %v3027_v2, %v3126_v38  ;;  %v167_v45 = vmul.f32 %v3039_v4, %v3126_v38  ;;  %s3139_s17 = sld [smem:[#allocation5 + $0x2]] }
  0x24   :  { %v176_v46 = vmul.f32 %v3051_v6, %v3129_v39  ;;  %v177_v47 = vmul.f32 %v3056_v7, %v3129_v39  ;;  %v3146_v48 = vstv %s3084_s10  ;;  %v3149_v49 = vstv %s3098_s25 }
  0x25   :  { %v142_v50 = vadd.f32 %v3113_v30, %v136_v42  ;;  %v143_v51 = vadd.f32 %v3113_v30, %v137_v43  ;;  %v170_v52 = vadd.f32 %v166_v44, %v160_v36  ;;  %v171_v53 = vadd.f32 %v167_v45, %v161_v37 }
  0x26   :  { %v186_v54 = vmul.f32 %v3068_v10, %v3146_v48  ;;  %v187_v55 = vmul.f32 %v3073_v11, %v3146_v48  ;;  %v3158_v56 = vstv %s3105_s26  ;;  %v3160_v57 = vstv %s1979_s28 }
  0x27   :  { %v146_v58 = vmax.f32 %v142_v50, 0.0  ;;  %v147_v59 = vmax.f32 %v143_v51, 0.0  ;;  %v180_v60 = vadd.f32 %v176_v46, %v170_v52  ;;  %v181_v61 = vadd.f32 %v177_v47, %v171_v53 }
  0x28   :  { %v214_v62 = vmul.f32 %v3158_v56, %v3017_v0  ;;  %v215_v63 = vmul.f32 %v3158_v56, %v3022_v1  ;;  %v220_v8 = vmul.f32 %v3027_v2, %v3160_v57  ;;  %v221_v12 = vmul.f32 %v3039_v4, %v3160_v57  ;;  %v1965_v1 = vld [vmem:[%s4739_s0 + $0x58] sm:$0xff] }
  0x29   :  { %v150_v13 = vadd.f32 %v147_v59, %v146_v58  ;;  %v190_v14 = vadd.f32 %v186_v54, %v180_v60  ;;  %v191_v15 = vadd.f32 %v187_v55, %v181_v61  ;;  %v229_v16 = vstv %s3123_s16 }
  0x2a   :  { %v224_v17 = vadd.f32 %v220_v8, %v214_v62  ;;  %v225_v20 = vadd.f32 %v221_v12, %v215_v63  ;;  %v230_v21 = vmul.f32 %v3051_v6, %v229_v16  ;;  %v231_v0 = vmul.f32 %v3056_v7, %v229_v16  ;;  %v3190_v6 = vld [vmem:[%s4739_s0 + $0x78] sm:$0xff] }
  0x2b   :  { %151 = vadd.xlane.f32.xlu0 %v150_v13  ;;  %v196_v2 = vadd.f32 %v3149_v49, %v190_v14  ;;  %v197_v22 = vadd.f32 %v3149_v49, %v191_v15  ;;  %v3179_v4 = vstv %s3131_s12  ;;  %v3182_v24 = vstv %s3139_s17  ;;  %v2718_v14 = vld [vmem:[%s4744_s5 + $0xf4] sm:$0xf0] }
  0x2c   :  { %v234_v7 = vadd.f32 %v230_v21, %v224_v17  ;;  %v235_v26 = vadd.f32 %v231_v0, %v225_v20  ;;  %v240_v27 = vmul.f32 %v3068_v10, %v3179_v4  ;;  %v241_v28 = vmul.f32 %v3073_v11, %v3179_v4 }
  0x2d   :  { %v200_v32 = vmax.f32 %v196_v2, 0.0  ;;  %v201_v34 = vmax.f32 %v197_v22, 0.0  ;;  %v125_v35 = vmul.f32 %v1965_v1, %v3082_v18  ;;  %v128_v36 = vadd.f32 %v124_v41, %v118_v33 }
  0x2e   :  { %v244_v37 = vadd.f32 %v240_v27, %v234_v7  ;;  %v245_v42 = vadd.f32 %v241_v28, %v235_v26  ;;  %v134_v43 = vmul.f32 %v1968_v25, %v3096_v23  ;;  %v135_v44 = vmul.f32 %v3190_v6, %v3096_v23  ;;  %v2716_v28 = vld [vmem:[%s4744_s5 + $0xe4] sm:$0xf0] }
  0x2f   :  { %v204_v45 = vadd.f32 %v201_v34, %v200_v32  ;;  %v129_v46 = vadd.f32 %v125_v35, %v119_v40  ;;  %v162_v10 = vmul.f32 %v3116_v31, %v3034_v3  ;;  %v163_v11 = vmul.f32 %v3116_v31, %v3046_v5  ;;  %v2161_v32 = vld [vmem:[%s4744_s5 + $0x160] sm:$0xf] }
  0x30   :  { %v250_v47 = vadd.f32 %v3182_v24, %v244_v37  ;;  %v251_v18 = vadd.f32 %v3182_v24, %v245_v42  ;;  %v138_v33 = vadd.f32 %v134_v43, %v128_v36  ;;  %v168_v41 = vmul.f32 %v3063_v9, %v3126_v38  ;;  %v2748_v42 = vld [vmem:[%s4744_s5 + $0x1e4] sm:$0xf0] }
  0x31   :  { %205 = vadd.xlane.f32.xlu1 %v204_v45  ;;  %v139_v50 = vadd.f32 %v135_v44, %v129_v46  ;;  %v169_v23 = vmul.f32 %v3089_v19, %v3126_v38  ;;  %v178_v40 = vmul.f32 %v3110_v29, %v3129_v39  ;;  %v179_v51 = vmul.f32 %v1965_v1, %v3129_v39  ;;  %v2041_v39 = vld [vmem:[%s4744_s5 + $0x70] sm:$0xf] }
  0x32   :  { %v254_v52 = vmax.f32 %v250_v47, 0.0  ;;  %v255_v31 = vmax.f32 %v251_v18, 0.0  ;;  %v144_v53 = vadd.f32 %v3113_v30, %v138_v33  ;;  %v172_v54 = vadd.f32 %v168_v41, %v162_v10  ;;  %v2025_v47 = vld [vmem:[%s4744_s5 + $0x50] sm:$0xf]  ;;  %v2698_v18 = vld [vmem:[%s4744_s5 + $0x54] sm:$0xf0] }
  0x33   :  { %v145_v55 = vadd.f32 %v3113_v30, %v139_v50  ;;  %v173_v58 = vadd.f32 %v169_v23, %v163_v11  ;;  %v188_v59 = vmul.f32 %v1968_v25, %v3146_v48  ;;  %v189_v60 = vmul.f32 %v3190_v6, %v3146_v48  ;;  %v2702_v30 = vld [vmem:[%s4744_s5 + $0x74] sm:$0xf0]  ;;  %v2089_v23 = vld [vmem:[%s4744_s5 + $0xd0] sm:$0xf] }
  0x34   :  { %v258_v61 = vadd.f32 %v255_v31, %v254_v52  ;;  %v148_v38 = vmax.f32 %v144_v53, 0.0  ;;  %v182_v62 = vadd.f32 %v178_v40, %v172_v54  ;;  %v216_v63 = vmul.f32 %v3158_v56, %v3034_v3  ;;  %v2105_v3 = vld [vmem:[%s4744_s5 + $0xf0] sm:$0xf]  ;;  %v2714_v40 = vld [vmem:[%s4744_s5 + $0xd4] sm:$0xf0] }
  0x35   :  { %v149_v8 = vmax.f32 %v145_v55, 0.0  ;;  %v183_v12 = vadd.f32 %v179_v51, %v173_v58  ;;  %v217_v13 = vmul.f32 %v3158_v56, %v3046_v5  ;;  %v222_v48 = vmul.f32 %v3063_v9, %v3160_v57  ;;  %v2169_v5 = vld [vmem:[%s4744_s5 + $0x170] sm:$0xf]  ;;  %v2734_v9 = vld [vmem:[%s4744_s5 + $0x174] sm:$0xf0] }
  0x36   :  { %259 = vadd.xlane.f32.xlu2 %v258_v61  ;;  %v192_v15 = vadd.f32 %v188_v59, %v182_v62  ;;  %v223_v17 = vmul.f32 %v3089_v19, %v3160_v57  ;;  %v232_v20 = vmul.f32 %v3110_v29, %v229_v16  ;;  %v233_v21 = vmul.f32 %v1965_v1, %v229_v16  ;;  %v2233_v56 = vld [vmem:[%s4744_s5 + $0x1f0] sm:$0xf]  ;;  %v2750_v29 = vld [vmem:[%s4744_s5 + $0x1f4] sm:$0xf0]  ;;  %v2033_v57 = vld [vmem:[%s4744_s5 + $0x60] sm:$0xf] }
  0x37   :  { %v153_v0 = vadd.f32 %v149_v8, %v148_v38  ;;  %v193_v2 = vadd.f32 %v189_v60, %v183_v12  ;;  %v226_v22 = vadd.f32 %v222_v48, %v216_v63  ;;  %v242_v19 = vmul.f32 %v1968_v25, %v3179_v4  ;;  %v2700_v16 = vld [vmem:[%s4744_s5 + $0x64] sm:$0xf0]  ;;  %v2097_v25 = vld [vmem:[%s4744_s5 + $0xe0] sm:$0xf]  ;;  %v2153_v31 = vld [vmem:[%s4744_s5 + $0x150] sm:$0xf] }
  0x38   :  { %v198_v1 = vadd.f32 %v3149_v49, %v192_v15  ;;  %v227_v7 = vadd.f32 %v223_v17, %v217_v13  ;;  %v243_v26 = vmul.f32 %v3190_v6, %v3179_v4  ;;  %v2042_v27 = vor.u32 %v2702_v30, %v2041_v39  ;;  %v2732_v4 = vld [vmem:[%s4744_s5 + $0x164] sm:$0xf0]  ;;  %v2225_v6 = vld [vmem:[%s4744_s5 + $0x1e0] sm:$0xf]  ;;  %v2730_v53 = vld [vmem:[%s4744_s5 + $0x154] sm:$0xf0] }
  0x39   :  { %154 = vadd.xlane.f32.xlu0 %v153_v0  ;;  %v199_v34 = vadd.f32 %v3149_v49, %v193_v2  ;;  %v236_v35 = vadd.f32 %v232_v20, %v226_v22  ;;  %v2106_v36 = vor.u32 %v2718_v14, %v2105_v3  ;;  %v2170_v37 = vor.u32 %v2734_v9, %v2169_v5  ;;  %v2217_v58 = vld [vmem:[%s4744_s5 + $0x1d0] sm:$0xf]  ;;  %v2746_v59 = vld [vmem:[%s4744_s5 + $0x1d4] sm:$0xf0]  ;;  %v2017_v38 = vld [vmem:[%s4744_s5 + $0x40] sm:$0xf] }
  0x3a   :  { %v202_v43 = vmax.f32 %v198_v1, 0.0  ;;  %v237_v44 = vadd.f32 %v233_v21, %v227_v7  ;;  %1506 = vmatpush.bf16.msra.mxu0 %v2042_v27  ;;  %v2234_v45 = vor.u32 %v2750_v29, %v2233_v56  ;;  %v2034_v49 = vor.u32 %v2700_v16, %v2033_v57  ;;  %v2081_v39 = vld [vmem:[%s4744_s5 + $0xc0] sm:$0xf]  ;;  %v2712_v30 = vld [vmem:[%s4744_s5 + $0xc4] sm:$0xf0] }
  0x3b   :  { %v203_v46 = vmax.f32 %v199_v34, 0.0  ;;  %v246_v10 = vadd.f32 %v242_v19, %v236_v35  ;;  %1520 = vmatpush.bf16.msra.mxu1 %v2106_v36  ;;  %1534 = vmatpush.bf16.msra.mxu2 %v2170_v37  ;;  %v2098_v11 = vor.u32 %v2716_v28, %v2097_v25  ;;  %v2162_v41 = vor.u32 %v2732_v4, %v2161_v32  ;;  %v2145_v12 = vld [vmem:[%s4744_s5 + $0x140] sm:$0xf]  ;;  %v2728_v13 = vld [vmem:[%s4744_s5 + $0x144] sm:$0xf0] }
  0x3c   :  { %v247_v33 = vadd.f32 %v243_v26, %v237_v44  ;;  %1548 = vmatpush.bf16.msra.mxu3 %v2234_v45  ;;  %v2226_v50 = vor.u32 %v2748_v42, %v2225_v6  ;;  %v2026_v55 = vor.u32 %v2698_v18, %v2025_v47  ;;  %v2090_v61 = vor.u32 %v2714_v40, %v2089_v23  ;;  %v2209_v14 = vld [vmem:[%s4744_s5 + $0x1c0] sm:$0xf]  ;;  %v2744_v15 = vld [vmem:[%s4744_s5 + $0x1c4] sm:$0xf0]  ;;  %v2009_v20 = vld [vmem:[%s4744_s5 + $0x30] sm:$0xf] }
  0x3d   :  { %v207_v51 = vadd.f32 %v203_v46, %v202_v43  ;;  %v252_v52 = vadd.f32 %v3182_v24, %v246_v10  ;;  %v2154_v63 = vor.u32 %v2730_v53, %v2153_v31  ;;  %v2218_v8 = vor.u32 %v2746_v59, %v2217_v58  ;;  %v2694_v21 = vld [vmem:[%s4744_s5 + $0x34] sm:$0xf0]  ;;  %v2073_v9 = vld [vmem:[%s4744_s5 + $0xb0] sm:$0xf]  ;;  %v2001_v1 = vld [vmem:[%s4744_s5 + $0x20] sm:$0xf] }
  0x3e   :  { %v253_v54 = vadd.f32 %v3182_v24, %v247_v33  ;;  %1507 = vmatpush.bf16.msra.mxu0 %v2034_v49  ;;  %v2696_v24 = vld [vmem:[%s4744_s5 + $0x44] sm:$0xf0]  ;;  %v2082_v17 = vor.u32 %v2712_v30, %v2081_v39  ;;  %v2146_v5 = vor.u32 %v2728_v13, %v2145_v12  ;;  %v2710_v56 = vld [vmem:[%s4744_s5 + $0xb4] sm:$0xf0]  ;;  %v2210_v0 = vor.u32 %v2744_v15, %v2209_v14  ;;  %v2137_v2 = vld [vmem:[%s4744_s5 + $0x130] sm:$0xf] }
  0x3f   :  { %208 = vadd.xlane.f32.xlu1 %v207_v51  ;;  %v256_v60 = vmax.f32 %v252_v52, 0.0  ;;  %1521 = vmatpush.bf16.msra.mxu1 %v2098_v11  ;;  %v2018_v3 = vor.u32 %v2696_v24, %v2017_v38  ;;  %v2726_v22 = vld [vmem:[%s4744_s5 + $0x134] sm:$0xf0]  ;;  %v2010_v19 = vor.u32 %v2694_v21, %v2009_v20  ;;  %v2201_v29 = vld [vmem:[%s4744_s5 + $0x1b0] sm:$0xf]  ;;  %v2074_v16 = vor.u32 %v2710_v56, %v2073_v9 }
  0x40   :  { %v257_v62 = vmax.f32 %v253_v54, 0.0  ;;  %1535 = vmatpush.bf16.msra.mxu2 %v2162_v41  ;;  %1549 = vmatpush.bf16.msra.mxu3 %v2226_v50  ;;  %v2742_v57 = vld [vmem:[%s4744_s5 + $0x1b4] sm:$0xf0]  ;;  %v2692_v7 = vld [vmem:[%s4744_s5 + $0x24] sm:$0xf0]  ;;  %v2138_v26 = vor.u32 %v2726_v22, %v2137_v2 }
  0x41   :  { %v2065_v27 = vld [vmem:[%s4744_s5 + $0xa0] sm:$0xf]  ;;  %v2708_v25 = vld [vmem:[%s4744_s5 + $0xa4] sm:$0xf0]  ;;  %v2202_v28 = vor.u32 %v2742_v57, %v2201_v29  ;;  %v2002_v35 = vor.u32 %v2692_v7, %v2001_v1  ;;  %v1993_v6 = vld [vmem:[%s4744_s5 + $0x10] sm:$0xf] }
  0x42   :  { %v261_v48 = vadd.f32 %v257_v62, %v256_v60  ;;  %1508 = vmatpush.bf16.msra.mxu0 %v2026_v55  ;;  %v2129_v32 = vld [vmem:[%s4744_s5 + $0x120] sm:$0xf]  ;;  %v2724_v34 = vld [vmem:[%s4744_s5 + $0x124] sm:$0xf0]  ;;  %v2066_v4 = vor.u32 %v2708_v25, %v2065_v27  ;;  %v2690_v42 = vld [vmem:[%s4744_s5 + $0x14] sm:$0xf0] }
  0x43   :  { %1522 = vmatpush.bf16.msra.mxu1 %v2090_v61  ;;  %v2193_v36 = vld [vmem:[%s4744_s5 + $0x1a0] sm:$0xf]  ;;  %v2740_v37 = vld [vmem:[%s4744_s5 + $0x1a4] sm:$0xf0]  ;;  %v2130_v43 = vor.u32 %v2724_v34, %v2129_v32  ;;  %v2057_v44 = vld [vmem:[%s4744_s5 + $0x90] sm:$0xf]  ;;  %v1994_v47 = vor.u32 %v2690_v42, %v1993_v6 }
  0x44   :  { %262 = vadd.xlane.f32.xlu2 %v261_v48  ;;  %1536 = vmatpush.bf16.msra.mxu2 %v2154_v63  ;;  %v2706_v45 = vld [vmem:[%s4744_s5 + $0x94] sm:$0xf0]  ;;  %v2194_v49 = vor.u32 %v2740_v37, %v2193_v36  ;;  %v2121_v46 = vld [vmem:[%s4744_s5 + $0x110] sm:$0xf]  ;;  %v1985_v33 = vld [vmem:[%s4744_s5] sm:$0xf] }
  0x45   :  { %1550 = vmatpush.bf16.msra.mxu3 %v2218_v8  ;;  %v2722_v10 = vld [vmem:[%s4744_s5 + $0x114] sm:$0xf0]  ;;  %v2185_v11 = vld [vmem:[%s4744_s5 + $0x190] sm:$0xf]  ;;  %v2688_v41 = vld [vmem:[%s4744_s5 + $0x4] sm:$0xf0]  ;;  %v2058_v50 = vor.u32 %v2706_v45, %v2057_v44 }
  0x46   :  { %1509 = vmatpush.bf16.msra.mxu0 %v2018_v3  ;;  %v2738_v18 = vld [vmem:[%s4744_s5 + $0x194] sm:$0xf0]  ;;  %v2049_v23 = vld [vmem:[%s4744_s5 + $0x80] sm:$0xf]  ;;  %v2704_v40 = vld [vmem:[%s4744_s5 + $0x84] sm:$0xf0]  ;;  %v2122_v52 = vor.u32 %v2722_v10, %v2121_v46  ;;  %v1986_v61 = vor.u32 %v2688_v41, %v1985_v33 }
  0x47   :  { %1523 = vmatpush.bf16.msra.mxu1 %v2082_v17  ;;  %v2113_v51 = vld [vmem:[%s4744_s5 + $0x100] sm:$0xf]  ;;  %v2720_v31 = vld [vmem:[%s4744_s5 + $0x104] sm:$0xf0]  ;;  %v2297_v53 = vld [vmem:[%s4744_s5 + $0x270] sm:$0xf]  ;;  %v2186_v55 = vor.u32 %v2738_v18, %v2185_v11  ;;  %v2050_v63 = vor.u32 %v2704_v40, %v2049_v23 }
  0x48   :  { %1537 = vmatpush.bf16.msra.mxu2 %v2146_v5  ;;  %v2766_v54 = vld [vmem:[%s4744_s5 + $0x274] sm:$0xf0]  ;;  %v2177_v58 = vld [vmem:[%s4744_s5 + $0x180] sm:$0xf]  ;;  %v2361_v59 = vld [vmem:[%s4744_s5 + $0x2f0] sm:$0xf]  ;;  %v2114_v12 = vor.u32 %v2720_v31, %v2113_v51 }
  0x49   :  { %1551 = vmatpush.bf16.msra.mxu3 %v2210_v0  ;;  %v2782_v60 = vld [vmem:[%s4744_s5 + $0x2f4] sm:$0xf0]  ;;  %v2736_v38 = vld [vmem:[%s4744_s5 + $0x184] sm:$0xf0]  ;;  %v2425_v24 = vld [vmem:[%s4744_s5 + $0x370] sm:$0xf]  ;;  %v2298_v39 = vor.u32 %v2766_v54, %v2297_v53 }
  0x4a   :  { %1510 = vmatpush.bf16.msra.mxu0 %v2010_v19  ;;  %v2798_v62 = vld [vmem:[%s4744_s5 + $0x374] sm:$0xf0]  ;;  %v2489_v30 = vld [vmem:[%s4744_s5 + $0x3f0] sm:$0xf]  ;;  %v2362_v13 = vor.u32 %v2782_v60, %v2361_v59  ;;  %v2289_v48 = vld [vmem:[%s4744_s5 + $0x260] sm:$0xf]  ;;  %v2178_v14 = vor.u32 %v2736_v38, %v2177_v58 }
  0x4b   :  { %1524 = vmatpush.bf16.msra.mxu1 %v2074_v16  ;;  %v2814_v8 = vld [vmem:[%s4744_s5 + $0x3f4] sm:$0xf0]  ;;  %v2764_v3 = vld [vmem:[%s4744_s5 + $0x264] sm:$0xf0]  ;;  %v2426_v15 = vor.u32 %v2798_v62, %v2425_v24  ;;  %v2353_v17 = vld [vmem:[%s4744_s5 + $0x2e0] sm:$0xf] }
  0x4c   :  { %1538 = vmatpush.bf16.msra.mxu2 %v2138_v26  ;;  %v2780_v20 = vld [vmem:[%s4744_s5 + $0x2e4] sm:$0xf0]  ;;  %v2490_v21 = vor.u32 %v2814_v8, %v2489_v30  ;;  %v2417_v5 = vld [vmem:[%s4744_s5 + $0x360] sm:$0xf]  ;;  %v2290_v56 = vor.u32 %v2764_v3, %v2289_v48  ;;  %v2281_v57 = vld [vmem:[%s4744_s5 + $0x250] sm:$0xf] }
  0x4d   :  { %1552 = vmatpush.bf16.msra.mxu3 %v2202_v28  ;;  %v2796_v9 = vld [vmem:[%s4744_s5 + $0x364] sm:$0xf0]  ;;  %v2481_v0 = vld [vmem:[%s4744_s5 + $0x3e0] sm:$0xf]  ;;  %v2354_v22 = vor.u32 %v2780_v20, %v2353_v17  ;;  %v2762_v16 = vld [vmem:[%s4744_s5 + $0x254] sm:$0xf0] }
  0x4e   :  { %1511 = vmatpush.bf16.msra.mxu0 %v2002_v35  ;;  %v2812_v2 = vld [vmem:[%s4744_s5 + $0x3e4] sm:$0xf0]  ;;  %v2418_v19 = vor.u32 %v2796_v9, %v2417_v5  ;;  %v2345_v1 = vld [vmem:[%s4744_s5 + $0x2d0] sm:$0xf]  ;;  %v2282_v7 = vor.u32 %v2762_v16, %v2281_v57  ;;  %v2778_v26 = vld [vmem:[%s4744_s5 + $0x2d4] sm:$0xf0] }
  0x4f   :  { %1525 = vmatpush.bf16.msra.mxu1 %v2066_v4  ;;  %v2482_v29 = vor.u32 %v2812_v2, %v2481_v0  ;;  %v2409_v27 = vld [vmem:[%s4744_s5 + $0x350] sm:$0xf]  ;;  %v2794_v25 = vld [vmem:[%s4744_s5 + $0x354] sm:$0xf0]  ;;  %v2346_v28 = vor.u32 %v2778_v26, %v2345_v1  ;;  %v2273_v37 = vld [vmem:[%s4744_s5 + $0x240] sm:$0xf] }
  0x50   :  { %1539 = vmatpush.bf16.msra.mxu2 %v2130_v43  ;;  %v2410_v32 = vor.u32 %v2794_v25, %v2409_v27  ;;  %v2473_v34 = vld [vmem:[%s4744_s5 + $0x3d0] sm:$0xf]  ;;  %v2810_v35 = vld [vmem:[%s4744_s5 + $0x3d4] sm:$0xf0]  ;;  %v2760_v4 = vld [vmem:[%s4744_s5 + $0x244] sm:$0xf0] }
  0x51   :  { %1553 = vmatpush.bf16.msra.mxu3 %v2194_v49  ;;  %v2474_v36 = vor.u32 %v2810_v35, %v2473_v34  ;;  %v2337_v6 = vld [vmem:[%s4744_s5 + $0x2c0] sm:$0xf]  ;;  %v2274_v42 = vor.u32 %v2760_v4, %v2273_v37  ;;  %v2776_v43 = vld [vmem:[%s4744_s5 + $0x2c4] sm:$0xf0]  ;;  %v2265_v33 = vld [vmem:[%s4744_s5 + $0x230] sm:$0xf] }
  0x52   :  { %1512 = vmatpush.bf16.msra.mxu0 %v1994_v47  ;;  %v2401_v44 = vld [vmem:[%s4744_s5 + $0x340] sm:$0xf]  ;;  %v2792_v45 = vld [vmem:[%s4744_s5 + $0x344] sm:$0xf0]  ;;  %v2338_v49 = vor.u32 %v2776_v43, %v2337_v6  ;;  %v2758_v41 = vld [vmem:[%s4744_s5 + $0x234] sm:$0xf0] }
  0x53   :  { %1526 = vmatpush.bf16.msra.mxu1 %v2058_v50  ;;  %v2402_v46 = vor.u32 %v2792_v45, %v2401_v44  ;;  %v2465_v10 = vld [vmem:[%s4744_s5 + $0x3c0] sm:$0xf]  ;;  %v2808_v11 = vld [vmem:[%s4744_s5 + $0x3c4] sm:$0xf0]  ;;  %v2329_v50 = vld [vmem:[%s4744_s5 + $0x2b0] sm:$0xf]  ;;  %v2266_v23 = vor.u32 %v2758_v41, %v2265_v33 }
  0x54   :  { %1540 = vmatpush.bf16.msra.mxu2 %v2122_v52  ;;  %v3522_v47 = vld [vmem:[#allocation7] sm:$0x77]  ;;  %v2466_v18 = vor.u32 %v2808_v11, %v2465_v10  ;;  %v2774_v40 = vld [vmem:[%s4744_s5 + $0x2b4] sm:$0xf0]  ;;  %v2393_v51 = vld [vmem:[%s4744_s5 + $0x330] sm:$0xf] }
  0x55   :  { %1554 = vmatpush.bf16.msra.mxu3 %v2186_v55  ;;  %v2790_v52 = vld [vmem:[%s4744_s5 + $0x334] sm:$0xf0]  ;;  %v2330_v31 = vor.u32 %v2774_v40, %v2329_v50  ;;  %v2457_v54 = vld [vmem:[%s4744_s5 + $0x3b0] sm:$0xf]  ;;  %v278_v59 = vperm.slane %v3522_v47, 0  ;;  %v370_v38 = vperm.slane %v3522_v47, 1 }
  0x56   :  { %1513 = vmatpush.bf16.msra.mxu0 %v1986_v61  ;;  %v2394_v53 = vor.u32 %v2790_v52, %v2393_v51  ;;  %v2806_v55 = vld [vmem:[%s4744_s5 + $0x3b4] sm:$0xf0]  ;;  %v3549_v60 = vld [vmem:[#allocation7 + $0x8] sm:$0x77]  ;;  %v440_v24 = vperm.slane %v3522_v47, 2  ;;  %v279_v62 = vperm.slane %v3522_v47, 4 }
  0x57   :  { %1527 = vmatpush.bf16.msra.mxu1 %v2050_v63  ;;  %v2458_v58 = vor.u32 %v2806_v55, %v2457_v54  ;;  %v3551_v61 = vperm.slane %v278_v59, 0  ;;  %v371_v63 = vperm.slane %v3522_v47, 5  ;;  %v280_v30 = vperm.slane %v3549_v60, 0  ;;  %v2321_v48 = vld [vmem:[%s4744_s5 + $0x2a0] sm:$0xf]  ;;  %v3616_v34 = vld [vmem:[#allocation8] sm:$0xff] }
  0x58   :  { %1541 = vmatpush.bf16.msra.mxu2 %v2114_v12  ;;  %v281_v8 = vperm.slane %v3549_v60, 4  ;;  %v2257_v12 = vld [vmem:[%s4744_s5 + $0x220] sm:$0xf]  ;;  %v2788_v17 = vld [vmem:[%s4744_s5 + $0x324] sm:$0xf0]  ;;  %v3636_v10 = vperm.slane %v279_v62, 0 }
  0x59   :  { %1555 = vmatpush.bf16.msra.mxu3 %v2178_v14  ;;  %v2772_v14 = vld [vmem:[%s4744_s5 + $0x2a4] sm:$0xf0]  ;;  %v2449_v5 = vld [vmem:[%s4744_s5 + $0x3a0] sm:$0xf]  ;;  %v2754_v2 = vld [vmem:[%s4744_s5 + $0x214] sm:$0xf0] }
  0x5a   :  { %1562 = vmatpush.bf16.msrb.mxu0 %v2298_v39  ;;  %v441_v39 = vperm.slane %v3522_v47, 6  ;;  %v2322_v20 = vor.u32 %v2772_v14, %v2321_v48  ;;  %v2804_v9 = vld [vmem:[%s4744_s5 + $0x3a4] sm:$0xf0]  ;;  %v2377_v16 = vld [vmem:[%s4744_s5 + $0x310] sm:$0xf]  ;;  %v372_v11 = vperm.slane %v3549_v60, 1 }
  0x5b   :  { %1576 = vmatpush.bf16.msrb.mxu1 %v2362_v13  ;;  %v2756_v13 = vld [vmem:[%s4744_s5 + $0x224] sm:$0xf0]  ;;  %v2450_v0 = vor.u32 %v2804_v9, %v2449_v5  ;;  %v2786_v1 = vld [vmem:[%s4744_s5 + $0x314] sm:$0xf0]  ;;  %v3605_v26 = vld [vmem:[#allocation7 + $0x10] sm:$0x77] }
  0x5c   :  { %1590 = vmatpush.bf16.msrb.mxu2 %v2426_v15  ;;  %v2258_v3 = vor.u32 %v2756_v13, %v2257_v12  ;;  %v2385_v15 = vld [vmem:[%s4744_s5 + $0x320] sm:$0xf]  ;;  %v2378_v27 = vor.u32 %v2786_v1, %v2377_v16  ;;  %v2802_v25 = vld [vmem:[%s4744_s5 + $0x394] sm:$0xf0]  ;;  %v2768_v37 = vld [vmem:[%s4744_s5 + $0x284] sm:$0xf0] }
  0x5d   :  { %1604 = vmatpush.bf16.msrb.mxu3 %v2490_v21  ;;  %v2386_v21 = vor.u32 %v2788_v17, %v2385_v15  ;;  %v2369_v4 = vld [vmem:[%s4744_s5 + $0x300] sm:$0xf]  ;;  %v2800_v44 = vld [vmem:[%s4744_s5 + $0x384] sm:$0xf0]  ;;  %v442_v41 = vperm.slane %v3549_v60, 2  ;;  %v282_v50 = vperm.slane %v3605_v26, 0 }
  0x5e   :  { %1563 = vmatpush.bf16.msrb.mxu0 %v2290_v56  ;;  %v2249_v56 = vld [vmem:[%s4744_s5 + $0x210] sm:$0xf]  ;;  %v2433_v43 = vld [vmem:[%s4744_s5 + $0x380] sm:$0xf]  ;;  %v3644_v40 = vperm.slane %v370_v38, 1  ;;  %v3646_v51 = vperm.slane %v440_v24, 2 }
  0x5f   :  { %1577 = vmatpush.bf16.msrb.mxu1 %v2354_v22  ;;  %v2313_v22 = vld [vmem:[%s4744_s5 + $0x290] sm:$0xf]  ;;  %v2434_v33 = vor.u32 %v2800_v44, %v2433_v43  ;;  %v331_v52 = vperm.slane %v3616_v34, 1  ;;  %v3652_v54 = vperm.slane %v281_v8, 0  ;;  %v373_v55 = vperm.slane %v3549_v60, 5 }
  0x60   :  { %1591 = vmatpush.bf16.msrb.mxu2 %v2418_v19  ;;  %v2770_v19 = vld [vmem:[%s4744_s5 + $0x294] sm:$0xf0]  ;;  %v3661_v38 = vperm.slane %v371_v63, 1  ;;  %v3665_v24 = vperm.slane %v441_v39, 2  ;;  %v3667_v62 = vperm.slane %v372_v11, 1  ;;  %v4750_v8 = vperm.slane %v3616_v34, 3 }
  0x61   :  { %1605 = vmatpush.bf16.msrb.mxu3 %v2482_v29  ;;  %v2250_v29 = vor.u32 %v2754_v2, %v2249_v56  ;;  %v2314_v57 = vor.u32 %v2770_v19, %v2313_v22  ;;  %v3672_v12 = vperm.slane %v282_v50, 0  ;;  %v443_v48 = vperm.slane %v3549_v60, 6  ;;  %v3678_v63 = vld [vmem:[%s4744_s5 + $0x470] sm:$0xf]  ;;  %v3683_v47 = vld [vmem:[%s4744_s5 + $0x474] sm:$0xf0] }
  0x62   :  { %1564 = vmatpush.bf16.msrb.mxu0 %v2282_v7  ;;  %v2441_v7 = vld [vmem:[%s4744_s5 + $0x390] sm:$0xf]  ;;  %v374_v39 = vperm.slane %v3605_v26, 1  ;;  %v3692_v15 = vperm.slane %v373_v55, 1  ;;  %v3711_v9 = vld [vmem:[%s4744_s5 + $0x74] sm:$0xf] }
  0x63   :  { %1578 = vmatpush.bf16.msrb.mxu1 %v2346_v28  ;;  %v2241_v28 = vld [vmem:[%s4744_s5 + $0x200] sm:$0xf]  ;;  %v2442_v35 = vor.u32 %v2802_v25, %v2441_v7  ;;  %v3697_v17 = vld [vmem:[%s4744_s5 + $0x4f0] sm:$0xf]  ;;  %v4749_v56 = vperm.slane %v3616_v34, 4  ;;  %v3736_v1 = vperm.slane %v443_v48, 2 }
  0x64   :  { %1592 = vmatpush.bf16.msrb.mxu2 %v2410_v32  ;;  %v2752_v32 = vld [vmem:[%s4744_s5 + $0x204] sm:$0xf0]  ;;  %v3722_v19 = vld [vmem:[%s4744_s5 + $0x78] sm:$0xf0]  ;;  %v3745_v25 = vld [vmem:[%s4744_s5 + $0x460] sm:$0xf] }
  0x65   :  { %1606 = vmatpush.bf16.msrb.mxu3 %v2474_v36  ;;  %v2305_v36 = vld [vmem:[%s4744_s5 + $0x280] sm:$0xf]  ;;  %v2242_v6 = vor.u32 %v2752_v32, %v2241_v28  ;;  %v3750_v28 = vld [vmem:[%s4744_s5 + $0x464] sm:$0xf0]  ;;  %v3752_v32 = vperm.slane %v374_v39, 1 }
  0x66   :  { %1565 = vmatpush.bf16.msrb.mxu0 %v2274_v42  ;;  %v2784_v42 = vld [vmem:[%s4744_s5 + $0x304] sm:$0xf0]  ;;  %v3779_v11 = vld [vmem:[%s4744_s5 + $0x64] sm:$0xf]  ;;  %v3834_v50 = vld [vmem:[%s4744_s5 + $0x4d4] sm:$0xf0] }
  0x67   :  { %1579 = vmatpush.bf16.msrb.mxu1 %v2338_v49  ;;  %v2306_v49 = vor.u32 %v2768_v37, %v2305_v36  ;;  %v3770_v43 = vld [vmem:[%s4744_s5 + $0x4e4] sm:$0xf0]  ;;  %v3793_v55 = vld [vmem:[%s4744_s5 + $0xe4] sm:$0xf]  ;;  %4768 = vst [vmem:[#allocation18_spill] sm:$0xff] %v3834_v50 }
  0x68   :  { %1593 = vmatpush.bf16.msrb.mxu2 %v2402_v46  ;;  %v2370_v46 = vor.u32 %v2784_v42, %v2369_v4  ;;  %v3765_v42 = vld [vmem:[%s4744_s5 + $0x4e0] sm:$0xf] }
  0x69   :  { %1607 = vmatpush.bf16.msrb.mxu3 %v2466_v18 }
  0x6a   :  { %1566 = vmatpush.bf16.msrb.mxu0 %v2266_v23  ;;  %v330_v23 = vperm.slane %v3616_v34, 0 }
  0x6b   :  { %1580 = vmatpush.bf16.msrb.mxu1 %v2330_v31  ;;  %v3649_v31 = vperm.slane %v280_v30, 0  ;;  %v3669_v30 = vperm.slane %v442_v41, 2  ;;  %v3839_v41 = vld [vmem:[%s4744_s5 + $0x54] sm:$0xf] }
  0x6c   :  { %1594 = vmatpush.bf16.msrb.mxu2 %v2394_v53  ;;  %v4751_v53 = vperm.slane %v3616_v34, 2  ;;  %4769 = vst [vmem:[#allocation19_spill] sm:$0xff] %v3839_v41 }
  0x6d   :  { %1608 = vmatpush.bf16.msrb.mxu3 %v2458_v58 }
  0x6e   :  { %1567 = vmatpush.bf16.msrb.mxu0 %v2258_v3 }
  0x6f   :  { %1581 = vmatpush.bf16.msrb.mxu1 %v2322_v20  ;;  %v3702_v20 = vld [vmem:[%s4744_s5 + $0x4f4] sm:$0xf0] }
  0x70   :  { %1595 = vmatpush.bf16.msrb.mxu2 %v2386_v21 }
  0x71   :  { %1609 = vmatpush.bf16.msrb.mxu3 %v2450_v0  ;;  %v444_v0 = vperm.slane %v3605_v26, 2 }
  0x72   :  { %1568 = vmatpush.bf16.msrb.mxu0 %v2250_v29  ;;  %v3727_v29 = vld [vmem:[%s4744_s5 + $0xf4] sm:$0xf] }
  0x73   :  { %1582 = vmatpush.bf16.msrb.mxu1 %v2314_v57  ;;  %v3732_v57 = vld [vmem:[%s4744_s5 + $0xf8] sm:$0xf0] }
  0x74   :  { %1596 = vmatpush.bf16.msrb.mxu2 %v2378_v27 }
  0x75   :  { %1610 = vmatpush.bf16.msrb.mxu3 %v2442_v35 }
  0x76   :  { %1569 = vmatpush.bf16.msrb.mxu0 %v2242_v6 }
  0x77   :  { %1583 = vmatpush.bf16.msrb.mxu1 %v2306_v49 }
  0x78   :  { %1597 = vmatpush.bf16.msrb.mxu2 %v2370_v46 }
  0x79   :  { %1611 = vmatpush.bf16.msrb.mxu3 %v2434_v33  ;;  %v3784_v33 = vld [vmem:[%s4744_s5 + $0x68] sm:$0xf0] }
  0x9e   :  { %v152_v45 = vpop.xlane.xlu0 %151 }
  0x9f   :  { %v3639_v18 = vmul.f32 0.00390625, %v152_v45 }
  0xa1   :  { %v308_v58 = vmul.f32 %v3551_v61, %v3639_v18  ;;  %v309_v59 = vmul.f32 %v3636_v10, %v3639_v18  ;;  %v310_v14 = vmul.f32 %v3649_v31, %v3639_v18  ;;  %v311_v60 = vmul.f32 %v3652_v54, %v3639_v18 }
  0xa2   :  { %v312_v16 = vmul.f32 %v3672_v12, %v3639_v18 }
  0xa3   :  { %v350_v21 = vadd.f32 %v330_v23, %v308_v58  ;;  %v351_v5 = vadd.f32 %v331_v52, %v309_v59  ;;  %v352_v36 = vadd.f32 %v4751_v53, %v310_v14  ;;  %v353_v4 = vadd.f32 %v4750_v8, %v311_v60  ;;  %v3798_v58 = vld [vmem:[%s4744_s5 + $0xe8] sm:$0xf0] }
  0xa4   :  { %v206_v13 = vpop.xlane.xlu1 %205  ;;  %4764 = vst [vmem:[#allocation14_spill] sm:$0xff] %v3798_v58  ;;  %v354_v59 = vadd.f32 %v4749_v56, %v312_v16 }
  0xa5   :  { %v3686_v3 = vmul.f32 0.00390625, %v206_v13  ;;  %v3802_v13 = vperm.slane %v444_v0, 2  ;;  %v3823_v0 = vld [vmem:[%s4744_s5 + $0x4d0] sm:$0xf] }
  0xa6   :  { %4767 = vst [vmem:[#allocation17_spill] sm:$0xff] %v3823_v0 }
  0xa7   :  { %v400_v2 = vmul.f32 %v3644_v40, %v3686_v3  ;;  %v401_v22 = vmul.f32 %v3661_v38, %v3686_v3  ;;  %v402_v37 = vmul.f32 %v3667_v62, %v3686_v3  ;;  %v403_v6 = vmul.f32 %v3692_v15, %v3686_v3 }
  0xa9   :  { %v260_v35 = vpop.xlane.xlu2 %259  ;;  %v420_v45 = vadd.f32 %v400_v2, %v350_v21  ;;  %v421_v49 = vadd.f32 %v401_v22, %v351_v5  ;;  %v3813_v21 = vld [vmem:[%s4744_s5 + $0x450] sm:$0xf]  ;;  %v3818_v5 = vld [vmem:[%s4744_s5 + $0x454] sm:$0xf0]  ;;  %v404_v2 = vmul.f32 %v3752_v32, %v3686_v3  ;;  %v422_v16 = vadd.f32 %v402_v37, %v352_v36 }
  0xaa   :  { %v3772_v44 = vmul.f32 0.00390625, %v260_v35  ;;  %4765 = vst [vmem:[#allocation15_spill] sm:$0xff] %v3813_v21  ;;  %v423_v35 = vadd.f32 %v403_v6, %v353_v4  ;;  %v3852_v4 = vld [vmem:[%s4744_s5 + $0x58] sm:$0xf0]  ;;  %v3857_v6 = vld [vmem:[%s4744_s5 + $0xd4] sm:$0xf] }
  0xab   :  { %4766 = vst [vmem:[#allocation16_spill] sm:$0xff] %v3818_v5  ;;  %v3877_v8 = vadd.f32 %v404_v2, %v354_v59 }
  0xac   :  { %v155_v48 = vpop.xlane.xlu0 %154  ;;  %v470_v39 = vmul.f32 %v3646_v51, %v3772_v44  ;;  %v471_v14 = vmul.f32 %v3665_v24, %v3772_v44  ;;  %v472_v36 = vmul.f32 %v3669_v30, %v3772_v44  ;;  %v473_v37 = vmul.f32 %v3736_v1, %v3772_v44  ;;  %4770 = vst [vmem:[#allocation20_spill] sm:$0xff] %v3852_v4 }
  0xad   :  { %v3827_v22 = vmul.f32 0.00390625, %v155_v48  ;;  %4771 = vst [vmem:[#allocation21_spill] sm:$0xff] %v3857_v6 }
  0xae   :  { %v3841_v46 = vadd.f32 %v470_v39, %v420_v45  ;;  %v3843_v27 = vadd.f32 %v471_v14, %v421_v49  ;;  %v3862_v45 = vld [vmem:[%s4744_s5 + $0xd8] sm:$0xf0]  ;;  %v283_v14 = vperm.slane %v3605_v26, 4  ;;  %v3891_v59 = vadd.f32 %v472_v36, %v422_v16 }
  0xaf   :  { %4772 = vst [vmem:[#allocation22_spill] sm:$0xff] %v3862_v45  ;;  %v318_v49 = vmul.f32 %v3551_v61, %v3827_v22  ;;  %v319_v48 = vmul.f32 %v3636_v10, %v3827_v22  ;;  %v320_v60 = vmul.f32 %v3649_v31, %v3827_v22  ;;  %v321_v7 = vmul.f32 %v3652_v54, %v3827_v22  ;;  %v3904_v45 = vld [vmem:[%s4744_s5 + $0x440] sm:$0xf] }
  0xb0   :  { %v3887_v31 = vmul.f32 %v3802_v13, %v3772_v44  ;;  %v510_v54 = vmax.f32 %v3841_v46, 0.0  ;;  %v511_v56 = vmax.f32 %v3843_v27, 0.0  ;;  %v3893_v2 = vadd.f32 %v473_v37, %v423_v35  ;;  %4773 = vst [vmem:[#allocation23_spill] sm:$0xff] %v3904_v45  ;;  %v3909_v27 = vld [vmem:[%s4744_s5 + $0x444] sm:$0xf0] }
  0xb1   :  { %v360_v10 = vadd.f32 %v330_v23, %v318_v49  ;;  %v361_v39 = vadd.f32 %v331_v52, %v319_v48  ;;  %4774 = vst [vmem:[#allocation24_spill] sm:$0xff] %v3909_v27  ;;  %v303_v46 = vperm.slane %v283_v14, 0  ;;  %v4776_v35 = vperm.slane %v3616_v34, 3  ;;  %v3918_v37 = vld [vmem:[#allocation7 + $0x18] sm:$0x77] }
  0xb2   :  { %v209_v53 = vpop.xlane.xlu1 %208  ;;  %v322_v52 = vmul.f32 %v3672_v12, %v3827_v22  ;;  %v375_v36 = vperm.slane %v3605_v26, 5  ;;  %v513_v12 = vmax.f32 %v3893_v2, 0.0  ;;  %v3941_v2 = vld [vmem:[%s4744_s5 + $0x4c0] sm:$0xf] }
  0xb3   :  { %v3895_v61 = vmul.f32 0.00390625, %v209_v53  ;;  %v4775_v53 = vperm.slane %v3616_v34, 2  ;;  %v363_v23 = vadd.f32 %v4776_v35, %v321_v7  ;;  %v512_v7 = vmax.f32 %v3891_v59, 0.0  ;;  %4777 = vst [vmem:[#allocation25_spill] sm:$0xff] %v3941_v2 }
  0xb4   :  { %v335_v35 = vperm.slane %v3616_v34, 5  ;;  %v313_v4 = vmul.f32 %v303_v46, %v3639_v18 }
  0xb5   :  { %v362_v16 = vadd.f32 %v4775_v53, %v320_v60  ;;  %v410_v49 = vmul.f32 %v3644_v40, %v3895_v61  ;;  %v411_v48 = vmul.f32 %v3661_v38, %v3895_v61  ;;  %v412_v14 = vmul.f32 %v3667_v62, %v3895_v61 }
  0xb6   :  { %v413_v60 = vmul.f32 %v3692_v15, %v3895_v61  ;;  %v445_v38 = vperm.slane %v3605_v26, 6  ;;  %v284_v62 = vperm.slane %v3918_v37, 0 }
  0xb7   :  { %v263_v6 = vpop.xlane.xlu2 %262  ;;  %v430_v40 = vadd.f32 %v410_v49, %v360_v10  ;;  %v431_v15 = vadd.f32 %v411_v48, %v361_v39  ;;  %v432_v0 = vadd.f32 %v412_v14, %v362_v16  ;;  %v3946_v10 = vld [vmem:[%s4744_s5 + $0x4c4] sm:$0xf0]  ;;  %v4778_v49 = vperm.slane %v3616_v34, 4 }
  0xb8   :  { %v3936_v41 = vmul.f32 0.00390625, %v263_v6  ;;  %v433_v59 = vadd.f32 %v413_v60, %v363_v23  ;;  %v414_v6 = vmul.f32 %v3752_v32, %v3895_v61  ;;  %v323_v39 = vmul.f32 %v303_v46, %v3827_v22 }
  0xb9   :  { %v364_v26 = vadd.f32 %v4778_v49, %v322_v52  ;;  %v395_v16 = vperm.slane %v375_v36, 1  ;;  %v355_v49 = vadd.f32 %v335_v35, %v313_v4  ;;  %v304_v46 = vperm.slane %v284_v62, 0 }
  0xba   :  { %v480_v23 = vmul.f32 %v3646_v51, %v3936_v41  ;;  %v481_v48 = vmul.f32 %v3665_v24, %v3936_v41  ;;  %v482_v14 = vmul.f32 %v3669_v30, %v3936_v41  ;;  %v483_v60 = vmul.f32 %v3736_v1, %v3936_v41 }
  0xbb   :  { %v405_v32 = vmul.f32 %v395_v16, %v3686_v3  ;;  %v434_v27 = vadd.f32 %v414_v6, %v364_v26  ;;  %v365_v50 = vadd.f32 %v335_v35, %v323_v39  ;;  %v415_v24 = vmul.f32 %v395_v16, %v3895_v61 }
  0xbc   :  { %v500_v36 = vadd.f32 %v480_v23, %v430_v40  ;;  %v501_v53 = vadd.f32 %v481_v48, %v431_v15  ;;  %v502_v45 = vadd.f32 %v482_v14, %v432_v0  ;;  %v503_v51 = vadd.f32 %v483_v60, %v433_v59  ;;  %v4026_v60 = vld [vmem:[#allocation7 + $0x20] sm:$0x77] }
  0xbd   :  { %v465_v21 = vperm.slane %v445_v38, 2  ;;  %v484_v52 = vmul.f32 %v3802_v13, %v3936_v41  ;;  %v425_v4 = vadd.f32 %v405_v32, %v355_v49  ;;  %v314_v2 = vmul.f32 %v304_v46, %v3639_v18  ;;  %v4037_v32 = vld [vmem:[%s4744_s5 + $0xc4] sm:$0xf] }
  0xbe   :  { %v520_v30 = vmax.f32 %v500_v36, 0.0  ;;  %v521_v5 = vmax.f32 %v501_v53, 0.0  ;;  %v522_v58 = vmax.f32 %v502_v45, 0.0  ;;  %v523_v1 = vmax.f32 %v503_v51, 0.0 }
  0xbf   :  { %v336_v40 = vperm.slane %v3616_v34, 6  ;;  %v435_v38 = vadd.f32 %v415_v24, %v365_v50  ;;  %v475_v45 = vmul.f32 %v465_v21, %v3772_v44  ;;  %v485_v53 = vmul.f32 %v465_v21, %v3936_v41 }
  0xc0   :  { %v3969_v62 = vpack.c.bf16 %v520_v30, %v510_v54  ;;  %v3971_v0 = vpack.c.bf16 %v521_v5, %v511_v56  ;;  %v3973_v35 = vpack.c.bf16 %v522_v58, %v512_v7  ;;  %v3975_v15 = vpack.c.bf16 %v523_v1, %v513_v12 }
  0xc1   :  { %v324_v13 = vmul.f32 %v304_v46, %v3827_v22  ;;  %v3984_v54 = vadd.f32 %v3887_v31, %v3877_v8  ;;  %v376_v56 = vperm.slane %v3918_v37, 1  ;;  %v446_v58 = vperm.slane %v3918_v37, 2  ;;  %v4042_v46 = vld [vmem:[%s4744_s5 + $0xc8] sm:$0xf0] }
  0xc2   :  { %1514 = vmatmul.bf16.vlgmr.msra.gmra.mxu0 %v3969_v62  ;;  %1528 = vmatmul.bf16.vlgmr.msra.gmra.mxu1 %v3971_v0  ;;  %v285_v50 = vperm.slane %v3918_v37, 4  ;;  %v3991_v21 = vadd.f32 %v484_v52, %v434_v27  ;;  %v356_v5 = vadd.f32 %v336_v40, %v314_v2  ;;  %v377_v12 = vperm.slane %v3918_v37, 5 }
  0xc3   :  { %1542 = vmatmul.bf16.vlgmr.msra.gmra.mxu2 %v3973_v35  ;;  %1556 = vmatmul.bf16.vlgmr.msra.gmra.mxu3 %v3975_v15  ;;  %v366_v7 = vadd.f32 %v336_v40, %v324_v13  ;;  %v4779_v8 = vor.u32 %v3683_v47, %v3678_v63  ;;  %v4780_v31 = vor.u32 %v3702_v20, %v3697_v17  ;;  %v396_v59 = vperm.slane %v376_v56, 1 }
  0xc4   :  { %v466_v26 = vperm.slane %v446_v58, 2  ;;  %v305_v6 = vperm.slane %v285_v50, 0  ;;  %v447_v39 = vperm.slane %v3918_v37, 6  ;;  %v4781_v27 = vor.u32 %v3711_v9, %v3722_v19  ;;  %v4015_v9 = vld [vmem:[%s4744_s5 + $0x44] sm:$0xf] }
  0xc5   :  { %1618 = vmatpush.bf16.msra.mxu0 %v4779_v8  ;;  %1632 = vmatpush.bf16.msra.mxu1 %v4780_v31  ;;  %v4782_v2 = vor.u32 %v3727_v29, %v3732_v57  ;;  %v495_v16 = vadd.f32 %v475_v45, %v425_v4  ;;  %v505_v63 = vadd.f32 %v485_v53, %v435_v38  ;;  %v337_v47 = vperm.slane %v3616_v34, 7  ;;  %v4020_v19 = vld [vmem:[%s4744_s5 + $0x48] sm:$0xf0]  ;;  %v4055_v38 = vld [vmem:[%s4744_s5 + $0x430] sm:$0xf] }
  0xc6   :  { %1646 = vmatpush.bf16.msra.mxu2 %v4781_v27  ;;  %v397_v23 = vperm.slane %v377_v12, 1  ;;  %v406_v17 = vmul.f32 %v396_v59, %v3686_v3  ;;  %v416_v20 = vmul.f32 %v396_v59, %v3895_v61  ;;  %v476_v48 = vmul.f32 %v466_v26, %v3772_v44  ;;  %v4060_v45 = vld [vmem:[%s4744_s5 + $0x434] sm:$0xf0]  ;;  %v4080_v53 = vld [vmem:[%s4744_s5 + $0x38] sm:$0xf0] }
  0xc7   :  { %1660 = vmatpush.bf16.msra.mxu3 %v4782_v2  ;;  %v486_v37 = vmul.f32 %v466_v26, %v3936_v41  ;;  %v315_v34 = vmul.f32 %v305_v6, %v3639_v18  ;;  %v325_v29 = vmul.f32 %v305_v6, %v3827_v22  ;;  %v4783_v52 = vor.u32 %v3750_v28, %v3745_v25  ;;  %v4087_v58 = vld [vmem:[%s4744_s5 + $0xb4] sm:$0xf]  ;;  %v4092_v50 = vld [vmem:[%s4744_s5 + $0xb8] sm:$0xf0]  ;;  %v4098_v31 = vld [vmem:[%s4744_s5 + $0x420] sm:$0xf] }
  0xc8   :  { %v407_v57 = vmul.f32 %v397_v23, %v3686_v3  ;;  %v417_v14 = vmul.f32 %v397_v23, %v3895_v61  ;;  %v4784_v49 = vor.u32 %v3770_v43, %v3765_v42  ;;  %v524_v36 = vmax.f32 %v3991_v21, 0.0  ;;  %v4786_v42 = vld [vmem:[#allocation14_spill] sm:$0xff]  ;;  %v4103_v59 = vld [vmem:[%s4744_s5 + $0x424] sm:$0xf0]  ;;  %v4105_v26 = vld [vmem:[#allocation8 + $0x8] sm:$0x3] }
  0xc9   :  { %1619 = vmatpush.bf16.msra.mxu0 %v4783_v52  ;;  %v426_v51 = vadd.f32 %v406_v17, %v356_v5  ;;  %v436_v24 = vadd.f32 %v416_v20, %v366_v7  ;;  %v467_v25 = vperm.slane %v447_v39, 2  ;;  %v4785_v28 = vor.u32 %v3779_v11, %v3784_v33  ;;  %v4065_v11 = vld [vmem:[%s4744_s5 + $0x4b0] sm:$0xf]  ;;  %v4070_v33 = vld [vmem:[%s4744_s5 + $0x4b4] sm:$0xf0]  ;;  %v4788_v6 = vld [vmem:[#allocation16_spill] sm:$0xff] }
  0xca   :  { %1633 = vmatpush.bf16.msra.mxu1 %v4784_v49  ;;  %v4787_v43 = vor.u32 %v3793_v55, %v4786_v42  ;;  %v514_v30 = vmax.f32 %v3984_v54, 0.0  ;;  %v525_v1 = vmax.f32 %v505_v63, 0.0  ;;  %v357_v4 = vadd.f32 %v337_v47, %v315_v34  ;;  %v4075_v55 = vld [vmem:[%s4744_s5 + $0x34] sm:$0xf]  ;;  %v4789_v39 = vld [vmem:[#allocation15_spill] sm:$0xff] }
  0xcb   :  { %1647 = vmatpush.bf16.msra.mxu2 %v4785_v28  ;;  %v367_v40 = vadd.f32 %v337_v47, %v325_v29  ;;  %v506_v13 = vadd.f32 %v486_v37, %v436_v24  ;;  %v477_v54 = vmul.f32 %v467_v25, %v3772_v44  ;;  %v487_v56 = vmul.f32 %v467_v25, %v3936_v41  ;;  %v4791_v2 = vld [vmem:[#allocation18_spill] sm:$0xff]  ;;  %v4122_v20 = vld [vmem:[%s4744_s5 + $0x4a0] sm:$0xf]  ;;  %v4132_v37 = vld [vmem:[%s4744_s5 + $0x24] sm:$0xf] }
  0xcc   :  { %1661 = vmatpush.bf16.msra.mxu3 %v4787_v43  ;;  %v286_v21 = vperm.slane %v4026_v60, 0  ;;  %v515_v5 = vmax.f32 %v495_v16, 0.0  ;;  %v496_v7 = vadd.f32 %v476_v48, %v426_v51  ;;  %v427_v12 = vadd.f32 %v407_v57, %v357_v4  ;;  %v4792_v16 = vld [vmem:[#allocation17_spill] sm:$0xff]  ;;  %v4798_v57 = vld [vmem:[#allocation22_spill] sm:$0xff]  ;;  %v4150_v51 = vld [vmem:[%s4744_s5 + $0xa4] sm:$0xf] }
  0xcd   :  { %v437_v8 = vadd.f32 %v417_v14, %v367_v40  ;;  %v4790_v27 = vor.u32 %v4788_v6, %v4789_v39  ;;  %v4793_v63 = vor.u32 %v4791_v2, %v4792_v16  ;;  %v2022_v47 = vor.u32 %v4015_v9, %v4020_v19  ;;  %v4127_v48 = vld [vmem:[%s4744_s5 + $0x4a4] sm:$0xf0]  ;;  %v4794_v9 = vld [vmem:[#allocation19_spill] sm:$0xff]  ;;  %v4161_v42 = vld [vmem:[%s4744_s5 + $0xa8] sm:$0xf0] }
  0xce   :  { %v2086_v23 = vor.u32 %v4037_v32, %v4042_v46  ;;  %v4117_v17 = vpack.c.bf16 %v524_v36, %v514_v30  ;;  %v4795_v19 = vld [vmem:[#allocation20_spill] sm:$0xff]  ;;  %v4797_v29 = vld [vmem:[#allocation21_spill] sm:$0xff]  ;;  %v4140_v52 = vpack.c.bf16 %v525_v1, %v515_v5  ;;  %v526_v49 = vmax.f32 %v506_v13, 0.0  ;;  %v4222_v2 = vld [vmem:[%s4744_s5 + $0x18] sm:$0xf0] }
  0xcf   :  { %1620 = vmatpush.bf16.msra.mxu0 %v4790_v27  ;;  %1634 = vmatpush.bf16.msra.mxu1 %v4793_v63  ;;  %v4796_v34 = vor.u32 %v4794_v9, %v4795_v19  ;;  %v4799_v14 = vor.u32 %v4797_v29, %v4798_v57  ;;  %v497_v32 = vadd.f32 %v477_v54, %v427_v12  ;;  %v4145_v36 = vld [vmem:[%s4744_s5 + $0x28] sm:$0xf0]  ;;  %v4166_v43 = vld [vmem:[%s4744_s5 + $0x410] sm:$0xf]  ;;  %v306_v30 = vperm.slane %v286_v21, 0 }
  0xd0   :  { %v507_v46 = vadd.f32 %v487_v56, %v437_v8  ;;  %v2522_v24 = vor.u32 %v4060_v45, %v4055_v38  ;;  %v2586_v25 = vor.u32 %v4070_v33, %v4065_v11  ;;  %v2014_v28 = vor.u32 %v4075_v55, %v4080_v53  ;;  %v4173_v45 = vld [vmem:[%s4744_s5 + $0x414] sm:$0xf0]  ;;  %v4800_v11 = vld [vmem:[#allocation24_spill] sm:$0xff]  ;;  %v4803_v53 = vld [vmem:[#allocation25_spill] sm:$0xff] }
  0xd1   :  { %1648 = vmatpush.bf16.msra.mxu2 %v4796_v34  ;;  %1662 = vmatpush.bf16.msra.mxu3 %v4799_v14  ;;  %v516_v1 = vmax.f32 %v496_v7, 0.0  ;;  %v517_v4 = vmax.f32 %v497_v32, 0.0  ;;  %v2078_v38 = vor.u32 %v4087_v58, %v4092_v50  ;;  %v4801_v33 = vld [vmem:[#allocation23_spill] sm:$0xff]  ;;  %v4804_v13 = vor.u32 %v3946_v10, %v4803_v53  ;;  %v4197_v7 = vld [vmem:[%s4744_s5 + $0x490] sm:$0xf] }
  0xd2   :  { %v527_v40 = vmax.f32 %v507_v46, 0.0  ;;  %v4802_v55 = vor.u32 %v4800_v11, %v4801_v33  ;;  %v2514_v54 = vor.u32 %v4103_v59, %v4098_v31  ;;  %v2578_v56 = vor.u32 %v4127_v48, %v4122_v20  ;;  %1570 = vmatmul.bf16.vlgmr.msrb.gmra.mxu0 %v4117_v17  ;;  %1584 = vmatmul.bf16.vlgmr.msrb.gmra.mxu1 %v4140_v52  ;;  %v4207_v31 = vld [vmem:[%s4744_s5 + $0x494] sm:$0xf0]  ;;  %v4212_v59 = vld [vmem:[%s4744_s5 + $0x14] sm:$0xf] }
  0xd3   :  { %1635 = vmatpush.bf16.msra.mxu1 %v4804_v13  ;;  %v2006_v58 = vor.u32 %v4132_v37, %v4145_v36  ;;  %v338_v50 = vperm.slane %v4105_v26, 0  ;;  %v4188_v21 = vpack.c.bf16 %v526_v49, %v516_v1  ;;  %v2070_v10 = vor.u32 %v4150_v51, %v4161_v42  ;;  %v2705_v49 = vld [vmem:[%s4744_s5 + $0x94] sm:$0xf]  ;;  %v2497_v36 = vld [vmem:[%s4744_s5 + $0x400] sm:$0xf] }
  0xd4   :  { %1621 = vmatpush.bf16.msra.mxu0 %v4802_v55  ;;  %v4190_v5 = vpack.c.bf16 %v527_v40, %v517_v4  ;;  %v378_v12 = vperm.slane %v4026_v60, 1  ;;  %v2506_v8 = vor.u32 %v4173_v45, %v4166_v43  ;;  %v316_v6 = vmul.f32 %v306_v30, %v3639_v18  ;;  %v2816_v42 = vld [vmem:[%s4744_s5 + $0x404] sm:$0xf0]  ;;  %v1987_v11 = vld [vmem:[%s4744_s5 + $0x8] sm:$0xf0] }
  0xd5   :  { %1649 = vmatpush.bf16.msra.mxu2 %v2022_v47  ;;  %1663 = vmatpush.bf16.msra.mxu3 %v2086_v23  ;;  %v326_v39 = vmul.f32 %v306_v30, %v3827_v22  ;;  %v448_v27 = vperm.slane %v4026_v60, 2  ;;  %v287_v63 = vperm.slane %v4026_v60, 4  ;;  %v339_v47 = vperm.slane %v4105_v26, 1  ;;  %v2561_v30 = vld [vmem:[%s4744_s5 + $0x480] sm:$0xf] }
  0xd6   :  { %1598 = vmatmul.bf16.vlgmr.msrb.gmra.mxu2 %v4188_v21  ;;  %1612 = vmatmul.bf16.vlgmr.msrb.gmra.mxu3 %v4190_v5  ;;  %v398_v16 = vperm.slane %v378_v12, 1  ;;  %v379_v23 = vperm.slane %v4026_v60, 5  ;;  %v358_v20 = vadd.f32 %v338_v50, %v316_v6  ;;  %v449_v9 = vperm.slane %v4026_v60, 6  ;;  %v2059_v60 = vld [vmem:[%s4744_s5 + $0x98] sm:$0xf0] }
  0xd7   :  { %1636 = vmatpush.bf16.msra.mxu1 %v2586_v25  ;;  %v368_v48 = vadd.f32 %v338_v50, %v326_v39  ;;  %v468_v37 = vperm.slane %v448_v27, 2  ;;  %v307_v29 = vperm.slane %v287_v63, 0  ;;  %v2570_v26 = vor.u32 %v4207_v31, %v4197_v7  ;;  %v2832_v1 = vld [vmem:[%s4744_s5 + $0x484] sm:$0xf0]  ;;  %v2703_v33 = vld [vmem:[%s4744_s5 + $0x84] sm:$0xf] }
  0xd8   :  { %1622 = vmatpush.bf16.msra.mxu0 %v2522_v24  ;;  %v408_v19 = vmul.f32 %v398_v16, %v3686_v3  ;;  %v418_v34 = vmul.f32 %v398_v16, %v3895_v61  ;;  %v399_v57 = vperm.slane %v379_v23, 1  ;;  %v1998_v14 = vor.u32 %v4212_v59, %v4222_v2  ;;  %v2733_v53 = vld [vmem:[%s4744_s5 + $0x174] sm:$0xf]  ;;  %v2171_v13 = vld [vmem:[%s4744_s5 + $0x178] sm:$0xf0] }
  0xd9   :  { %1650 = vmatpush.bf16.msra.mxu2 %v2014_v28  ;;  %1664 = vmatpush.bf16.msra.mxu3 %v2078_v38  ;;  %v488_v32 = vmul.f32 %v468_v37, %v3936_v41  ;;  %v469_v46 = vperm.slane %v449_v9, 2  ;;  %v478_v24 = vmul.f32 %v468_v37, %v3772_v44  ;;  %v317_v25 = vmul.f32 %v307_v29, %v3639_v18  ;;  %v2687_v38 = vld [vmem:[%s4744_s5 + $0x4] sm:$0xf]  ;;  %v2765_v7 = vld [vmem:[%s4744_s5 + $0x274] sm:$0xf] }
  0xda   :  { %v438_v51 = vadd.f32 %v418_v34, %v368_v48  ;;  %v327_v28 = vmul.f32 %v307_v29, %v3827_v22  ;;  %v428_v4 = vadd.f32 %v408_v19, %v358_v20  ;;  %v409_v40 = vmul.f32 %v399_v57, %v3686_v3  ;;  %v2299_v31 = vld [vmem:[%s4744_s5 + $0x278] sm:$0xf0]  ;;  %v2781_v59 = vld [vmem:[%s4744_s5 + $0x2f4] sm:$0xf]  ;;  %v2731_v2 = vld [vmem:[%s4744_s5 + $0x164] sm:$0xf] }
  0xdb   :  { %1637 = vmatpush.bf16.msra.mxu1 %v2578_v56  ;;  %v419_v18 = vmul.f32 %v399_v57, %v3895_v61  ;;  %v2062_v22 = vor.u32 %v2705_v49, %v2059_v60  ;;  %v359_v55 = vadd.f32 %v339_v47, %v317_v25  ;;  %v479_v3 = vmul.f32 %v469_v46, %v3772_v44  ;;  %v2051_v61 = vld [vmem:[%s4744_s5 + $0x88] sm:$0xf0]  ;;  %v2749_v44 = vld [vmem:[%s4744_s5 + $0x1f4] sm:$0xf]  ;;  %v2363_v6 = vld [vmem:[%s4744_s5 + $0x2f8] sm:$0xf0] }
  0xdc   :  { %1623 = vmatpush.bf16.msra.mxu0 %v2514_v54  ;;  %v508_v54 = vadd.f32 %v488_v32, %v438_v51  ;;  %v369_v56 = vadd.f32 %v339_v47, %v327_v28  ;;  %v2498_v50 = vor.u32 %v2816_v42, %v2497_v36  ;;  %v498_v39 = vadd.f32 %v478_v24, %v428_v4  ;;  %v2163_v16 = vld [vmem:[%s4744_s5 + $0x168] sm:$0xf0]  ;;  %v2747_v48 = vld [vmem:[%s4744_s5 + $0x1e4] sm:$0xf]  ;;  %v2729_v24 = vld [vmem:[%s4744_s5 + $0x154] sm:$0xf] }
  0xdd   :  { %1651 = vmatpush.bf16.msra.mxu2 %v2006_v58  ;;  %1665 = vmatpush.bf16.msra.mxu3 %v2070_v10  ;;  %v489_v58 = vmul.f32 %v469_v46, %v3936_v41  ;;  %v2235_v10 = vld [vmem:[%s4744_s5 + $0x1f8] sm:$0xf0]  ;;  %v429_v12 = vadd.f32 %v409_v40, %v359_v55  ;;  %v2562_v41 = vor.u32 %v2832_v1, %v2561_v30  ;;  %v2227_v37 = vld [vmem:[%s4744_s5 + $0x1e8] sm:$0xf0]  ;;  %v2763_v34 = vld [vmem:[%s4744_s5 + $0x264] sm:$0xf] }
  0xde   :  { %v439_v27 = vadd.f32 %v419_v18, %v369_v56  ;;  %v1990_v43 = vor.u32 %v2687_v38, %v1987_v11  ;;  %v2054_v45 = vor.u32 %v2703_v33, %v2051_v61  ;;  %v2174_v63 = vor.u32 %v2733_v53, %v2171_v13  ;;  %v2291_v29 = vld [vmem:[%s4744_s5 + $0x268] sm:$0xf0]  ;;  %v2779_v57 = vld [vmem:[%s4744_s5 + $0x2e4] sm:$0xf]  ;;  %v2155_v25 = vld [vmem:[%s4744_s5 + $0x158] sm:$0xf0] }
  0xdf   :  { %1638 = vmatpush.bf16.msra.mxu1 %v2570_v26  ;;  %v2238_v47 = vor.u32 %v2749_v44, %v2235_v10  ;;  %v528_v23 = vmax.f32 %v508_v54, 0.0  ;;  %v2302_v9 = vor.u32 %v2765_v7, %v2299_v31  ;;  %v2366_v19 = vor.u32 %v2781_v59, %v2363_v6  ;;  %v2355_v60 = vld [vmem:[%s4744_s5 + $0x2e8] sm:$0xf0]  ;;  %v2745_v30 = vld [vmem:[%s4744_s5 + $0x1d4] sm:$0xf] }
  0xe0   :  { %1624 = vmatpush.bf16.msra.mxu0 %v2506_v8  ;;  %v499_v8 = vadd.f32 %v479_v3, %v429_v12  ;;  %v509_v20 = vadd.f32 %v489_v58, %v439_v27  ;;  %v518_v26 = vmax.f32 %v498_v39, 0.0  ;;  %v2166_v32 = vor.u32 %v2731_v2, %v2163_v16  ;;  %v2219_v1 = vld [vmem:[%s4744_s5 + $0x1d8] sm:$0xf0]  ;;  %v2761_v4 = vld [vmem:[%s4744_s5 + $0x254] sm:$0xf] }
  0xe1   :  { %1652 = vmatpush.bf16.msra.mxu2 %v1998_v14  ;;  %1666 = vmatpush.bf16.msra.mxu3 %v2062_v22  ;;  %v2230_v51 = vor.u32 %v2747_v48, %v2227_v37  ;;  %v2294_v28 = vor.u32 %v2763_v34, %v2291_v29  ;;  %v2358_v42 = vor.u32 %v2779_v57, %v2355_v60  ;;  %v2283_v40 = vld [vmem:[%s4744_s5 + $0x258] sm:$0xf0]  ;;  %v2777_v18 = vld [vmem:[%s4744_s5 + $0x2d4] sm:$0xf]  ;;  %v2727_v33 = vld [vmem:[%s4744_s5 + $0x144] sm:$0xf] }
  0xe2   :  { %v519_v14 = vmax.f32 %v499_v8, 0.0  ;;  %v529_v49 = vmax.f32 %v509_v20, 0.0  ;;  %v4323_v46 = vpack.c.bf16 %v528_v23, %v518_v26  ;;  %v2347_v22 = vld [vmem:[%s4744_s5 + $0x2d8] sm:$0xf0]  ;;  %v2158_v38 = vor.u32 %v2729_v24, %v2155_v25  ;;  %v2147_v55 = vld [vmem:[%s4744_s5 + $0x148] sm:$0xf0] }
  0xe3   :  { %1639 = vmatpush.bf16.msra.mxu1 %v2562_v41  ;;  %v2222_v11 = vor.u32 %v2745_v30, %v2219_v1  ;;  %v2286_v3 = vor.u32 %v2761_v4, %v2283_v40  ;;  %v2350_v61 = vor.u32 %v2777_v18, %v2347_v22  ;;  %v2759_v53 = vld [vmem:[%s4744_s5 + $0x244] sm:$0xf]  ;;  %v2275_v13 = vld [vmem:[%s4744_s5 + $0x248] sm:$0xf0]  ;;  %v2150_v58 = vor.u32 %v2727_v33, %v2147_v55  ;;  %v2725_v44 = vld [vmem:[%s4744_s5 + $0x134] sm:$0xf] }
  0xe4   :  { %1625 = vmatpush.bf16.msra.mxu0 %v2498_v50  ;;  %v4325_v36 = vpack.c.bf16 %v529_v49, %v519_v14  ;;  %v2775_v54 = vld [vmem:[%s4744_s5 + $0x2c4] sm:$0xf]  ;;  %v2339_v56 = vld [vmem:[%s4744_s5 + $0x2c8] sm:$0xf0]  ;;  %v2139_v10 = vld [vmem:[%s4744_s5 + $0x138] sm:$0xf0]  ;;  %v2278_v7 = vor.u32 %v2759_v53, %v2275_v13 }
  0xe5   :  { %1653 = vmatpush.bf16.msra.mxu2 %v1990_v43  ;;  %1667 = vmatpush.bf16.msra.mxu3 %v2054_v45  ;;  %v2342_v12 = vor.u32 %v2775_v54, %v2339_v56  ;;  %v2741_v41 = vld [vmem:[%s4744_s5 + $0x1b4] sm:$0xf]  ;;  %v2203_v31 = vld [vmem:[%s4744_s5 + $0x1b8] sm:$0xf0]  ;;  %v2142_v43 = vor.u32 %v2725_v44, %v2139_v10  ;;  %v2723_v8 = vld [vmem:[%s4744_s5 + $0x124] sm:$0xf] }
  0xe6   :  { %1640 = vmatmul.bf16.vlgmr.msra.gmra.mxu1 %v4325_v36  ;;  %v2757_v59 = vld [vmem:[%s4744_s5 + $0x234] sm:$0xf]  ;;  %v2267_v6 = vld [vmem:[%s4744_s5 + $0x238] sm:$0xf0]  ;;  %v2206_v45 = vor.u32 %v2741_v41, %v2203_v31  ;;  %v2131_v2 = vld [vmem:[%s4744_s5 + $0x128] sm:$0xf0] }
  0xe7   :  { %1688 = vmatpush.bf16.msrb.mxu1 %v2238_v47  ;;  %1626 = vmatmul.bf16.vlgmr.msra.gmra.mxu0 %v4323_v46  ;;  %v2773_v39 = vld [vmem:[%s4744_s5 + $0x2b4] sm:$0xf]  ;;  %v2331_v27 = vld [vmem:[%s4744_s5 + $0x2b8] sm:$0xf0]  ;;  %v2270_v16 = vor.u32 %v2757_v59, %v2267_v6  ;;  %v2739_v47 = vld [vmem:[%s4744_s5 + $0x1a4] sm:$0xf] }
  0xe8   :  { %1674 = vmatpush.bf16.msrb.mxu0 %v2174_v63  ;;  %1654 = vmatmul.bf16.vlgmr.msra.gmra.mxu2 %v3969_v62  ;;  %v2743_v62 = vld [vmem:[%s4744_s5 + $0x1c4] sm:$0xf]  ;;  %v2334_v63 = vor.u32 %v2773_v39, %v2331_v27  ;;  %v2195_v23 = vld [vmem:[%s4744_s5 + $0x1a8] sm:$0xf0]  ;;  %v2721_v29 = vld [vmem:[%s4744_s5 + $0x114] sm:$0xf] }
  0xe9   :  { %1702 = vmatpush.bf16.msrb.mxu2 %v2302_v9  ;;  %1716 = vmatpush.bf16.msrb.mxu3 %v2366_v19  ;;  %v2755_v20 = vld [vmem:[%s4744_s5 + $0x224] sm:$0xf]  ;;  %v2259_v48 = vld [vmem:[%s4744_s5 + $0x228] sm:$0xf0]  ;;  %v2134_v19 = vor.u32 %v2723_v8, %v2131_v2  ;;  %v2198_v34 = vor.u32 %v2739_v47, %v2195_v23  ;;  %v2123_v57 = vld [vmem:[%s4744_s5 + $0x118] sm:$0xf0] }
  0xea   :  { %1668 = vmatmul.bf16.vlgmr.msra.gmra.mxu3 %v3971_v0  ;;  %v2211_v0 = vld [vmem:[%s4744_s5 + $0x1c8] sm:$0xf0]  ;;  %v2771_v37 = vld [vmem:[%s4744_s5 + $0x2a4] sm:$0xf]  ;;  %v2262_v26 = vor.u32 %v2755_v20, %v2259_v48  ;;  %v2737_v49 = vld [vmem:[%s4744_s5 + $0x194] sm:$0xf] }
  0xeb   :  { %1689 = vmatpush.bf16.msrb.mxu1 %v2230_v51  ;;  %v2214_v50 = vor.u32 %v2743_v62, %v2211_v0  ;;  %v2323_v9 = vld [vmem:[%s4744_s5 + $0x2a8] sm:$0xf0]  ;;  %v2187_v60 = vld [vmem:[%s4744_s5 + $0x198] sm:$0xf0]  ;;  %v2769_v24 = vld [vmem:[%s4744_s5 + $0x294] sm:$0xf] }
  0xec   :  { %1675 = vmatpush.bf16.msrb.mxu0 %v2166_v32  ;;  %v2326_v14 = vor.u32 %v2771_v37, %v2323_v9  ;;  %v2753_v32 = vld [vmem:[%s4744_s5 + $0x214] sm:$0xf]  ;;  %v2251_v51 = vld [vmem:[%s4744_s5 + $0x218] sm:$0xf0]  ;;  %v2190_v30 = vor.u32 %v2737_v49, %v2187_v60  ;;  %v2115_v1 = vld [vmem:[%s4744_s5 + $0x108] sm:$0xf0] }
  0xed   :  { %1703 = vmatpush.bf16.msrb.mxu2 %v2294_v28  ;;  %1717 = vmatpush.bf16.msrb.mxu3 %v2358_v42  ;;  %v2315_v25 = vld [vmem:[%s4744_s5 + $0x298] sm:$0xf0]  ;;  %v2719_v28 = vld [vmem:[%s4744_s5 + $0x104] sm:$0xf]  ;;  %v2126_v42 = vor.u32 %v2721_v29, %v2123_v57  ;;  %v2179_v40 = vld [vmem:[%s4744_s5 + $0x188] sm:$0xf0]  ;;  %v2254_v18 = vor.u32 %v2753_v32, %v2251_v51 }
  0xee   :  { %v2735_v4 = vld [vmem:[%s4744_s5 + $0x184] sm:$0xf]  ;;  %v2318_v22 = vor.u32 %v2769_v24, %v2315_v25  ;;  %v2307_v55 = vld [vmem:[%s4744_s5 + $0x288] sm:$0xf0]  ;;  %v2813_v62 = vld [vmem:[%s4744_s5 + $0x3f4] sm:$0xf]  ;;  %v2118_v13 = vor.u32 %v2719_v28, %v2115_v1 }
  0xef   :  { %1690 = vmatpush.bf16.msrb.mxu1 %v2222_v11  ;;  %v2243_v11 = vld [vmem:[%s4744_s5 + $0x208] sm:$0xf0]  ;;  %v2767_v33 = vld [vmem:[%s4744_s5 + $0x284] sm:$0xf]  ;;  %v2491_v0 = vld [vmem:[%s4744_s5 + $0x3f8] sm:$0xf0]  ;;  %v2182_v54 = vor.u32 %v2735_v4, %v2179_v40 }
  0xf0   :  { %1676 = vmatpush.bf16.msrb.mxu0 %v2158_v38  ;;  %v2751_v38 = vld [vmem:[%s4744_s5 + $0x204] sm:$0xf]  ;;  %v2829_v53 = vld [vmem:[%s4744_s5 + $0x474] sm:$0xf]  ;;  %v2555_v56 = vld [vmem:[%s4744_s5 + $0x478] sm:$0xf0]  ;;  %v2310_v10 = vor.u32 %v2767_v33, %v2307_v55 }
  0xf1   :  { %1704 = vmatpush.bf16.msrb.mxu2 %v2286_v3  ;;  %1718 = vmatpush.bf16.msrb.mxu3 %v2350_v61  ;;  %v2797_v3 = vld [vmem:[%s4744_s5 + $0x374] sm:$0xf]  ;;  %v2427_v61 = vld [vmem:[%s4744_s5 + $0x378] sm:$0xf0]  ;;  %v2246_v44 = vor.u32 %v2751_v38, %v2243_v11  ;;  %v2795_v41 = vld [vmem:[%s4744_s5 + $0x364] sm:$0xf]  ;;  %v2558_v59 = vor.u32 %v2829_v53, %v2555_v56 }
  0xf2   :  { %v2419_v31 = vld [vmem:[%s4744_s5 + $0x368] sm:$0xf0]  ;;  %v2811_v39 = vld [vmem:[%s4744_s5 + $0x3e4] sm:$0xf]  ;;  %v2793_v47 = vld [vmem:[%s4744_s5 + $0x354] sm:$0xf] }
  0xf3   :  { %1691 = vmatpush.bf16.msrb.mxu1 %v2214_v50  ;;  %v2619_v50 = vld [vmem:[%s4744_s5 + $0x4f8] sm:$0xf0]  ;;  %v2483_v27 = vld [vmem:[%s4744_s5 + $0x3e8] sm:$0xf0]  ;;  %v2843_v8 = vld [vmem:[%s4744_s5 + $0x4e4] sm:$0xf] }
  0xf4   :  { %1677 = vmatpush.bf16.msrb.mxu0 %v2150_v58  ;;  %v2845_v58 = vld [vmem:[%s4744_s5 + $0x4f4] sm:$0xf]  ;;  %v2611_v2 = vld [vmem:[%s4744_s5 + $0x4e8] sm:$0xf0]  ;;  %v2411_v23 = vld [vmem:[%s4744_s5 + $0x358] sm:$0xf0] }
  0xf5   :  { %1705 = vmatpush.bf16.msrb.mxu2 %v2278_v7  ;;  %1719 = vmatpush.bf16.msrb.mxu3 %v2342_v12  ;;  %v2430_v7 = vor.u32 %v2797_v3, %v2427_v61  ;;  %v2494_v12 = vor.u32 %v2813_v62, %v2491_v0  ;;  %v2622_v6 = vor.u32 %v2845_v58, %v2619_v50  ;;  %v2809_v37 = vld [vmem:[%s4744_s5 + $0x3d4] sm:$0xf]  ;;  %v2475_v9 = vld [vmem:[%s4744_s5 + $0x3d8] sm:$0xf0]  ;;  %v2823_v32 = vld [vmem:[%s4744_s5 + $0x444] sm:$0xf] }
  0xf6   :  { %v2614_v48 = vor.u32 %v2843_v8, %v2611_v2  ;;  %v2841_v29 = vld [vmem:[%s4744_s5 + $0x4d4] sm:$0xf]  ;;  %v2603_v57 = vld [vmem:[%s4744_s5 + $0x4d8] sm:$0xf0]  ;;  %v2531_v51 = vld [vmem:[%s4744_s5 + $0x448] sm:$0xf0] }
  0xf7   :  { %1692 = vmatpush.bf16.msrb.mxu1 %v2206_v45  ;;  %v2547_v45 = vld [vmem:[%s4744_s5 + $0x468] sm:$0xf0]  ;;  %v2606_v60 = vor.u32 %v2841_v29, %v2603_v57  ;;  %v2839_v24 = vld [vmem:[%s4744_s5 + $0x4c4] sm:$0xf]  ;;  %v2395_v1 = vld [vmem:[%s4744_s5 + $0x338] sm:$0xf0]  ;;  %v2534_v4 = vor.u32 %v2823_v32, %v2531_v51 }
  0xf8   :  { %1678 = vmatpush.bf16.msrb.mxu0 %v2142_v43  ;;  %v2827_v43 = vld [vmem:[%s4744_s5 + $0x464] sm:$0xf]  ;;  %v2595_v25 = vld [vmem:[%s4744_s5 + $0x4c8] sm:$0xf0]  ;;  %v2821_v38 = vld [vmem:[%s4744_s5 + $0x434] sm:$0xf] }
  0xf9   :  { %1706 = vmatpush.bf16.msrb.mxu2 %v2270_v16  ;;  %1720 = vmatpush.bf16.msrb.mxu3 %v2334_v63  ;;  %v2422_v16 = vor.u32 %v2795_v41, %v2419_v31  ;;  %v2486_v63 = vor.u32 %v2811_v39, %v2483_v27  ;;  %v2550_v20 = vor.u32 %v2827_v43, %v2547_v45  ;;  %v2523_v11 = vld [vmem:[%s4744_s5 + $0x438] sm:$0xf0]  ;;  %v2837_v33 = vld [vmem:[%s4744_s5 + $0x4b4] sm:$0xf]  ;;  %v2787_v62 = vld [vmem:[%s4744_s5 + $0x324] sm:$0xf] }
  0xfa   :  { %v2598_v40 = vor.u32 %v2839_v24, %v2595_v25  ;;  %v2587_v55 = vld [vmem:[%s4744_s5 + $0x4b8] sm:$0xf0]  ;;  %v2387_v0 = vld [vmem:[%s4744_s5 + $0x328] sm:$0xf0]  ;;  %v2526_v53 = vor.u32 %v2821_v38, %v2523_v11  ;;  %v2819_v58 = vld [vmem:[%s4744_s5 + $0x424] sm:$0xf] }
  0xfb   :  { %1693 = vmatpush.bf16.msrb.mxu1 %v2198_v34  ;;  %v2539_v34 = vld [vmem:[%s4744_s5 + $0x458] sm:$0xf0]  ;;  %v2451_v56 = vld [vmem:[%s4744_s5 + $0x3a8] sm:$0xf0]  ;;  %v2785_v41 = vld [vmem:[%s4744_s5 + $0x314] sm:$0xf] }
  0xfc   :  { %1679 = vmatpush.bf16.msrb.mxu0 %v2134_v19  ;;  %v2825_v19 = vld [vmem:[%s4744_s5 + $0x454] sm:$0xf]  ;;  %v2515_v50 = vld [vmem:[%s4744_s5 + $0x428] sm:$0xf0]  ;;  %v2379_v31 = vld [vmem:[%s4744_s5 + $0x318] sm:$0xf0] }
  0xfd   :  { %1707 = vmatpush.bf16.msrb.mxu2 %v2262_v26  ;;  %1721 = vmatpush.bf16.msrb.mxu3 %v2326_v14  ;;  %v2791_v26 = vld [vmem:[%s4744_s5 + $0x344] sm:$0xf]  ;;  %v2403_v14 = vld [vmem:[%s4744_s5 + $0x348] sm:$0xf0]  ;;  %v2542_v49 = vor.u32 %v2825_v19, %v2539_v34  ;;  %v2801_v39 = vld [vmem:[%s4744_s5 + $0x394] sm:$0xf] }
  0xfe   :  { %v2406_v28 = vor.u32 %v2791_v26, %v2403_v14  ;;  %v2443_v27 = vld [vmem:[%s4744_s5 + $0x398] sm:$0xf0]  ;;  %v2817_v43 = vld [vmem:[%s4744_s5 + $0x414] sm:$0xf]  ;;  %v2815_v19 = vld [vmem:[%s4744_s5 + $0x404] sm:$0xf] }
  0xff   :  { %1694 = vmatpush.bf16.msrb.mxu1 %v2190_v30  ;;  %v2789_v30 = vld [vmem:[%s4744_s5 + $0x334] sm:$0xf]  ;;  %v2507_v45 = vld [vmem:[%s4744_s5 + $0x418] sm:$0xf0]  ;;  %v2499_v34 = vld [vmem:[%s4744_s5 + $0x408] sm:$0xf0] }
 0x100   :  { %1680 = vmatpush.bf16.msrb.mxu0 %v2126_v42  ;;  %v2398_v3 = vor.u32 %v2789_v30, %v2395_v1  ;;  %v2833_v8 = vld [vmem:[%s4744_s5 + $0x494] sm:$0xf]  ;;  %v2571_v2 = vld [vmem:[%s4744_s5 + $0x498] sm:$0xf0]  ;;  %v2831_v29 = vld [vmem:[%s4744_s5 + $0x484] sm:$0xf]  ;;  %v2502_v26 = vor.u32 %v2815_v19, %v2499_v34 }
 0x101   :  { %1708 = vmatpush.bf16.msrb.mxu2 %v2254_v18  ;;  %1722 = vmatpush.bf16.msrb.mxu3 %v2318_v22  ;;  %v2805_v18 = vld [vmem:[%s4744_s5 + $0x3b4] sm:$0xf]  ;;  %v2459_v22 = vld [vmem:[%s4744_s5 + $0x3b8] sm:$0xf0]  ;;  %v2563_v57 = vld [vmem:[%s4744_s5 + $0x488] sm:$0xf0] }
 0x102   :  { %v2462_v61 = vor.u32 %v2805_v18, %v2459_v22  ;;  %v2566_v14 = vor.u32 %v2831_v29, %v2563_v57  ;;  %v2849_v32 = vld [vmem:[%s4746_s7 + $0x10] sm:$0xff]  ;;  %v4696_v25 = vld [vmem:[%s4745_s6] sm:$0x3]  ;;  %v2848_v1 = vld [vmem:[%s4746_s7 + $0x8] sm:$0xff] }
 0x103   :  { %1695 = vmatpush.bf16.msrb.mxu1 %v2182_v54  ;;  %v2803_v54 = vld [vmem:[%s4744_s5 + $0x3a4] sm:$0xf]  ;;  %v2858_v34 = vld [vmem:[%s4746_s7 + $0x58] sm:$0xff]  ;;  %v2857_v29 = vld [vmem:[%s4746_s7 + $0x50] sm:$0xff] }
 0x104   :  { %1681 = vmatpush.bf16.msrb.mxu0 %v2118_v13  ;;  %v2590_v13 = vor.u32 %v2837_v33, %v2587_v55  ;;  %v2847_v22 = vld [vmem:[%s4746_s7] sm:$0xff] }
 0x105   :  { %1709 = vmatpush.bf16.msrb.mxu2 %v2246_v44  ;;  %1723 = vmatpush.bf16.msrb.mxu3 %v2310_v10  ;;  %v2835_v44 = vld [vmem:[%s4744_s5 + $0x4a4] sm:$0xf]  ;;  %v2579_v10 = vld [vmem:[%s4744_s5 + $0x4a8] sm:$0xf0] }
 0x106   :  { %1696 = vmatmul.bf16.vlgmr.msrb.gmra.mxu1 %v3975_v15  ;;  %v2478_v15 = vor.u32 %v2809_v37, %v2475_v9  ;;  %v2799_v37 = vld [vmem:[%s4744_s5 + $0x384] sm:$0xf]  ;;  %v2435_v9 = vld [vmem:[%s4744_s5 + $0x388] sm:$0xf0] }
 0x107   :  { %1744 = vmatpush.bf16.msra.mxu1 %v2494_v12  ;;  %1682 = vmatmul.bf16.vlgmr.msrb.gmra.mxu0 %v3973_v35  ;;  %v2414_v35 = vor.u32 %v2793_v47, %v2411_v23  ;;  %v2454_v12 = vor.u32 %v2803_v54, %v2451_v56  ;;  %v2783_v47 = vld [vmem:[%s4744_s5 + $0x304] sm:$0xf]  ;;  %v2371_v23 = vld [vmem:[%s4744_s5 + $0x308] sm:$0xf0] }
 0x108   :  { %1730 = vmatpush.bf16.msra.mxu0 %v2430_v7  ;;  %1710 = vmatmul.bf16.vlgmr.msrb.gmra.mxu2 %v4117_v17  ;;  %v2807_v17 = vld [vmem:[%s4744_s5 + $0x3c4] sm:$0xf]  ;;  %v2390_v7 = vor.u32 %v2787_v62, %v2387_v0 }
 0x109   :  { %1758 = vmatpush.bf16.msra.mxu2 %v2558_v59  ;;  %1772 = vmatpush.bf16.msra.mxu3 %v2622_v6  ;;  %v2518_v59 = vor.u32 %v2819_v58, %v2515_v50  ;;  %v2582_v6 = vor.u32 %v2835_v44, %v2579_v10  ;;  %v2859_v19 = vld [vmem:[%s4746_s7 + $0x60] sm:$0xff] }
 0x10a   :  { %1724 = vmatmul.bf16.vlgmr.msrb.gmra.mxu3 %v4140_v52  ;;  %v2467_v52 = vld [vmem:[%s4744_s5 + $0x3c8] sm:$0xf0] }
 0x10b   :  { %1745 = vmatpush.bf16.msra.mxu1 %v2486_v63  ;;  %v2470_v42 = vor.u32 %v2807_v17, %v2467_v52  ;;  %v2446_v63 = vor.u32 %v2801_v39, %v2443_v27  ;;  %v2850_v17 = vld [vmem:[%s4746_s7 + $0x18] sm:$0xff] }
 0x10c   :  { %1731 = vmatpush.bf16.msra.mxu0 %v2422_v16  ;;  %v2382_v16 = vor.u32 %v2785_v41, %v2379_v31 }
 0x10d   :  { %1759 = vmatpush.bf16.msra.mxu2 %v2550_v20  ;;  %1773 = vmatpush.bf16.msra.mxu3 %v2614_v48  ;;  %v2510_v20 = vor.u32 %v2817_v43, %v2507_v45  ;;  %v2574_v48 = vor.u32 %v2833_v8, %v2571_v2 }
 0x10f   :  { %1746 = vmatpush.bf16.msra.mxu1 %v2478_v15  ;;  %v2438_v15 = vor.u32 %v2799_v37, %v2435_v9 }
 0x110   :  { %1732 = vmatpush.bf16.msra.mxu0 %v2414_v35  ;;  %v2374_v35 = vor.u32 %v2783_v47, %v2371_v23  ;;  %v2862_v23 = vld [vmem:[%s4746_s7 + $0x78] sm:$0xff] }
 0x111   :  { %1760 = vmatpush.bf16.msra.mxu2 %v2542_v49  ;;  %1774 = vmatpush.bf16.msra.mxu3 %v2606_v60  ;;  %v2854_v49 = vld [vmem:[%s4746_s7 + $0x38] sm:$0xff]  ;;  %v2853_v60 = vld [vmem:[%s4746_s7 + $0x30] sm:$0xff] }
 0x113   :  { %1747 = vmatpush.bf16.msra.mxu1 %v2470_v42  ;;  %v702_v42 = vperm.slane %v4696_v25, 0 }
 0x114   :  { %1733 = vmatpush.bf16.msra.mxu0 %v2406_v28 }
 0x115   :  { %1761 = vmatpush.bf16.msra.mxu2 %v2534_v4  ;;  %1775 = vmatpush.bf16.msra.mxu3 %v2598_v40 }
 0x117   :  { %1748 = vmatpush.bf16.msra.mxu1 %v2462_v61 }
 0x118   :  { %1734 = vmatpush.bf16.msra.mxu0 %v2398_v3 }
 0x119   :  { %1762 = vmatpush.bf16.msra.mxu2 %v2526_v53  ;;  %1776 = vmatpush.bf16.msra.mxu3 %v2590_v13 }
 0x11b   :  { %1749 = vmatpush.bf16.msra.mxu1 %v2454_v12 }
 0x11c   :  { %1735 = vmatpush.bf16.msra.mxu0 %v2390_v7 }
 0x11d   :  { %1763 = vmatpush.bf16.msra.mxu2 %v2518_v59  ;;  %1777 = vmatpush.bf16.msra.mxu3 %v2582_v6 }
 0x11f   :  { %1750 = vmatpush.bf16.msra.mxu1 %v2446_v63 }
 0x120   :  { %1736 = vmatpush.bf16.msra.mxu0 %v2382_v16 }
 0x121   :  { %1764 = vmatpush.bf16.msra.mxu2 %v2510_v20  ;;  %1778 = vmatpush.bf16.msra.mxu3 %v2574_v48  ;;  %v2861_v20 = vld [vmem:[%s4746_s7 + $0x70] sm:$0xff]  ;;  %v2860_v48 = vld [vmem:[%s4746_s7 + $0x68] sm:$0xff] }
 0x123   :  { %1751 = vmatpush.bf16.msra.mxu1 %v2438_v15 }
 0x124   :  { %1737 = vmatpush.bf16.msra.mxu0 %v2374_v35 }
 0x125   :  { %1765 = vmatpush.bf16.msra.mxu2 %v2502_v26  ;;  %1779 = vmatpush.bf16.msra.mxu3 %v2566_v14  ;;  %v703_v14 = vperm.slane %v4696_v25, 1 }
 0x126   :  { %1752 = vmatmul.bf16.vlgmr.msra.gmra.mxu1 %v4190_v5  ;;  %v2851_v5 = vld [vmem:[%s4746_s7 + $0x20] sm:$0xff] }
 0x127   :  { %1738 = vmatmul.bf16.vlgmr.msra.gmra.mxu0 %v4188_v21  ;;  %v2852_v21 = vld [vmem:[%s4746_s7 + $0x28] sm:$0xff]  ;;  %1934 = vmatpush.bf16.msrb.mxu1 %v2862_v23 }
 0x128   :  { %1766 = vmatmul.bf16.vlgmr.msra.gmra.mxu2 %v4323_v46  ;;  %1780 = vmatmul.bf16.vlgmr.msra.gmra.mxu3 %v4325_v36 }
 0x129   :  { %1920 = vmatpush.bf16.msrb.mxu0 %v2854_v49  ;;  %v2856_v49 = vld [vmem:[%s4746_s7 + $0x48] sm:$0xff] }
 0x12b   :  { %1935 = vmatpush.bf16.msrb.mxu1 %v2861_v20 }
 0x12d   :  { %1921 = vmatpush.bf16.msrb.mxu0 %v2853_v60 }
 0x12f   :  { %1936 = vmatpush.bf16.msrb.mxu1 %v2860_v48 }
 0x131   :  { %1922 = vmatpush.bf16.msrb.mxu0 %v2852_v21 }
 0x133   :  { %1937 = vmatpush.bf16.msrb.mxu1 %v2859_v19 }
 0x135   :  { %1923 = vmatpush.bf16.msrb.mxu0 %v2851_v5 }
 0x137   :  { %1938 = vmatpush.bf16.msrb.mxu1 %v2858_v34 }
 0x139   :  { %1924 = vmatpush.bf16.msrb.mxu0 %v2850_v17 }
 0x13b   :  { %1939 = vmatpush.bf16.msrb.mxu1 %v2857_v29 }
 0x13d   :  { %1925 = vmatpush.bf16.msrb.mxu0 %v2849_v32 }
 0x13f   :  { %v1515_v46 = vpop.f32.mrf.mxu0  ;;  %v1529_v36 = vpop.f32.mrf.mxu1  ;;  %1940 = vmatpush.bf16.msrb.mxu1 %v2856_v49 }
 0x140   :  { %v1516_v18 = vadd.f32 %v1515_v46, %v702_v42  ;;  %v2855_v46 = vld [vmem:[%s4746_s7 + $0x40] sm:$0xff] }
 0x141   :  { %1926 = vmatpush.bf16.msrb.mxu0 %v2848_v1 }
 0x142   :  { %v1530_v33 = vadd.f32 %v1529_v36, %v1516_v18 }
 0x143   :  { %1941 = vmatpush.bf16.msrb.mxu1 %v2855_v46 }
 0x145   :  { %1927 = vmatpush.bf16.msrb.mxu0 %v2847_v22 }
 0x146   :  { %v1543_v52 = vpop.f32.mrf.mxu2  ;;  %v1557_v28 = vpop.f32.mrf.mxu3 }
 0x147   :  { %v1517_v51 = vpop.f32.mrf.mxu0  ;;  %v1531_v24 = vpop.f32.mrf.mxu1  ;;  %v1544_v55 = vadd.f32 %v1543_v52, %v1530_v33 }
 0x148   :  { %v1518_v38 = vadd.f32 %v1517_v51, %v702_v42 }
 0x149   :  { %v1558_v13 = vadd.f32 %v1557_v28, %v1544_v55 }
 0x14a   :  { %v1532_v3 = vadd.f32 %v1531_v24, %v1518_v38 }
 0x14e   :  { %v1545_v30 = vpop.f32.mrf.mxu2  ;;  %v1559_v11 = vpop.f32.mrf.mxu3 }
 0x14f   :  { %v1571_v4 = vpop.f32.mrf.mxu0  ;;  %v1585_v40 = vpop.f32.mrf.mxu1  ;;  %v1546_v53 = vadd.f32 %v1545_v30, %v1532_v3 }
 0x150   :  { %v1572_v56 = vadd.f32 %v1571_v4, %v1558_v13 }
 0x151   :  { %v1560_v54 = vadd.f32 %v1559_v11, %v1546_v53 }
 0x152   :  { %v1586_v44 = vadd.f32 %v1585_v40, %v1572_v56 }
 0x157   :  { %v1573_v62 = vpop.f32.mrf.mxu0  ;;  %v1587_v0 = vpop.f32.mrf.mxu1 }
 0x158   :  { %v1574_v50 = vadd.f32 %v1573_v62, %v1560_v54 }
 0x159   :  { %v1599_v61 = vpop.f32.mrf.mxu2  ;;  %v1613_v58 = vpop.f32.mrf.mxu3 }
 0x15a   :  { %v1600_v41 = vadd.f32 %v1599_v61, %v1586_v44  ;;  %v1588_v31 = vadd.f32 %v1587_v0, %v1574_v50 }
 0x15c   :  { %v1614_v6 = vadd.f32 %v1613_v58, %v1600_v41  ;;  %v2867_v41 = vld [vmem:[%s4747_s8] ss:$0 sm:$0xff] }
 0x161   :  { %v1601_v10 = vpop.f32.mrf.mxu2  ;;  %v1615_v39 = vpop.f32.mrf.mxu3 }
 0x162   :  { %v1602_v59 = vadd.f32 %v1601_v10, %v1588_v31 }
 0x163   :  { %v1641_v12 = vpop.f32.mrf.mxu1 }
 0x164   :  { %v1627_v7 = vpop.f32.mrf.mxu0  ;;  %v1616_v27 = vadd.f32 %v1615_v39, %v1602_v59 }
 0x165   :  { %v1628_v43 = vadd.f32 %v1627_v7, %v1614_v6 }
 0x167   :  { %v1642_v16 = vadd.f32 %v1641_v12, %v1628_v43 }
 0x16b   :  { %v1643_v2 = vpop.f32.mrf.mxu1  ;;  %v1655_v37 = vpop.f32.mrf.mxu2 }
 0x16c   :  { %v1629_v45 = vpop.f32.mrf.mxu0  ;;  %v1656_v5 = vadd.f32 %v1655_v37, %v703_v14 }
 0x16d   :  { %v1630_v8 = vadd.f32 %v1629_v45, %v1616_v27  ;;  %v1669_v9 = vpop.f32.mrf.mxu3 }
 0x16e   :  { %v1670_v52 = vadd.f32 %v1669_v9, %v1656_v5 }
 0x16f   :  { %v1644_v63 = vadd.f32 %v1643_v2, %v1630_v8 }
 0x171   :  { %v1786_v47 = vpack.c.bf16 %v1644_v63, %v1642_v16 }
 0x173   :  { %1928 = vmatmul.bf16.vlgmr.msrb.gmra.mxu0 %v1786_v47  ;;  %v1657_v57 = vpop.f32.mrf.mxu2 }
 0x174   :  { %v1658_v36 = vadd.f32 %v1657_v57, %v703_v14 }
 0x175   :  { %v1671_v35 = vpop.f32.mrf.mxu3 }
 0x176   :  { %v1672_v51 = vadd.f32 %v1671_v35, %v1658_v36 }
 0x183   :  { %v1697_v26 = vpop.f32.mrf.mxu1 }
 0x184   :  { %v1683_v15 = vpop.f32.mrf.mxu0 }
 0x185   :  { %v1684_v24 = vadd.f32 %v1683_v15, %v1670_v52 }
 0x187   :  { %v1698_v30 = vadd.f32 %v1697_v26, %v1684_v24 }
 0x18b   :  { %v1711_v60 = vpop.f32.mrf.mxu2  ;;  %v1699_v32 = vpop.f32.mrf.mxu1 }
 0x18c   :  { %v1685_v17 = vpop.f32.mrf.mxu0  ;;  %v1712_v4 = vadd.f32 %v1711_v60, %v1698_v30 }
 0x18d   :  { %v1725_v21 = vpop.f32.mrf.mxu3  ;;  %v1686_v25 = vadd.f32 %v1685_v17, %v1672_v51 }
 0x18e   :  { %v1726_v38 = vadd.f32 %v1725_v21, %v1712_v4 }
 0x18f   :  { %v1700_v40 = vadd.f32 %v1699_v32, %v1686_v25 }
 0x193   :  { %v1713_v28 = vpop.f32.mrf.mxu2 }
 0x194   :  { %v1714_v22 = vadd.f32 %v1713_v28, %v1700_v40 }
 0x195   :  { %v1727_v42 = vpop.f32.mrf.mxu3 }
 0x196   :  { %v1728_v55 = vadd.f32 %v1727_v42, %v1714_v22 }
 0x1a3   :  { %v1753_v18 = vpop.f32.mrf.mxu1 }
 0x1a4   :  { %v1739_v1 = vpop.f32.mrf.mxu0 }
 0x1a5   :  { %v1740_v3 = vadd.f32 %v1739_v1, %v1726_v38 }
 0x1a7   :  { %v1754_v0 = vadd.f32 %v1753_v18, %v1740_v3 }
 0x1ab   :  { %v1767_v11 = vpop.f32.mrf.mxu2  ;;  %v1781_v33 = vpop.f32.mrf.mxu3 }
 0x1ac   :  { %v1741_v61 = vpop.f32.mrf.mxu0  ;;  %v1755_v53 = vpop.f32.mrf.mxu1  ;;  %v1768_v13 = vadd.f32 %v1767_v11, %v1754_v0 }
 0x1ad   :  { %v1742_v62 = vadd.f32 %v1741_v61, %v1728_v55 }
 0x1ae   :  { %v1782_v44 = vadd.f32 %v1781_v33, %v1768_v13 }
 0x1af   :  { %v1756_v54 = vadd.f32 %v1755_v53, %v1742_v62 }
 0x1b3   :  { %v1769_v56 = vpop.f32.mrf.mxu2  ;;  %v1783_v50 = vpop.f32.mrf.mxu3 }
 0x1b4   :  { %v1770_v58 = vadd.f32 %v1769_v56, %v1756_v54 }
 0x1b6   :  { %v1784_v10 = vadd.f32 %v1783_v50, %v1770_v58 }
 0x1b8   :  { %v1787_v7 = vpack.c.bf16 %v1784_v10, %v1782_v44 }
 0x1ba   :  { %1942 = vmatmul.bf16.vlgmr.msrb.gmra.mxu1 %v1787_v7 }
 0x1f0   :  { %v1929_v12 = vpop.f32.mrf.mxu0 }
 0x1f1   :  { %v1930_v31 = vadd.f32 %v2867_v41, %v1929_v12 }
 0x1f8   :  { %v1931_v39 = vpop.f32.mrf.mxu0 }
 0x1f9   :  { %v1932_v27 = vadd.f32 %v2867_v41, %v1931_v39 }
 0x237   :  { %v1943_v59 = vpop.f32.mrf.mxu1 }
 0x238   :  { %v1944_v6 = vadd.f32 %v1943_v59, %v1930_v31 }
 0x23a   :  { %1948 = vst [vmem:[%s4748_s9] sm:$0xff] %v1944_v6 }
 0x23f   :  { %v1945_v43 = vpop.f32.mrf.mxu1 }
 0x240   :  { %v1946_v45 = vadd.f32 %v1945_v43, %v1932_v27 }
 0x242   :  { %1949 = vst [vmem:[%s4748_s9 + $0x8] sm:$0xff] %v1946_v45 }
 0x243   :  { %1954 = vsyncpa [#allocation3], 1 }
 0x244   :  { %1955 = vsyncpa [#allocation9], 1 }
 0x245   :  { %1956 = vsyncpa [#allocation4], 1 }
 0x246   :  { %1957 = vsyncpa [#allocation6], 1 }

</bundles_post_ra>
